<compile_context>
chip_gen: v6e
topology: v6e:2x2x1
jax: 0.10.0
libtpu: 0.0.40
codegen_flags: <defaults>
</compile_context>

<pallas_src>
import functools
import math

import jax
import jax.numpy as jnp
from jax.experimental import pallas as pl
from jax.experimental.pallas import tpu as pltpu


# ------------------------------------------------------------------ fused kernel --
def _fused_layers_kernel(
        x_ref, pos_ref, u_ref, v_ref, hw_ref, hb_ref,
        ln1g_ref, ln1b_ref, wqkv_ref, wp_ref, wout_ref,
        g1wy_ref, g1by_ref, g1wx_ref, g1bx_ref, g1ug_ref, g1bg_ref,
        ln2g_ref, ln2b_ref,
        ffw1_ref, ffb1_ref, ffw2_ref, ffb2_ref,
        g2wy_ref, g2by_ref, g2wx_ref, g2bx_ref, g2ug_ref, g2bg_ref,
        out_ref,
        x_scr, attn_scr,
        *, S, B, H, d, D, bg):
    l = pl.program_id(0)
    n_layers = pl.num_programs(0)
    Hd = H * d
    inv_sqrt_d = 1.0 / math.sqrt(d)

    @pl.when(l == 0)
    def _():
        x_scr[...] = x_ref[...]          # activation slab becomes VMEM-resident

    x = x_scr[...]                       # [B*S, D]

    def layernorm(val, gam, bet):
        mu = jnp.mean(val, axis=-1, keepdims=True)
        var = jnp.mean((val - mu) * (val - mu), axis=-1, keepdims=True)
        return (val - mu) * jax.lax.rsqrt(var + 1e-5) * gam + bet

    def gru_gate(x_in, y_in, wy, by, wx, bx, ug, bug):
        # GTrXL GRU gating with fused weight matmuls:
        #   ly = y @ [Wr|Wz|Wg],  lx = x @ [Ur|Uz]
        ly = jnp.dot(y_in, wy, preferred_element_type=jnp.float32) + by      # [N, 3D]
        lx = jnp.dot(x_in, wx, preferred_element_type=jnp.float32) + bx      # [N, 2D]
        r = jax.nn.sigmoid(ly[:, :D] + lx[:, :D])
        z = jax.nn.sigmoid(ly[:, D:2 * D] + lx[:, D:2 * D] - bg)
        hcand = jnp.tanh(ly[:, 2 * D:] +
                         jnp.dot(r * x_in, ug, preferred_element_type=jnp.float32) + bug)
        return (1.0 - z) * x_in + z * hcand

    # ---------------- sub-layer 1: LN -> relative-position MHA -> GRU gate ----------------
    src2 = layernorm(x, ln1g_ref[...], ln1b_ref[...])                        # [N, D]

    qkv = jnp.dot(src2, wqkv_ref[...], preferred_element_type=jnp.float32)   # [N, 3*Hd]
    p2d = jnp.dot(pos_ref[...], wp_ref[...], preferred_element_type=jnp.float32)  # [S, Hd]
    u_all = u_ref[...]                                                       # [H, d]
    v_all = v_ref[...]                                                       # [H, d]

    # causal mask + Transformer-XL rel_shift gather pattern, generated in-kernel (no HBM mask)
    ii = jax.lax.broadcasted_iota(jnp.int32, (S, S), 0)
    jj = jax.lax.broadcasted_iota(jnp.int32, (S, S), 1)
    causal = jj > ii                       # True -> masked (prev_seq == 0)
    tgt = (S - 1) - ii + jj                # rel_shift source column for (i, j), valid for j <= i

    for b in range(B):
        r0 = b * S
        for h in range(H):
            c0 = h * d
            q_bh = qkv[r0:r0 + S, c0:c0 + d]                                 # [S, d]
            k_bh = qkv[r0:r0 + S, Hd + c0:Hd + c0 + d]                       # [S, d]
            v_bh = qkv[r0:r0 + S, 2 * Hd + c0:2 * Hd + c0 + d]               # [S, d]
            p_h = p2d[:, c0:c0 + d]                                          # [S, d]

            # TXL content/position biases; pre-scale by 1/sqrt(d) instead of scaling [S,S] scores
            qu = (q_bh + u_all[h:h + 1, :]) * inv_sqrt_d
            qv = (q_bh + v_all[h:h + 1, :]) * inv_sqrt_d

            content = jax.lax.dot_general(qu, k_bh, (((1,), (1,)), ((), ())),
                                          preferred_element_type=jnp.float32)   # [S, S]
            pos_raw = jax.lax.dot_general(qv, p_h, (((1,), (1,)), ((), ())),
                                          preferred_element_type=jnp.float32)   # [S, S]

            # exact TXL rel_shift for the unmasked region (j <= i); j > i is masked below anyway
            shifted = jnp.zeros((S, S), jnp.float32)
            for kk in range(S):
                shifted = shifted + jnp.where(tgt == kk, pos_raw[:, kk:kk + 1], 0.0)

            scores = jnp.where(causal, -1e30, content + shifted)
            mx = jnp.max(scores, axis=-1, keepdims=True)
            e = jnp.exp(scores - mx)
            probs = e * pl.reciprocal(jnp.sum(e, axis=-1, keepdims=True), approx=True)

            attn_scr[r0:r0 + S, c0:c0 + d] = jnp.dot(
                probs, v_bh, preferred_element_type=jnp.float32)

    attn_proj = jnp.dot(attn_scr[...], wout_ref[...],
                        preferred_element_type=jnp.float32)                  # [N, D]
    src = gru_gate(x, attn_proj, g1wy_ref[...], g1by_ref[...],
                   g1wx_ref[...], g1bx_ref[...], g1ug_ref[...], g1bg_ref[...])

    # ---------------- sub-layer 2: LN -> position-wise FF (ReLU) -> GRU gate ----------------
    src_n = layernorm(src, ln2g_ref[...], ln2b_ref[...])
    hmid = jnp.maximum(
        jnp.dot(src_n, ffw1_ref[...], preferred_element_type=jnp.float32) + ffb1_ref[...],
        0.0)
    ff = jnp.dot(hmid, ffw2_ref[...], preferred_element_type=jnp.float32) + ffb2_ref[...]
    out_x = gru_gate(src, ff, g2wy_ref[...], g2by_ref[...],
                     g2wx_ref[...], g2bx_ref[...], g2ug_ref[...], g2bg_ref[...])

    x_scr[...] = out_x                   # carry to next layer (next grid step)

    # ---------------- policy head (linear + softmax), fused into the last grid step ---------
    @pl.when(l == n_layers - 1)
    def _():
        logits = jnp.dot(out_x, hw_ref[...],
                         preferred_element_type=jnp.float32) + hb_ref[...]
        mx = jnp.max(logits, axis=-1, keepdims=True)
        e = jnp.exp(logits - mx)
        out_ref[...] = e / jnp.sum(e, axis=-1, keepdims=True)   # exact divide for the head


# --------------------------------------------------------------------- wrapper --
def transformer_policy_forward(params, state, *, n_heads, d_head, act_dim, bg=0.1):
    """state: [seq, batch, state_dim] -> action probabilities [seq, batch, act_dim]."""
    S, B, D = state.shape
    H, d = n_heads, d_head
    A = act_dim
    Hd = H * d
    L = params["w_qkv"].shape[0]
    F = params["ff_w1"].shape[-1]
    N = B * S
    assert D % 2 == 0

    # sinusoidal relative position embeddings for positions S-1 .. 0 (prev_seq == 0)
    pos = jnp.arange(S - 1, -1, -1, dtype=jnp.float32)
    inv_freq = 1.0 / (10000.0 ** (jnp.arange(0, D, 2, dtype=jnp.float32) / D))
    sin_inp = pos[:, None] * inv_freq[None, :]
    pos_emb = jnp.concatenate([jnp.sin(sin_inp), jnp.cos(sin_inp)], axis=-1)   # [S, D]

    # batch-major activation slab: one transpose outside the fused kernel
    x0 = state.astype(jnp.float32).transpose(1, 0, 2).reshape(N, D)

    def cspec(*shape):                       # same (whole) block every grid step
        zeros = (0,) * len(shape)
        return pl.BlockSpec(shape, lambda l: zeros)

    def lspec(*shape):                       # per-layer stacked weight, leading L squeezed
        zeros = (0,) * len(shape)
        return pl.BlockSpec((None,) + shape, lambda l: (l,) + zeros)

    kernel = functools.partial(_fused_layers_kernel,
                               S=S, B=B, H=H, d=d, D=D, bg=bg)

    probs2d = pl.pallas_call(
        kernel,
        out_shape=jax.ShapeDtypeStruct((N, A), jnp.float32),
        grid=(L,),
        in_specs=[
            cspec(N, D), cspec(S, D), cspec(H, d), cspec(H, d),
            cspec(D, A), cspec(1, A),
            lspec(1, D), lspec(1, D),                              # ln1
            lspec(D, 3 * Hd), lspec(D, Hd), lspec(Hd, D),          # fused qkv / pos / out proj
            lspec(D, 3 * D), lspec(1, 3 * D),                      # gate1 y-path [Wr|Wz|Wg]
            lspec(D, 2 * D), lspec(1, 2 * D),                      # gate1 x-path [Ur|Uz]
            lspec(D, D), lspec(1, D),                              # gate1 Ug
            lspec(1, D), lspec(1, D),                              # ln2
            lspec(D, F), lspec(1, F), lspec(F, D), lspec(1, D),    # feed-forward
            lspec(D, 3 * D), lspec(1, 3 * D),                      # gate2 y-path
            lspec(D, 2 * D), lspec(1, 2 * D),                      # gate2 x-path
            lspec(D, D), lspec(1, D),                              # gate2 Ug
        ],
        out_specs=pl.BlockSpec((N, A), lambda l: (0, 0)),
        scratch_shapes=[pltpu.VMEM((N, D), jnp.float32),           # resident activations
                        pltpu.VMEM((N, Hd), jnp.float32)],         # attention head outputs
        compiler_params=pltpu.CompilerParams(
            dimension_semantics=("arbitrary",)),                   # layers carry state
    )(
        x0, pos_emb, params["u"], params["v"], params["head_w"], params["head_b"],
        params["ln1_g"], params["ln1_b"],
        params["w_qkv"], params["w_p"], params["w_out"],
        params["g1_wy"], params["g1_by"], params["g1_wx"], params["g1_bx"],
        params["g1_ug"], params["g1_bug"],
        params["ln2_g"], params["ln2_b"],
        params["ff_w1"], params["ff_b1"], params["ff_w2"], params["ff_b2"],
        params["g2_wy"], params["g2_by"], params["g2_wx"], params["g2_bx"],
        params["g2_ug"], params["g2_bug"],
    )

    return probs2d.reshape(B, S, A).transpose(1, 0, 2)     # back to [seq, batch, act_dim]


# ------------------------------------------------------------------- params --
def init_params(key, *, state_dim, act_dim, n_layers, n_heads, d_head, d_ff):
    D, H, d, F, A, L = state_dim, n_heads, d_head, d_ff, act_dim, n_layers
    Hd = H * d
    keys = iter(jax.random.split(key, L * 40 + 8))

    def w(din, dout):
        s = 1.0 / math.sqrt(din)
        return jax.random.uniform(next(keys), (din, dout), jnp.float32, -s, s)

    def bvec(din, dout):
        s = 1.0 / math.sqrt(din)
        return jax.random.uniform(next(keys), (1, dout), jnp.float32, -s, s)

    def gate():
        wy = jnp.concatenate([w(D, D), w(D, D), w(D, D)], axis=1)       # [Wr|Wz|Wg]
        by = jnp.concatenate([bvec(D, D), bvec(D, D), bvec(D, D)], axis=1)
        wx = jnp.concatenate([w(D, D), w(D, D)], axis=1)                # [Ur|Uz]
        bx = jnp.concatenate([bvec(D, D), bvec(D, D)], axis=1)
        return wy, by, wx, bx, w(D, D), bvec(D, D)

    names = ["ln1_g", "ln1_b", "w_qkv", "w_p", "w_out",
             "g1_wy", "g1_by", "g1_wx", "g1_bx", "g1_ug", "g1_bug",
             "ln2_g", "ln2_b", "ff_w1", "ff_b1", "ff_w2", "ff_b2",
             "g2_wy", "g2_by", "g2_wx", "g2_bx", "g2_ug", "g2_bug"]
    per_layer = {k: [] for k in names}
    for _ in range(L):
        per_layer["ln1_g"].append(jnp.ones((1, D), jnp.float32))
        per_layer["ln1_b"].append(jnp.zeros((1, D), jnp.float32))
        per_layer["ln2_g"].append(jnp.ones((1, D), jnp.float32))
        per_layer["ln2_b"].append(jnp.zeros((1, D), jnp.float32))
        per_layer["w_qkv"].append(jnp.concatenate([w(D, Hd), w(D, 2 * Hd)], axis=1))
        per_layer["w_p"].append(w(D, Hd))
        per_layer["w_out"].append(w(Hd, D))
        for tag in ("g1", "g2"):
            wy, by, wx, bx, ug, bug = gate()
            per_layer[f"{tag}_wy"].append(wy); per_layer[f"{tag}_by"].append(by)
            per_layer[f"{tag}_wx"].append(wx); per_layer[f"{tag}_bx"].append(bx)
            per_layer[f"{tag}_ug"].append(ug); per_layer[f"{tag}_bug"].append(bug)
        per_layer["ff_w1"].append(w(D, F)); per_layer["ff_b1"].append(bvec(D, F))
        per_layer["ff_w2"].append(w(F, D)); per_layer["ff_b2"].append(bvec(F, D))

    params = {k: jnp.stack(v, axis=0) for k, v in per_layer.items()}
    # reference zero-inits the global TXL u/v biases; small random here (synthetic weights)
    params["u"] = 0.02 * jax.random.normal(next(keys), (H, d), jnp.float32)
    params["v"] = 0.02 * jax.random.normal(next(keys), (H, d), jnp.float32)
    params["head_w"] = w(D, A)
    params["head_b"] = bvec(D, A)
    return params


# --------------------------------------------------------------------- main --
if __name__ == "__main__":
    SEQ, BATCH = 8, 2
    STATE_DIM, ACT_DIM = 32, 4
    N_LAYERS, N_HEADS, D_HEAD, D_FF = 2, 4, 16, 64

    key = jax.random.PRNGKey(0)
    pkey, xkey = jax.random.split(key)
    params = init_params(pkey, state_dim=STATE_DIM, act_dim=ACT_DIM,
                         n_layers=N_LAYERS, n_heads=N_HEADS,
                         d_head=D_HEAD, d_ff=D_FF)
    state = jax.random.normal(xkey, (SEQ, BATCH, STATE_DIM), jnp.float32)

    fwd = jax.jit(functools.partial(transformer_policy_forward,
                                    n_heads=N_HEADS, d_head=D_HEAD, act_dim=ACT_DIM))
    out = jax.block_until_ready(fwd(params, state))

    assert out.shape == (SEQ, BATCH, ACT_DIM)
    assert bool(jnp.all(jnp.isfinite(out)))
    assert bool(jnp.allclose(jnp.sum(out, axis=-1), 1.0, atol=1e-4))
    print("KERNEL_OK")
</pallas_src>

<mosaic_0001>
module attributes {stable_mosaic.version = 11 : i64} {
  func.func @_fused_layers_kernel(%arg0: i32, %arg1: memref<16x32xf32, #tpu.memory_space<vmem>>, %arg2: memref<8x32xf32, #tpu.memory_space<vmem>>, %arg3: memref<4x16xf32, #tpu.memory_space<vmem>>, %arg4: memref<4x16xf32, #tpu.memory_space<vmem>>, %arg5: memref<32x4xf32, #tpu.memory_space<vmem>>, %arg6: memref<1x4xf32, #tpu.memory_space<vmem>>, %arg7: memref<1x1x32xf32, #tpu.memory_space<vmem>>, %arg8: memref<1x1x32xf32, #tpu.memory_space<vmem>>, %arg9: memref<1x32x192xf32, #tpu.memory_space<vmem>>, %arg10: memref<1x32x64xf32, #tpu.memory_space<vmem>>, %arg11: memref<1x64x32xf32, #tpu.memory_space<vmem>>, %arg12: memref<1x32x96xf32, #tpu.memory_space<vmem>>, %arg13: memref<1x1x96xf32, #tpu.memory_space<vmem>>, %arg14: memref<1x32x64xf32, #tpu.memory_space<vmem>>, %arg15: memref<1x1x64xf32, #tpu.memory_space<vmem>>, %arg16: memref<1x32x32xf32, #tpu.memory_space<vmem>>, %arg17: memref<1x1x32xf32, #tpu.memory_space<vmem>>, %arg18: memref<1x1x32xf32, #tpu.memory_space<vmem>>, %arg19: memref<1x1x32xf32, #tpu.memory_space<vmem>>, %arg20: memref<1x32x64xf32, #tpu.memory_space<vmem>>, %arg21: memref<1x1x64xf32, #tpu.memory_space<vmem>>, %arg22: memref<1x64x32xf32, #tpu.memory_space<vmem>>, %arg23: memref<1x1x32xf32, #tpu.memory_space<vmem>>, %arg24: memref<1x32x96xf32, #tpu.memory_space<vmem>>, %arg25: memref<1x1x96xf32, #tpu.memory_space<vmem>>, %arg26: memref<1x32x64xf32, #tpu.memory_space<vmem>>, %arg27: memref<1x1x64xf32, #tpu.memory_space<vmem>>, %arg28: memref<1x32x32xf32, #tpu.memory_space<vmem>>, %arg29: memref<1x1x32xf32, #tpu.memory_space<vmem>>, %arg30: memref<16x4xf32, #tpu.memory_space<vmem>>, %arg31: memref<16x32xf32, #tpu.memory_space<vmem>>, %arg32: memref<16x64xf32, #tpu.memory_space<vmem>>) attributes {dimension_semantics = [#tpu.dimension_semantics<arbitrary>], iteration_bounds = array<i64: 2>, scalar_prefetch = 0 : i64, scratch_operands = 2 : i64, tpu.core_type = #tpu.core_type<tc>, window_params = [{pipeline_mode = #tpu.pipeline_mode<synchronous>, transform_indices = @transform_0, window_bounds = array<i64: 16, 32>}, {pipeline_mode = #tpu.pipeline_mode<synchronous>, transform_indices = @transform_1, window_bounds = array<i64: 8, 32>}, {pipeline_mode = #tpu.pipeline_mode<synchronous>, transform_indices = @transform_2, window_bounds = array<i64: 4, 16>}, {pipeline_mode = #tpu.pipeline_mode<synchronous>, transform_indices = @transform_3, window_bounds = array<i64: 4, 16>}, {pipeline_mode = #tpu.pipeline_mode<synchronous>, transform_indices = @transform_4, window_bounds = array<i64: 32, 4>}, {pipeline_mode = #tpu.pipeline_mode<synchronous>, transform_indices = @transform_5, window_bounds = array<i64: 1, 4>}, {transform_indices = @transform_6, window_bounds = array<i64: 1, 1, 32>}, {transform_indices = @transform_7, window_bounds = array<i64: 1, 1, 32>}, {transform_indices = @transform_8, window_bounds = array<i64: 1, 32, 192>}, {transform_indices = @transform_9, window_bounds = array<i64: 1, 32, 64>}, {transform_indices = @transform_10, window_bounds = array<i64: 1, 64, 32>}, {transform_indices = @transform_11, window_bounds = array<i64: 1, 32, 96>}, {transform_indices = @transform_12, window_bounds = array<i64: 1, 1, 96>}, {transform_indices = @transform_13, window_bounds = array<i64: 1, 32, 64>}, {transform_indices = @transform_14, window_bounds = array<i64: 1, 1, 64>}, {transform_indices = @transform_15, window_bounds = array<i64: 1, 32, 32>}, {transform_indices = @transform_16, window_bounds = array<i64: 1, 1, 32>}, {transform_indices = @transform_17, window_bounds = array<i64: 1, 1, 32>}, {transform_indices = @transform_18, window_bounds = array<i64: 1, 1, 32>}, {transform_indices = @transform_19, window_bounds = array<i64: 1, 32, 64>}, {transform_indices = @transform_20, window_bounds = array<i64: 1, 1, 64>}, {transform_indices = @transform_21, window_bounds = array<i64: 1, 64, 32>}, {transform_indices = @transform_22, window_bounds = array<i64: 1, 1, 32>}, {transform_indices = @transform_23, window_bounds = array<i64: 1, 32, 96>}, {transform_indices = @transform_24, window_bounds = array<i64: 1, 1, 96>}, {transform_indices = @transform_25, window_bounds = array<i64: 1, 32, 64>}, {transform_indices = @transform_26, window_bounds = array<i64: 1, 1, 64>}, {transform_indices = @transform_27, window_bounds = array<i64: 1, 32, 32>}, {transform_indices = @transform_28, window_bounds = array<i64: 1, 1, 32>}, {pipeline_mode = #tpu.pipeline_mode<synchronous>, transform_indices = @transform_29, window_bounds = array<i64: 16, 4>}]} {
    %c0_i32 = arith.constant 0 : i32
    %0 = arith.cmpi eq, %arg0, %c0_i32 : i32
    %1 = arith.extui %0 : i1 to i32
    %c0_i32_0 = arith.constant 0 : i32
    %2 = arith.cmpi ne, %1, %c0_i32_0 : i32
    scf.if %2 {
      %c0_318 = arith.constant 0 : index
      %c0_319 = arith.constant 0 : index
      %963 = vector.load %arg1[%c0_318, %c0_319] : memref<16x32xf32, #tpu.memory_space<vmem>>, vector<16x32xf32>
      %c0_320 = arith.constant 0 : index
      %c0_321 = arith.constant 0 : index
      %964 = vector.load %arg31[%c0_320, %c0_321] : memref<16x32xf32, #tpu.memory_space<vmem>>, vector<16x32xf32>
      tpu.vector_store %arg31[%c0_320, %c0_321], %963 {strides = array<i32>} : memref<16x32xf32, #tpu.memory_space<vmem>>, vector<16x32xf32>,
    } else {
    }
    %c0 = arith.constant 0 : index
    %c0_1 = arith.constant 0 : index
    %3 = vector.load %arg31[%c0, %c0_1] : memref<16x32xf32, #tpu.memory_space<vmem>>, vector<16x32xf32>
    %c0_2 = arith.constant 0 : index
    %c0_3 = arith.constant 0 : index
    %c0_4 = arith.constant 0 : index
    %4 = vector.load %arg7[%c0_2, %c0_3, %c0_4] : memref<1x1x32xf32, #tpu.memory_space<vmem>>, vector<1x1x32xf32>
    %5 = vector.shape_cast %4 : vector<1x1x32xf32> to vector<1x32xf32>
    %c0_5 = arith.constant 0 : index
    %c0_6 = arith.constant 0 : index
    %c0_7 = arith.constant 0 : index
    %6 = vector.load %arg8[%c0_5, %c0_6, %c0_7] : memref<1x1x32xf32, #tpu.memory_space<vmem>>, vector<1x1x32xf32>
    %7 = vector.shape_cast %6 : vector<1x1x32xf32> to vector<1x32xf32>
    %cst = arith.constant dense<0.000000e+00> : vector<16xf32>
    %8 = vector.multi_reduction <add>, %3, %cst [1] : vector<16x32xf32> to vector<16xf32>
    %9 = vector.shape_cast %8 : vector<16xf32> to vector<16x1xf32>
    %cst_8 = arith.constant 3.200000e+01 : f32
    %10 = vector.broadcast %cst_8 : f32 to vector<16x1xf32>
    %11 = arith.divf %9, %10 : vector<16x1xf32>
    %12 = vector.broadcast %11 : vector<16x1xf32> to vector<16x32xf32>
    %13 = arith.subf %3, %12 : vector<16x32xf32>
    %14 = vector.broadcast %11 : vector<16x1xf32> to vector<16x32xf32>
    %15 = arith.subf %3, %14 : vector<16x32xf32>
    %16 = arith.mulf %13, %15 : vector<16x32xf32>
    %cst_9 = arith.constant dense<0.000000e+00> : vector<16xf32>
    %17 = vector.multi_reduction <add>, %16, %cst_9 [1] : vector<16x32xf32> to vector<16xf32>
    %18 = vector.shape_cast %17 : vector<16xf32> to vector<16x1xf32>
    %cst_10 = arith.constant 3.200000e+01 : f32
    %19 = vector.broadcast %cst_10 : f32 to vector<16x1xf32>
    %20 = arith.divf %18, %19 : vector<16x1xf32>
    %21 = vector.broadcast %11 : vector<16x1xf32> to vector<16x32xf32>
    %22 = arith.subf %3, %21 : vector<16x32xf32>
    %cst_11 = arith.constant 9.99999974E-6 : f32
    %23 = vector.broadcast %cst_11 : f32 to vector<16x1xf32>
    %24 = arith.addf %20, %23 : vector<16x1xf32>
    %25 = math.rsqrt %24 : vector<16x1xf32>
    %26 = vector.broadcast %25 : vector<16x1xf32> to vector<16x32xf32>
    %27 = arith.mulf %22, %26 : vector<16x32xf32>
    %28 = vector.broadcast %5 : vector<1x32xf32> to vector<16x32xf32>
    %29 = arith.mulf %27, %28 : vector<16x32xf32>
    %30 = vector.broadcast %7 : vector<1x32xf32> to vector<16x32xf32>
    %31 = arith.addf %29, %30 : vector<16x32xf32>
    %c0_12 = arith.constant 0 : index
    %c0_13 = arith.constant 0 : index
    %c0_14 = arith.constant 0 : index
    %32 = vector.load %arg9[%c0_12, %c0_13, %c0_14] : memref<1x32x192xf32, #tpu.memory_space<vmem>>, vector<1x32x192xf32>
    %33 = vector.shape_cast %32 : vector<1x32x192xf32> to vector<32x192xf32>
    %cst_15 = arith.constant dense<0.000000e+00> : vector<16x192xf32>
    %34 = tpu.matmul %31, %33, %cst_15 {dimension_numbers = #tpu.dot_dimension_numbers<[1], [0], [0], [1], [0, 0, 1, 1], [], []>} : vector<16x32xf32>, vector<32x192xf32>, vector<16x192xf32> -> vector<16x192xf32>
    %c0_16 = arith.constant 0 : index
    %c0_17 = arith.constant 0 : index
    %35 = vector.load %arg2[%c0_16, %c0_17] : memref<8x32xf32, #tpu.memory_space<vmem>>, vector<8x32xf32>
    %c0_18 = arith.constant 0 : index
    %c0_19 = arith.constant 0 : index
    %c0_20 = arith.constant 0 : index
    %36 = vector.load %arg10[%c0_18, %c0_19, %c0_20] : memref<1x32x64xf32, #tpu.memory_space<vmem>>, vector<1x32x64xf32>
    %37 = vector.shape_cast %36 : vector<1x32x64xf32> to vector<32x64xf32>
    %cst_21 = arith.constant dense<0.000000e+00> : vector<8x64xf32>
    %38 = tpu.matmul %35, %37, %cst_21 {dimension_numbers = #tpu.dot_dimension_numbers<[1], [0], [0], [1], [0, 0, 1, 1], [], []>} : vector<8x32xf32>, vector<32x64xf32>, vector<8x64xf32> -> vector<8x64xf32>
    %c0_22 = arith.constant 0 : index
    %c0_23 = arith.constant 0 : index
    %39 = vector.load %arg3[%c0_22, %c0_23] : memref<4x16xf32, #tpu.memory_space<vmem>>, vector<4x16xf32>
    %c0_24 = arith.constant 0 : index
    %c0_25 = arith.constant 0 : index
    %40 = vector.load %arg4[%c0_24, %c0_25] : memref<4x16xf32, #tpu.memory_space<vmem>>, vector<4x16xf32>
    %41 = tpu.iota {dimensions = array<i32: 0>} : vector<8x8xi32>
    %42 = tpu.iota {dimensions = array<i32: 1>} : vector<8x8xi32>
    %43 = arith.cmpi sgt, %42, %41 : vector<8x8xi32>
    %c7_i32 = arith.constant 7 : i32
    %44 = vector.broadcast %c7_i32 : i32 to vector<8x8xi32>
    %45 = arith.subi %44, %41 : vector<8x8xi32>
    %46 = arith.addi %45, %42 : vector<8x8xi32>
    %47 = vector.extract_strided_slice %34 {offsets = [0, 0], sizes = [8, 16], strides = [1, 1]} : vector<16x192xf32> to vector<8x16xf32>
    %48 = vector.extract_strided_slice %34 {offsets = [0, 64], sizes = [8, 16], strides = [1, 1]} : vector<16x192xf32> to vector<8x16xf32>
    %49 = vector.extract_strided_slice %34 {offsets = [0, 128], sizes = [8, 16], strides = [1, 1]} : vector<16x192xf32> to vector<8x16xf32>
    %50 = vector.extract_strided_slice %38 {offsets = [0, 0], sizes = [8, 16], strides = [1, 1]} : vector<8x64xf32> to vector<8x16xf32>
    %51 = vector.extract_strided_slice %39 {offsets = [0, 0], sizes = [1, 16], strides = [1, 1]} : vector<4x16xf32> to vector<1x16xf32>
    %52 = vector.broadcast %51 : vector<1x16xf32> to vector<8x16xf32>
    %53 = arith.addf %47, %52 : vector<8x16xf32>
    %cst_26 = arith.constant 2.500000e-01 : f32
    %54 = vector.broadcast %cst_26 : f32 to vector<8x16xf32>
    %55 = arith.mulf %53, %54 : vector<8x16xf32>
    %56 = vector.extract_strided_slice %40 {offsets = [0, 0], sizes = [1, 16], strides = [1, 1]} : vector<4x16xf32> to vector<1x16xf32>
    %57 = vector.broadcast %56 : vector<1x16xf32> to vector<8x16xf32>
    %58 = arith.addf %47, %57 : vector<8x16xf32>
    %cst_27 = arith.constant 2.500000e-01 : f32
    %59 = vector.broadcast %cst_27 : f32 to vector<8x16xf32>
    %60 = arith.mulf %58, %59 : vector<8x16xf32>
    %cst_28 = arith.constant dense<0.000000e+00> : vector<8x8xf32>
    %61 = tpu.matmul %55, %48, %cst_28 {dimension_numbers = #tpu.dot_dimension_numbers<[1], [1], [0], [0], [0, 0, 1, 0], [], []>} : vector<8x16xf32>, vector<8x16xf32>, vector<8x8xf32> -> vector<8x8xf32>
    %cst_29 = arith.constant dense<0.000000e+00> : vector<8x8xf32>
    %62 = tpu.matmul %60, %50, %cst_29 {dimension_numbers = #tpu.dot_dimension_numbers<[1], [1], [0], [0], [0, 0, 1, 0], [], []>} : vector<8x16xf32>, vector<8x16xf32>, vector<8x8xf32> -> vector<8x8xf32>
    %cst_30 = arith.constant 0.000000e+00 : f32
    %63 = vector.broadcast %cst_30 : f32 to vector<8x8xf32>
    %c0_i32_31 = arith.constant 0 : i32
    %64 = vector.broadcast %c0_i32_31 : i32 to vector<8x8xi32>
    %65 = arith.cmpi eq, %46, %64 : vector<8x8xi32>
    %66 = vector.extract_strided_slice %62 {offsets = [0, 0], sizes = [8, 1], strides = [1, 1]} : vector<8x8xf32> to vector<8x1xf32>
    %cst_32 = arith.constant 0.000000e+00 : f32
    %67 = vector.shape_cast %66 : vector<8x1xf32> to vector<8x1xf32>
    %68 = vector.broadcast %67 : vector<8x1xf32> to vector<8x8xf32>
    %69 = vector.broadcast %cst_32 : f32 to vector<8x8xf32>
    %70 = arith.select %65, %68, %69 : vector<8x8xi1>, vector<8x8xf32>
    %71 = arith.addf %63, %70 : vector<8x8xf32>
    %c1_i32 = arith.constant 1 : i32
    %72 = vector.broadcast %c1_i32 : i32 to vector<8x8xi32>
    %73 = arith.cmpi eq, %46, %72 : vector<8x8xi32>
    %74 = vector.extract_strided_slice %62 {offsets = [0, 1], sizes = [8, 1], strides = [1, 1]} : vector<8x8xf32> to vector<8x1xf32>
    %cst_33 = arith.constant 0.000000e+00 : f32
    %75 = vector.shape_cast %74 : vector<8x1xf32> to vector<8x1xf32>
    %76 = vector.broadcast %75 : vector<8x1xf32> to vector<8x8xf32>
    %77 = vector.broadcast %cst_33 : f32 to vector<8x8xf32>
    %78 = arith.select %73, %76, %77 : vector<8x8xi1>, vector<8x8xf32>
    %79 = arith.addf %71, %78 : vector<8x8xf32>
    %c2_i32 = arith.constant 2 : i32
    %80 = vector.broadcast %c2_i32 : i32 to vector<8x8xi32>
    %81 = arith.cmpi eq, %46, %80 : vector<8x8xi32>
    %82 = vector.extract_strided_slice %62 {offsets = [0, 2], sizes = [8, 1], strides = [1, 1]} : vector<8x8xf32> to vector<8x1xf32>
    %cst_34 = arith.constant 0.000000e+00 : f32
    %83 = vector.shape_cast %82 : vector<8x1xf32> to vector<8x1xf32>
    %84 = vector.broadcast %83 : vector<8x1xf32> to vector<8x8xf32>
    %85 = vector.broadcast %cst_34 : f32 to vector<8x8xf32>
    %86 = arith.select %81, %84, %85 : vector<8x8xi1>, vector<8x8xf32>
    %87 = arith.addf %79, %86 : vector<8x8xf32>
    %c3_i32 = arith.constant 3 : i32
    %88 = vector.broadcast %c3_i32 : i32 to vector<8x8xi32>
    %89 = arith.cmpi eq, %46, %88 : vector<8x8xi32>
    %90 = vector.extract_strided_slice %62 {offsets = [0, 3], sizes = [8, 1], strides = [1, 1]} : vector<8x8xf32> to vector<8x1xf32>
    %cst_35 = arith.constant 0.000000e+00 : f32
    %91 = vector.shape_cast %90 : vector<8x1xf32> to vector<8x1xf32>
    %92 = vector.broadcast %91 : vector<8x1xf32> to vector<8x8xf32>
    %93 = vector.broadcast %cst_35 : f32 to vector<8x8xf32>
    %94 = arith.select %89, %92, %93 : vector<8x8xi1>, vector<8x8xf32>
    %95 = arith.addf %87, %94 : vector<8x8xf32>
    %c4_i32 = arith.constant 4 : i32
    %96 = vector.broadcast %c4_i32 : i32 to vector<8x8xi32>
    %97 = arith.cmpi eq, %46, %96 : vector<8x8xi32>
    %98 = vector.extract_strided_slice %62 {offsets = [0, 4], sizes = [8, 1], strides = [1, 1]} : vector<8x8xf32> to vector<8x1xf32>
    %cst_36 = arith.constant 0.000000e+00 : f32
    %99 = vector.shape_cast %98 : vector<8x1xf32> to vector<8x1xf32>
    %100 = vector.broadcast %99 : vector<8x1xf32> to vector<8x8xf32>
    %101 = vector.broadcast %cst_36 : f32 to vector<8x8xf32>
    %102 = arith.select %97, %100, %101 : vector<8x8xi1>, vector<8x8xf32>
    %103 = arith.addf %95, %102 : vector<8x8xf32>
    %c5_i32 = arith.constant 5 : i32
    %104 = vector.broadcast %c5_i32 : i32 to vector<8x8xi32>
    %105 = arith.cmpi eq, %46, %104 : vector<8x8xi32>
    %106 = vector.extract_strided_slice %62 {offsets = [0, 5], sizes = [8, 1], strides = [1, 1]} : vector<8x8xf32> to vector<8x1xf32>
    %cst_37 = arith.constant 0.000000e+00 : f32
    %107 = vector.shape_cast %106 : vector<8x1xf32> to vector<8x1xf32>
    %108 = vector.broadcast %107 : vector<8x1xf32> to vector<8x8xf32>
    %109 = vector.broadcast %cst_37 : f32 to vector<8x8xf32>
    %110 = arith.select %105, %108, %109 : vector<8x8xi1>, vector<8x8xf32>
    %111 = arith.addf %103, %110 : vector<8x8xf32>
    %c6_i32 = arith.constant 6 : i32
    %112 = vector.broadcast %c6_i32 : i32 to vector<8x8xi32>
    %113 = arith.cmpi eq, %46, %112 : vector<8x8xi32>
    %114 = vector.extract_strided_slice %62 {offsets = [0, 6], sizes = [8, 1], strides = [1, 1]} : vector<8x8xf32> to vector<8x1xf32>
    %cst_38 = arith.constant 0.000000e+00 : f32
    %115 = vector.shape_cast %114 : vector<8x1xf32> to vector<8x1xf32>
    %116 = vector.broadcast %115 : vector<8x1xf32> to vector<8x8xf32>
    %117 = vector.broadcast %cst_38 : f32 to vector<8x8xf32>
    %118 = arith.select %113, %116, %117 : vector<8x8xi1>, vector<8x8xf32>
    %119 = arith.addf %111, %118 : vector<8x8xf32>
    %c7_i32_39 = arith.constant 7 : i32
    %120 = vector.broadcast %c7_i32_39 : i32 to vector<8x8xi32>
    %121 = arith.cmpi eq, %46, %120 : vector<8x8xi32>
    %122 = vector.extract_strided_slice %62 {offsets = [0, 7], sizes = [8, 1], strides = [1, 1]} : vector<8x8xf32> to vector<8x1xf32>
    %cst_40 = arith.constant 0.000000e+00 : f32
    %123 = vector.shape_cast %122 : vector<8x1xf32> to vector<8x1xf32>
    %124 = vector.broadcast %123 : vector<8x1xf32> to vector<8x8xf32>
    %125 = vector.broadcast %cst_40 : f32 to vector<8x8xf32>
    %126 = arith.select %121, %124, %125 : vector<8x8xi1>, vector<8x8xf32>
    %127 = arith.addf %119, %126 : vector<8x8xf32>
    %128 = arith.addf %61, %127 : vector<8x8xf32>
    %cst_41 = arith.constant -1.000000e+30 : f32
    %129 = vector.broadcast %cst_41 : f32 to vector<8x8xf32>
    %130 = arith.select %43, %129, %128 : vector<8x8xi1>, vector<8x8xf32>
    %cst_42 = arith.constant dense<0xFF800000> : vector<8xf32>
    %131 = vector.multi_reduction <maximumf>, %130, %cst_42 [1] : vector<8x8xf32> to vector<8xf32>
    %132 = vector.shape_cast %131 : vector<8xf32> to vector<8x1xf32>
    %133 = vector.broadcast %132 : vector<8x1xf32> to vector<8x8xf32>
    %134 = arith.subf %130, %133 : vector<8x8xf32>
    %135 = math.exp %134 : vector<8x8xf32>
    %cst_43 = arith.constant dense<0.000000e+00> : vector<8xf32>
    %136 = vector.multi_reduction <add>, %135, %cst_43 [1] : vector<8x8xf32> to vector<8xf32>
    %137 = vector.shape_cast %136 : vector<8xf32> to vector<8x1xf32>
    %138 = tpu.reciprocal %137 {approx = true} : vector<8x1xf32> -> vector<8x1xf32>
    %139 = vector.broadcast %138 : vector<8x1xf32> to vector<8x8xf32>
    %140 = arith.mulf %135, %139 : vector<8x8xf32>
    %cst_44 = arith.constant dense<0.000000e+00> : vector<8x16xf32>
    %141 = tpu.matmul %140, %49, %cst_44 {dimension_numbers = #tpu.dot_dimension_numbers<[1], [0], [0], [1], [0, 0, 1, 1], [], []>} : vector<8x8xf32>, vector<8x16xf32>, vector<8x16xf32> -> vector<8x16xf32>
    %c0_45 = arith.constant 0 : index
    %c0_46 = arith.constant 0 : index
    %142 = vector.load %arg32[%c0_45, %c0_46] : memref<16x64xf32, #tpu.memory_space<vmem>>, vector<8x16xf32>
    tpu.vector_store %arg32[%c0_45, %c0_46], %141 {strides = array<i32>} : memref<16x64xf32, #tpu.memory_space<vmem>>, vector<8x16xf32>,
    %143 = vector.extract_strided_slice %34 {offsets = [0, 16], sizes = [8, 16], strides = [1, 1]} : vector<16x192xf32> to vector<8x16xf32>
    %144 = vector.extract_strided_slice %34 {offsets = [0, 80], sizes = [8, 16], strides = [1, 1]} : vector<16x192xf32> to vector<8x16xf32>
    %145 = vector.extract_strided_slice %34 {offsets = [0, 144], sizes = [8, 16], strides = [1, 1]} : vector<16x192xf32> to vector<8x16xf32>
    %146 = vector.extract_strided_slice %38 {offsets = [0, 16], sizes = [8, 16], strides = [1, 1]} : vector<8x64xf32> to vector<8x16xf32>
    %147 = vector.extract_strided_slice %39 {offsets = [1, 0], sizes = [1, 16], strides = [1, 1]} : vector<4x16xf32> to vector<1x16xf32>
    %148 = vector.broadcast %147 : vector<1x16xf32> to vector<8x16xf32>
    %149 = arith.addf %143, %148 : vector<8x16xf32>
    %cst_47 = arith.constant 2.500000e-01 : f32
    %150 = vector.broadcast %cst_47 : f32 to vector<8x16xf32>
    %151 = arith.mulf %149, %150 : vector<8x16xf32>
    %152 = vector.extract_strided_slice %40 {offsets = [1, 0], sizes = [1, 16], strides = [1, 1]} : vector<4x16xf32> to vector<1x16xf32>
    %153 = vector.broadcast %152 : vector<1x16xf32> to vector<8x16xf32>
    %154 = arith.addf %143, %153 : vector<8x16xf32>
    %cst_48 = arith.constant 2.500000e-01 : f32
    %155 = vector.broadcast %cst_48 : f32 to vector<8x16xf32>
    %156 = arith.mulf %154, %155 : vector<8x16xf32>
    %cst_49 = arith.constant dense<0.000000e+00> : vector<8x8xf32>
    %157 = tpu.matmul %151, %144, %cst_49 {dimension_numbers = #tpu.dot_dimension_numbers<[1], [1], [0], [0], [0, 0, 1, 0], [], []>} : vector<8x16xf32>, vector<8x16xf32>, vector<8x8xf32> -> vector<8x8xf32>
    %cst_50 = arith.constant dense<0.000000e+00> : vector<8x8xf32>
    %158 = tpu.matmul %156, %146, %cst_50 {dimension_numbers = #tpu.dot_dimension_numbers<[1], [1], [0], [0], [0, 0, 1, 0], [], []>} : vector<8x16xf32>, vector<8x16xf32>, vector<8x8xf32> -> vector<8x8xf32>
    %cst_51 = arith.constant 0.000000e+00 : f32
    %159 = vector.broadcast %cst_51 : f32 to vector<8x8xf32>
    %c0_i32_52 = arith.constant 0 : i32
    %160 = vector.broadcast %c0_i32_52 : i32 to vector<8x8xi32>
    %161 = arith.cmpi eq, %46, %160 : vector<8x8xi32>
    %162 = vector.extract_strided_slice %158 {offsets = [0, 0], sizes = [8, 1], strides = [1, 1]} : vector<8x8xf32> to vector<8x1xf32>
    %cst_53 = arith.constant 0.000000e+00 : f32
    %163 = vector.shape_cast %162 : vector<8x1xf32> to vector<8x1xf32>
    %164 = vector.broadcast %163 : vector<8x1xf32> to vector<8x8xf32>
    %165 = vector.broadcast %cst_53 : f32 to vector<8x8xf32>
    %166 = arith.select %161, %164, %165 : vector<8x8xi1>, vector<8x8xf32>
    %167 = arith.addf %159, %166 : vector<8x8xf32>
    %c1_i32_54 = arith.constant 1 : i32
    %168 = vector.broadcast %c1_i32_54 : i32 to vector<8x8xi32>
    %169 = arith.cmpi eq, %46, %168 : vector<8x8xi32>
    %170 = vector.extract_strided_slice %158 {offsets = [0, 1], sizes = [8, 1], strides = [1, 1]} : vector<8x8xf32> to vector<8x1xf32>
    %cst_55 = arith.constant 0.000000e+00 : f32
    %171 = vector.shape_cast %170 : vector<8x1xf32> to vector<8x1xf32>
    %172 = vector.broadcast %171 : vector<8x1xf32> to vector<8x8xf32>
    %173 = vector.broadcast %cst_55 : f32 to vector<8x8xf32>
    %174 = arith.select %169, %172, %173 : vector<8x8xi1>, vector<8x8xf32>
    %175 = arith.addf %167, %174 : vector<8x8xf32>
    %c2_i32_56 = arith.constant 2 : i32
    %176 = vector.broadcast %c2_i32_56 : i32 to vector<8x8xi32>
    %177 = arith.cmpi eq, %46, %176 : vector<8x8xi32>
    %178 = vector.extract_strided_slice %158 {offsets = [0, 2], sizes = [8, 1], strides = [1, 1]} : vector<8x8xf32> to vector<8x1xf32>
    %cst_57 = arith.constant 0.000000e+00 : f32
    %179 = vector.shape_cast %178 : vector<8x1xf32> to vector<8x1xf32>
    %180 = vector.broadcast %179 : vector<8x1xf32> to vector<8x8xf32>
    %181 = vector.broadcast %cst_57 : f32 to vector<8x8xf32>
    %182 = arith.select %177, %180, %181 : vector<8x8xi1>, vector<8x8xf32>
    %183 = arith.addf %175, %182 : vector<8x8xf32>
    %c3_i32_58 = arith.constant 3 : i32
    %184 = vector.broadcast %c3_i32_58 : i32 to vector<8x8xi32>
    %185 = arith.cmpi eq, %46, %184 : vector<8x8xi32>
    %186 = vector.extract_strided_slice %158 {offsets = [0, 3], sizes = [8, 1], strides = [1, 1]} : vector<8x8xf32> to vector<8x1xf32>
    %cst_59 = arith.constant 0.000000e+00 : f32
    %187 = vector.shape_cast %186 : vector<8x1xf32> to vector<8x1xf32>
    %188 = vector.broadcast %187 : vector<8x1xf32> to vector<8x8xf32>
    %189 = vector.broadcast %cst_59 : f32 to vector<8x8xf32>
    %190 = arith.select %185, %188, %189 : vector<8x8xi1>, vector<8x8xf32>
    %191 = arith.addf %183, %190 : vector<8x8xf32>
    %c4_i32_60 = arith.constant 4 : i32
    %192 = vector.broadcast %c4_i32_60 : i32 to vector<8x8xi32>
    %193 = arith.cmpi eq, %46, %192 : vector<8x8xi32>
    %194 = vector.extract_strided_slice %158 {offsets = [0, 4], sizes = [8, 1], strides = [1, 1]} : vector<8x8xf32> to vector<8x1xf32>
    %cst_61 = arith.constant 0.000000e+00 : f32
    %195 = vector.shape_cast %194 : vector<8x1xf32> to vector<8x1xf32>
    %196 = vector.broadcast %195 : vector<8x1xf32> to vector<8x8xf32>
    %197 = vector.broadcast %cst_61 : f32 to vector<8x8xf32>
    %198 = arith.select %193, %196, %197 : vector<8x8xi1>, vector<8x8xf32>
    %199 = arith.addf %191, %198 : vector<8x8xf32>
    %c5_i32_62 = arith.constant 5 : i32
    %200 = vector.broadcast %c5_i32_62 : i32 to vector<8x8xi32>
    %201 = arith.cmpi eq, %46, %200 : vector<8x8xi32>
    %202 = vector.extract_strided_slice %158 {offsets = [0, 5], sizes = [8, 1], strides = [1, 1]} : vector<8x8xf32> to vector<8x1xf32>
    %cst_63 = arith.constant 0.000000e+00 : f32
    %203 = vector.shape_cast %202 : vector<8x1xf32> to vector<8x1xf32>
    %204 = vector.broadcast %203 : vector<8x1xf32> to vector<8x8xf32>
    %205 = vector.broadcast %cst_63 : f32 to vector<8x8xf32>
    %206 = arith.select %201, %204, %205 : vector<8x8xi1>, vector<8x8xf32>
    %207 = arith.addf %199, %206 : vector<8x8xf32>
    %c6_i32_64 = arith.constant 6 : i32
    %208 = vector.broadcast %c6_i32_64 : i32 to vector<8x8xi32>
    %209 = arith.cmpi eq, %46, %208 : vector<8x8xi32>
    %210 = vector.extract_strided_slice %158 {offsets = [0, 6], sizes = [8, 1], strides = [1, 1]} : vector<8x8xf32> to vector<8x1xf32>
    %cst_65 = arith.constant 0.000000e+00 : f32
    %211 = vector.shape_cast %210 : vector<8x1xf32> to vector<8x1xf32>
    %212 = vector.broadcast %211 : vector<8x1xf32> to vector<8x8xf32>
    %213 = vector.broadcast %cst_65 : f32 to vector<8x8xf32>
    %214 = arith.select %209, %212, %213 : vector<8x8xi1>, vector<8x8xf32>
    %215 = arith.addf %207, %214 : vector<8x8xf32>
    %c7_i32_66 = arith.constant 7 : i32
    %216 = vector.broadcast %c7_i32_66 : i32 to vector<8x8xi32>
    %217 = arith.cmpi eq, %46, %216 : vector<8x8xi32>
    %218 = vector.extract_strided_slice %158 {offsets = [0, 7], sizes = [8, 1], strides = [1, 1]} : vector<8x8xf32> to vector<8x1xf32>
    %cst_67 = arith.constant 0.000000e+00 : f32
    %219 = vector.shape_cast %218 : vector<8x1xf32> to vector<8x1xf32>
    %220 = vector.broadcast %219 : vector<8x1xf32> to vector<8x8xf32>
    %221 = vector.broadcast %cst_67 : f32 to vector<8x8xf32>
    %222 = arith.select %217, %220, %221 : vector<8x8xi1>, vector<8x8xf32>
    %223 = arith.addf %215, %222 : vector<8x8xf32>
    %224 = arith.addf %157, %223 : vector<8x8xf32>
    %cst_68 = arith.constant -1.000000e+30 : f32
    %225 = vector.broadcast %cst_68 : f32 to vector<8x8xf32>
    %226 = arith.select %43, %225, %224 : vector<8x8xi1>, vector<8x8xf32>
    %cst_69 = arith.constant dense<0xFF800000> : vector<8xf32>
    %227 = vector.multi_reduction <maximumf>, %226, %cst_69 [1] : vector<8x8xf32> to vector<8xf32>
    %228 = vector.shape_cast %227 : vector<8xf32> to vector<8x1xf32>
    %229 = vector.broadcast %228 : vector<8x1xf32> to vector<8x8xf32>
    %230 = arith.subf %226, %229 : vector<8x8xf32>
    %231 = math.exp %230 : vector<8x8xf32>
    %cst_70 = arith.constant dense<0.000000e+00> : vector<8xf32>
    %232 = vector.multi_reduction <add>, %231, %cst_70 [1] : vector<8x8xf32> to vector<8xf32>
    %233 = vector.shape_cast %232 : vector<8xf32> to vector<8x1xf32>
    %234 = tpu.reciprocal %233 {approx = true} : vector<8x1xf32> -> vector<8x1xf32>
    %235 = vector.broadcast %234 : vector<8x1xf32> to vector<8x8xf32>
    %236 = arith.mulf %231, %235 : vector<8x8xf32>
    %cst_71 = arith.constant dense<0.000000e+00> : vector<8x16xf32>
    %237 = tpu.matmul %236, %145, %cst_71 {dimension_numbers = #tpu.dot_dimension_numbers<[1], [0], [0], [1], [0, 0, 1, 1], [], []>} : vector<8x8xf32>, vector<8x16xf32>, vector<8x16xf32> -> vector<8x16xf32>
    %c0_72 = arith.constant 0 : index
    %c16 = arith.constant 16 : index
    %238 = vector.load %arg32[%c0_72, %c16] : memref<16x64xf32, #tpu.memory_space<vmem>>, vector<8x16xf32>
    tpu.vector_store %arg32[%c0_72, %c16], %237 {strides = array<i32>} : memref<16x64xf32, #tpu.memory_space<vmem>>, vector<8x16xf32>,
    %239 = vector.extract_strided_slice %34 {offsets = [0, 32], sizes = [8, 16], strides = [1, 1]} : vector<16x192xf32> to vector<8x16xf32>
    %240 = vector.extract_strided_slice %34 {offsets = [0, 96], sizes = [8, 16], strides = [1, 1]} : vector<16x192xf32> to vector<8x16xf32>
    %241 = vector.extract_strided_slice %34 {offsets = [0, 160], sizes = [8, 16], strides = [1, 1]} : vector<16x192xf32> to vector<8x16xf32>
    %242 = vector.extract_strided_slice %38 {offsets = [0, 32], sizes = [8, 16], strides = [1, 1]} : vector<8x64xf32> to vector<8x16xf32>
    %243 = vector.extract_strided_slice %39 {offsets = [2, 0], sizes = [1, 16], strides = [1, 1]} : vector<4x16xf32> to vector<1x16xf32>
    %244 = vector.broadcast %243 : vector<1x16xf32> to vector<8x16xf32>
    %245 = arith.addf %239, %244 : vector<8x16xf32>
    %cst_73 = arith.constant 2.500000e-01 : f32
    %246 = vector.broadcast %cst_73 : f32 to vector<8x16xf32>
    %247 = arith.mulf %245, %246 : vector<8x16xf32>
    %248 = vector.extract_strided_slice %40 {offsets = [2, 0], sizes = [1, 16], strides = [1, 1]} : vector<4x16xf32> to vector<1x16xf32>
    %249 = vector.broadcast %248 : vector<1x16xf32> to vector<8x16xf32>
    %250 = arith.addf %239, %249 : vector<8x16xf32>
    %cst_74 = arith.constant 2.500000e-01 : f32
    %251 = vector.broadcast %cst_74 : f32 to vector<8x16xf32>
    %252 = arith.mulf %250, %251 : vector<8x16xf32>
    %cst_75 = arith.constant dense<0.000000e+00> : vector<8x8xf32>
    %253 = tpu.matmul %247, %240, %cst_75 {dimension_numbers = #tpu.dot_dimension_numbers<[1], [1], [0], [0], [0, 0, 1, 0], [], []>} : vector<8x16xf32>, vector<8x16xf32>, vector<8x8xf32> -> vector<8x8xf32>
    %cst_76 = arith.constant dense<0.000000e+00> : vector<8x8xf32>
    %254 = tpu.matmul %252, %242, %cst_76 {dimension_numbers = #tpu.dot_dimension_numbers<[1], [1], [0], [0], [0, 0, 1, 0], [], []>} : vector<8x16xf32>, vector<8x16xf32>, vector<8x8xf32> -> vector<8x8xf32>
    %cst_77 = arith.constant 0.000000e+00 : f32
    %255 = vector.broadcast %cst_77 : f32 to vector<8x8xf32>
    %c0_i32_78 = arith.constant 0 : i32
    %256 = vector.broadcast %c0_i32_78 : i32 to vector<8x8xi32>
    %257 = arith.cmpi eq, %46, %256 : vector<8x8xi32>
    %258 = vector.extract_strided_slice %254 {offsets = [0, 0], sizes = [8, 1], strides = [1, 1]} : vector<8x8xf32> to vector<8x1xf32>
    %cst_79 = arith.constant 0.000000e+00 : f32
    %259 = vector.shape_cast %258 : vector<8x1xf32> to vector<8x1xf32>
    %260 = vector.broadcast %259 : vector<8x1xf32> to vector<8x8xf32>
    %261 = vector.broadcast %cst_79 : f32 to vector<8x8xf32>
    %262 = arith.select %257, %260, %261 : vector<8x8xi1>, vector<8x8xf32>
    %263 = arith.addf %255, %262 : vector<8x8xf32>
    %c1_i32_80 = arith.constant 1 : i32
    %264 = vector.broadcast %c1_i32_80 : i32 to vector<8x8xi32>
    %265 = arith.cmpi eq, %46, %264 : vector<8x8xi32>
    %266 = vector.extract_strided_slice %254 {offsets = [0, 1], sizes = [8, 1], strides = [1, 1]} : vector<8x8xf32> to vector<8x1xf32>
    %cst_81 = arith.constant 0.000000e+00 : f32
    %267 = vector.shape_cast %266 : vector<8x1xf32> to vector<8x1xf32>
    %268 = vector.broadcast %267 : vector<8x1xf32> to vector<8x8xf32>
    %269 = vector.broadcast %cst_81 : f32 to vector<8x8xf32>
    %270 = arith.select %265, %268, %269 : vector<8x8xi1>, vector<8x8xf32>
    %271 = arith.addf %263, %270 : vector<8x8xf32>
    %c2_i32_82 = arith.constant 2 : i32
    %272 = vector.broadcast %c2_i32_82 : i32 to vector<8x8xi32>
    %273 = arith.cmpi eq, %46, %272 : vector<8x8xi32>
    %274 = vector.extract_strided_slice %254 {offsets = [0, 2], sizes = [8, 1], strides = [1, 1]} : vector<8x8xf32> to vector<8x1xf32>
    %cst_83 = arith.constant 0.000000e+00 : f32
    %275 = vector.shape_cast %274 : vector<8x1xf32> to vector<8x1xf32>
    %276 = vector.broadcast %275 : vector<8x1xf32> to vector<8x8xf32>
    %277 = vector.broadcast %cst_83 : f32 to vector<8x8xf32>
    %278 = arith.select %273, %276, %277 : vector<8x8xi1>, vector<8x8xf32>
    %279 = arith.addf %271, %278 : vector<8x8xf32>
    %c3_i32_84 = arith.constant 3 : i32
    %280 = vector.broadcast %c3_i32_84 : i32 to vector<8x8xi32>
    %281 = arith.cmpi eq, %46, %280 : vector<8x8xi32>
    %282 = vector.extract_strided_slice %254 {offsets = [0, 3], sizes = [8, 1], strides = [1, 1]} : vector<8x8xf32> to vector<8x1xf32>
    %cst_85 = arith.constant 0.000000e+00 : f32
    %283 = vector.shape_cast %282 : vector<8x1xf32> to vector<8x1xf32>
    %284 = vector.broadcast %283 : vector<8x1xf32> to vector<8x8xf32>
    %285 = vector.broadcast %cst_85 : f32 to vector<8x8xf32>
    %286 = arith.select %281, %284, %285 : vector<8x8xi1>, vector<8x8xf32>
    %287 = arith.addf %279, %286 : vector<8x8xf32>
    %c4_i32_86 = arith.constant 4 : i32
    %288 = vector.broadcast %c4_i32_86 : i32 to vector<8x8xi32>
    %289 = arith.cmpi eq, %46, %288 : vector<8x8xi32>
    %290 = vector.extract_strided_slice %254 {offsets = [0, 4], sizes = [8, 1], strides = [1, 1]} : vector<8x8xf32> to vector<8x1xf32>
    %cst_87 = arith.constant 0.000000e+00 : f32
    %291 = vector.shape_cast %290 : vector<8x1xf32> to vector<8x1xf32>
    %292 = vector.broadcast %291 : vector<8x1xf32> to vector<8x8xf32>
    %293 = vector.broadcast %cst_87 : f32 to vector<8x8xf32>
    %294 = arith.select %289, %292, %293 : vector<8x8xi1>, vector<8x8xf32>
    %295 = arith.addf %287, %294 : vector<8x8xf32>
    %c5_i32_88 = arith.constant 5 : i32
    %296 = vector.broadcast %c5_i32_88 : i32 to vector<8x8xi32>
    %297 = arith.cmpi eq, %46, %296 : vector<8x8xi32>
    %298 = vector.extract_strided_slice %254 {offsets = [0, 5], sizes = [8, 1], strides = [1, 1]} : vector<8x8xf32> to vector<8x1xf32>
    %cst_89 = arith.constant 0.000000e+00 : f32
    %299 = vector.shape_cast %298 : vector<8x1xf32> to vector<8x1xf32>
    %300 = vector.broadcast %299 : vector<8x1xf32> to vector<8x8xf32>
    %301 = vector.broadcast %cst_89 : f32 to vector<8x8xf32>
    %302 = arith.select %297, %300, %301 : vector<8x8xi1>, vector<8x8xf32>
    %303 = arith.addf %295, %302 : vector<8x8xf32>
    %c6_i32_90 = arith.constant 6 : i32
    %304 = vector.broadcast %c6_i32_90 : i32 to vector<8x8xi32>
    %305 = arith.cmpi eq, %46, %304 : vector<8x8xi32>
    %306 = vector.extract_strided_slice %254 {offsets = [0, 6], sizes = [8, 1], strides = [1, 1]} : vector<8x8xf32> to vector<8x1xf32>
    %cst_91 = arith.constant 0.000000e+00 : f32
    %307 = vector.shape_cast %306 : vector<8x1xf32> to vector<8x1xf32>
    %308 = vector.broadcast %307 : vector<8x1xf32> to vector<8x8xf32>
    %309 = vector.broadcast %cst_91 : f32 to vector<8x8xf32>
    %310 = arith.select %305, %308, %309 : vector<8x8xi1>, vector<8x8xf32>
    %311 = arith.addf %303, %310 : vector<8x8xf32>
    %c7_i32_92 = arith.constant 7 : i32
    %312 = vector.broadcast %c7_i32_92 : i32 to vector<8x8xi32>
    %313 = arith.cmpi eq, %46, %312 : vector<8x8xi32>
    %314 = vector.extract_strided_slice %254 {offsets = [0, 7], sizes = [8, 1], strides = [1, 1]} : vector<8x8xf32> to vector<8x1xf32>
    %cst_93 = arith.constant 0.000000e+00 : f32
    %315 = vector.shape_cast %314 : vector<8x1xf32> to vector<8x1xf32>
    %316 = vector.broadcast %315 : vector<8x1xf32> to vector<8x8xf32>
    %317 = vector.broadcast %cst_93 : f32 to vector<8x8xf32>
    %318 = arith.select %313, %316, %317 : vector<8x8xi1>, vector<8x8xf32>
    %319 = arith.addf %311, %318 : vector<8x8xf32>
    %320 = arith.addf %253, %319 : vector<8x8xf32>
    %cst_94 = arith.constant -1.000000e+30 : f32
    %321 = vector.broadcast %cst_94 : f32 to vector<8x8xf32>
    %322 = arith.select %43, %321, %320 : vector<8x8xi1>, vector<8x8xf32>
    %cst_95 = arith.constant dense<0xFF800000> : vector<8xf32>
    %323 = vector.multi_reduction <maximumf>, %322, %cst_95 [1] : vector<8x8xf32> to vector<8xf32>
    %324 = vector.shape_cast %323 : vector<8xf32> to vector<8x1xf32>
    %325 = vector.broadcast %324 : vector<8x1xf32> to vector<8x8xf32>
    %326 = arith.subf %322, %325 : vector<8x8xf32>
    %327 = math.exp %326 : vector<8x8xf32>
    %cst_96 = arith.constant dense<0.000000e+00> : vector<8xf32>
    %328 = vector.multi_reduction <add>, %327, %cst_96 [1] : vector<8x8xf32> to vector<8xf32>
    %329 = vector.shape_cast %328 : vector<8xf32> to vector<8x1xf32>
    %330 = tpu.reciprocal %329 {approx = true} : vector<8x1xf32> -> vector<8x1xf32>
    %331 = vector.broadcast %330 : vector<8x1xf32> to vector<8x8xf32>
    %332 = arith.mulf %327, %331 : vector<8x8xf32>
    %cst_97 = arith.constant dense<0.000000e+00> : vector<8x16xf32>
    %333 = tpu.matmul %332, %241, %cst_97 {dimension_numbers = #tpu.dot_dimension_numbers<[1], [0], [0], [1], [0, 0, 1, 1], [], []>} : vector<8x8xf32>, vector<8x16xf32>, vector<8x16xf32> -> vector<8x16xf32>
    %c0_98 = arith.constant 0 : index
    %c32 = arith.constant 32 : index
    %334 = vector.load %arg32[%c0_98, %c32] : memref<16x64xf32, #tpu.memory_space<vmem>>, vector<8x16xf32>
    tpu.vector_store %arg32[%c0_98, %c32], %333 {strides = array<i32>} : memref<16x64xf32, #tpu.memory_space<vmem>>, vector<8x16xf32>,
    %335 = vector.extract_strided_slice %34 {offsets = [0, 48], sizes = [8, 16], strides = [1, 1]} : vector<16x192xf32> to vector<8x16xf32>
    %336 = vector.extract_strided_slice %34 {offsets = [0, 112], sizes = [8, 16], strides = [1, 1]} : vector<16x192xf32> to vector<8x16xf32>
    %337 = vector.extract_strided_slice %34 {offsets = [0, 176], sizes = [8, 16], strides = [1, 1]} : vector<16x192xf32> to vector<8x16xf32>
    %338 = vector.extract_strided_slice %38 {offsets = [0, 48], sizes = [8, 16], strides = [1, 1]} : vector<8x64xf32> to vector<8x16xf32>
    %339 = vector.extract_strided_slice %39 {offsets = [3, 0], sizes = [1, 16], strides = [1, 1]} : vector<4x16xf32> to vector<1x16xf32>
    %340 = vector.broadcast %339 : vector<1x16xf32> to vector<8x16xf32>
    %341 = arith.addf %335, %340 : vector<8x16xf32>
    %cst_99 = arith.constant 2.500000e-01 : f32
    %342 = vector.broadcast %cst_99 : f32 to vector<8x16xf32>
    %343 = arith.mulf %341, %342 : vector<8x16xf32>
    %344 = vector.extract_strided_slice %40 {offsets = [3, 0], sizes = [1, 16], strides = [1, 1]} : vector<4x16xf32> to vector<1x16xf32>
    %345 = vector.broadcast %344 : vector<1x16xf32> to vector<8x16xf32>
    %346 = arith.addf %335, %345 : vector<8x16xf32>
    %cst_100 = arith.constant 2.500000e-01 : f32
    %347 = vector.broadcast %cst_100 : f32 to vector<8x16xf32>
    %348 = arith.mulf %346, %347 : vector<8x16xf32>
    %cst_101 = arith.constant dense<0.000000e+00> : vector<8x8xf32>
    %349 = tpu.matmul %343, %336, %cst_101 {dimension_numbers = #tpu.dot_dimension_numbers<[1], [1], [0], [0], [0, 0, 1, 0], [], []>} : vector<8x16xf32>, vector<8x16xf32>, vector<8x8xf32> -> vector<8x8xf32>
    %cst_102 = arith.constant dense<0.000000e+00> : vector<8x8xf32>
    %350 = tpu.matmul %348, %338, %cst_102 {dimension_numbers = #tpu.dot_dimension_numbers<[1], [1], [0], [0], [0, 0, 1, 0], [], []>} : vector<8x16xf32>, vector<8x16xf32>, vector<8x8xf32> -> vector<8x8xf32>
    %cst_103 = arith.constant 0.000000e+00 : f32
    %351 = vector.broadcast %cst_103 : f32 to vector<8x8xf32>
    %c0_i32_104 = arith.constant 0 : i32
    %352 = vector.broadcast %c0_i32_104 : i32 to vector<8x8xi32>
    %353 = arith.cmpi eq, %46, %352 : vector<8x8xi32>
    %354 = vector.extract_strided_slice %350 {offsets = [0, 0], sizes = [8, 1], strides = [1, 1]} : vector<8x8xf32> to vector<8x1xf32>
    %cst_105 = arith.constant 0.000000e+00 : f32
    %355 = vector.shape_cast %354 : vector<8x1xf32> to vector<8x1xf32>
    %356 = vector.broadcast %355 : vector<8x1xf32> to vector<8x8xf32>
    %357 = vector.broadcast %cst_105 : f32 to vector<8x8xf32>
    %358 = arith.select %353, %356, %357 : vector<8x8xi1>, vector<8x8xf32>
    %359 = arith.addf %351, %358 : vector<8x8xf32>
    %c1_i32_106 = arith.constant 1 : i32
    %360 = vector.broadcast %c1_i32_106 : i32 to vector<8x8xi32>
    %361 = arith.cmpi eq, %46, %360 : vector<8x8xi32>
    %362 = vector.extract_strided_slice %350 {offsets = [0, 1], sizes = [8, 1], strides = [1, 1]} : vector<8x8xf32> to vector<8x1xf32>
    %cst_107 = arith.constant 0.000000e+00 : f32
    %363 = vector.shape_cast %362 : vector<8x1xf32> to vector<8x1xf32>
    %364 = vector.broadcast %363 : vector<8x1xf32> to vector<8x8xf32>
    %365 = vector.broadcast %cst_107 : f32 to vector<8x8xf32>
    %366 = arith.select %361, %364, %365 : vector<8x8xi1>, vector<8x8xf32>
    %367 = arith.addf %359, %366 : vector<8x8xf32>
    %c2_i32_108 = arith.constant 2 : i32
    %368 = vector.broadcast %c2_i32_108 : i32 to vector<8x8xi32>
    %369 = arith.cmpi eq, %46, %368 : vector<8x8xi32>
    %370 = vector.extract_strided_slice %350 {offsets = [0, 2], sizes = [8, 1], strides = [1, 1]} : vector<8x8xf32> to vector<8x1xf32>
    %cst_109 = arith.constant 0.000000e+00 : f32
    %371 = vector.shape_cast %370 : vector<8x1xf32> to vector<8x1xf32>
    %372 = vector.broadcast %371 : vector<8x1xf32> to vector<8x8xf32>
    %373 = vector.broadcast %cst_109 : f32 to vector<8x8xf32>
    %374 = arith.select %369, %372, %373 : vector<8x8xi1>, vector<8x8xf32>
    %375 = arith.addf %367, %374 : vector<8x8xf32>
    %c3_i32_110 = arith.constant 3 : i32
    %376 = vector.broadcast %c3_i32_110 : i32 to vector<8x8xi32>
    %377 = arith.cmpi eq, %46, %376 : vector<8x8xi32>
    %378 = vector.extract_strided_slice %350 {offsets = [0, 3], sizes = [8, 1], strides = [1, 1]} : vector<8x8xf32> to vector<8x1xf32>
    %cst_111 = arith.constant 0.000000e+00 : f32
    %379 = vector.shape_cast %378 : vector<8x1xf32> to vector<8x1xf32>
    %380 = vector.broadcast %379 : vector<8x1xf32> to vector<8x8xf32>
    %381 = vector.broadcast %cst_111 : f32 to vector<8x8xf32>
    %382 = arith.select %377, %380, %381 : vector<8x8xi1>, vector<8x8xf32>
    %383 = arith.addf %375, %382 : vector<8x8xf32>
    %c4_i32_112 = arith.constant 4 : i32
    %384 = vector.broadcast %c4_i32_112 : i32 to vector<8x8xi32>
    %385 = arith.cmpi eq, %46, %384 : vector<8x8xi32>
    %386 = vector.extract_strided_slice %350 {offsets = [0, 4], sizes = [8, 1], strides = [1, 1]} : vector<8x8xf32> to vector<8x1xf32>
    %cst_113 = arith.constant 0.000000e+00 : f32
    %387 = vector.shape_cast %386 : vector<8x1xf32> to vector<8x1xf32>
    %388 = vector.broadcast %387 : vector<8x1xf32> to vector<8x8xf32>
    %389 = vector.broadcast %cst_113 : f32 to vector<8x8xf32>
    %390 = arith.select %385, %388, %389 : vector<8x8xi1>, vector<8x8xf32>
    %391 = arith.addf %383, %390 : vector<8x8xf32>
    %c5_i32_114 = arith.constant 5 : i32
    %392 = vector.broadcast %c5_i32_114 : i32 to vector<8x8xi32>
    %393 = arith.cmpi eq, %46, %392 : vector<8x8xi32>
    %394 = vector.extract_strided_slice %350 {offsets = [0, 5], sizes = [8, 1], strides = [1, 1]} : vector<8x8xf32> to vector<8x1xf32>
    %cst_115 = arith.constant 0.000000e+00 : f32
    %395 = vector.shape_cast %394 : vector<8x1xf32> to vector<8x1xf32>
    %396 = vector.broadcast %395 : vector<8x1xf32> to vector<8x8xf32>
    %397 = vector.broadcast %cst_115 : f32 to vector<8x8xf32>
    %398 = arith.select %393, %396, %397 : vector<8x8xi1>, vector<8x8xf32>
    %399 = arith.addf %391, %398 : vector<8x8xf32>
    %c6_i32_116 = arith.constant 6 : i32
    %400 = vector.broadcast %c6_i32_116 : i32 to vector<8x8xi32>
    %401 = arith.cmpi eq, %46, %400 : vector<8x8xi32>
    %402 = vector.extract_strided_slice %350 {offsets = [0, 6], sizes = [8, 1], strides = [1, 1]} : vector<8x8xf32> to vector<8x1xf32>
    %cst_117 = arith.constant 0.000000e+00 : f32
    %403 = vector.shape_cast %402 : vector<8x1xf32> to vector<8x1xf32>
    %404 = vector.broadcast %403 : vector<8x1xf32> to vector<8x8xf32>
    %405 = vector.broadcast %cst_117 : f32 to vector<8x8xf32>
    %406 = arith.select %401, %404, %405 : vector<8x8xi1>, vector<8x8xf32>
    %407 = arith.addf %399, %406 : vector<8x8xf32>
    %c7_i32_118 = arith.constant 7 : i32
    %408 = vector.broadcast %c7_i32_118 : i32 to vector<8x8xi32>
    %409 = arith.cmpi eq, %46, %408 : vector<8x8xi32>
    %410 = vector.extract_strided_slice %350 {offsets = [0, 7], sizes = [8, 1], strides = [1, 1]} : vector<8x8xf32> to vector<8x1xf32>
    %cst_119 = arith.constant 0.000000e+00 : f32
    %411 = vector.shape_cast %410 : vector<8x1xf32> to vector<8x1xf32>
    %412 = vector.broadcast %411 : vector<8x1xf32> to vector<8x8xf32>
    %413 = vector.broadcast %cst_119 : f32 to vector<8x8xf32>
    %414 = arith.select %409, %412, %413 : vector<8x8xi1>, vector<8x8xf32>
    %415 = arith.addf %407, %414 : vector<8x8xf32>
    %416 = arith.addf %349, %415 : vector<8x8xf32>
    %cst_120 = arith.constant -1.000000e+30 : f32
    %417 = vector.broadcast %cst_120 : f32 to vector<8x8xf32>
    %418 = arith.select %43, %417, %416 : vector<8x8xi1>, vector<8x8xf32>
    %cst_121 = arith.constant dense<0xFF800000> : vector<8xf32>
    %419 = vector.multi_reduction <maximumf>, %418, %cst_121 [1] : vector<8x8xf32> to vector<8xf32>
    %420 = vector.shape_cast %419 : vector<8xf32> to vector<8x1xf32>
    %421 = vector.broadcast %420 : vector<8x1xf32> to vector<8x8xf32>
    %422 = arith.subf %418, %421 : vector<8x8xf32>
    %423 = math.exp %422 : vector<8x8xf32>
    %cst_122 = arith.constant dense<0.000000e+00> : vector<8xf32>
    %424 = vector.multi_reduction <add>, %423, %cst_122 [1] : vector<8x8xf32> to vector<8xf32>
    %425 = vector.shape_cast %424 : vector<8xf32> to vector<8x1xf32>
    %426 = tpu.reciprocal %425 {approx = true} : vector<8x1xf32> -> vector<8x1xf32>
    %427 = vector.broadcast %426 : vector<8x1xf32> to vector<8x8xf32>
    %428 = arith.mulf %423, %427 : vector<8x8xf32>
    %cst_123 = arith.constant dense<0.000000e+00> : vector<8x16xf32>
    %429 = tpu.matmul %428, %337, %cst_123 {dimension_numbers = #tpu.dot_dimension_numbers<[1], [0], [0], [1], [0, 0, 1, 1], [], []>} : vector<8x8xf32>, vector<8x16xf32>, vector<8x16xf32> -> vector<8x16xf32>
    %c0_124 = arith.constant 0 : index
    %c48 = arith.constant 48 : index
    %430 = vector.load %arg32[%c0_124, %c48] : memref<16x64xf32, #tpu.memory_space<vmem>>, vector<8x16xf32>
    tpu.vector_store %arg32[%c0_124, %c48], %429 {strides = array<i32>} : memref<16x64xf32, #tpu.memory_space<vmem>>, vector<8x16xf32>,
    %431 = vector.extract_strided_slice %34 {offsets = [8, 0], sizes = [8, 16], strides = [1, 1]} : vector<16x192xf32> to vector<8x16xf32>
    %432 = vector.extract_strided_slice %34 {offsets = [8, 64], sizes = [8, 16], strides = [1, 1]} : vector<16x192xf32> to vector<8x16xf32>
    %433 = vector.extract_strided_slice %34 {offsets = [8, 128], sizes = [8, 16], strides = [1, 1]} : vector<16x192xf32> to vector<8x16xf32>
    %434 = vector.extract_strided_slice %38 {offsets = [0, 0], sizes = [8, 16], strides = [1, 1]} : vector<8x64xf32> to vector<8x16xf32>
    %435 = vector.extract_strided_slice %39 {offsets = [0, 0], sizes = [1, 16], strides = [1, 1]} : vector<4x16xf32> to vector<1x16xf32>
    %436 = vector.broadcast %435 : vector<1x16xf32> to vector<8x16xf32>
    %437 = arith.addf %431, %436 : vector<8x16xf32>
    %cst_125 = arith.constant 2.500000e-01 : f32
    %438 = vector.broadcast %cst_125 : f32 to vector<8x16xf32>
    %439 = arith.mulf %437, %438 : vector<8x16xf32>
    %440 = vector.extract_strided_slice %40 {offsets = [0, 0], sizes = [1, 16], strides = [1, 1]} : vector<4x16xf32> to vector<1x16xf32>
    %441 = vector.broadcast %440 : vector<1x16xf32> to vector<8x16xf32>
    %442 = arith.addf %431, %441 : vector<8x16xf32>
    %cst_126 = arith.constant 2.500000e-01 : f32
    %443 = vector.broadcast %cst_126 : f32 to vector<8x16xf32>
    %444 = arith.mulf %442, %443 : vector<8x16xf32>
    %cst_127 = arith.constant dense<0.000000e+00> : vector<8x8xf32>
    %445 = tpu.matmul %439, %432, %cst_127 {dimension_numbers = #tpu.dot_dimension_numbers<[1], [1], [0], [0], [0, 0, 1, 0], [], []>} : vector<8x16xf32>, vector<8x16xf32>, vector<8x8xf32> -> vector<8x8xf32>
    %cst_128 = arith.constant dense<0.000000e+00> : vector<8x8xf32>
    %446 = tpu.matmul %444, %434, %cst_128 {dimension_numbers = #tpu.dot_dimension_numbers<[1], [1], [0], [0], [0, 0, 1, 0], [], []>} : vector<8x16xf32>, vector<8x16xf32>, vector<8x8xf32> -> vector<8x8xf32>
    %cst_129 = arith.constant 0.000000e+00 : f32
    %447 = vector.broadcast %cst_129 : f32 to vector<8x8xf32>
    %c0_i32_130 = arith.constant 0 : i32
    %448 = vector.broadcast %c0_i32_130 : i32 to vector<8x8xi32>
    %449 = arith.cmpi eq, %46, %448 : vector<8x8xi32>
    %450 = vector.extract_strided_slice %446 {offsets = [0, 0], sizes = [8, 1], strides = [1, 1]} : vector<8x8xf32> to vector<8x1xf32>
    %cst_131 = arith.constant 0.000000e+00 : f32
    %451 = vector.shape_cast %450 : vector<8x1xf32> to vector<8x1xf32>
    %452 = vector.broadcast %451 : vector<8x1xf32> to vector<8x8xf32>
    %453 = vector.broadcast %cst_131 : f32 to vector<8x8xf32>
    %454 = arith.select %449, %452, %453 : vector<8x8xi1>, vector<8x8xf32>
    %455 = arith.addf %447, %454 : vector<8x8xf32>
    %c1_i32_132 = arith.constant 1 : i32
    %456 = vector.broadcast %c1_i32_132 : i32 to vector<8x8xi32>
    %457 = arith.cmpi eq, %46, %456 : vector<8x8xi32>
    %458 = vector.extract_strided_slice %446 {offsets = [0, 1], sizes = [8, 1], strides = [1, 1]} : vector<8x8xf32> to vector<8x1xf32>
    %cst_133 = arith.constant 0.000000e+00 : f32
    %459 = vector.shape_cast %458 : vector<8x1xf32> to vector<8x1xf32>
    %460 = vector.broadcast %459 : vector<8x1xf32> to vector<8x8xf32>
    %461 = vector.broadcast %cst_133 : f32 to vector<8x8xf32>
    %462 = arith.select %457, %460, %461 : vector<8x8xi1>, vector<8x8xf32>
    %463 = arith.addf %455, %462 : vector<8x8xf32>
    %c2_i32_134 = arith.constant 2 : i32
    %464 = vector.broadcast %c2_i32_134 : i32 to vector<8x8xi32>
    %465 = arith.cmpi eq, %46, %464 : vector<8x8xi32>
    %466 = vector.extract_strided_slice %446 {offsets = [0, 2], sizes = [8, 1], strides = [1, 1]} : vector<8x8xf32> to vector<8x1xf32>
    %cst_135 = arith.constant 0.000000e+00 : f32
    %467 = vector.shape_cast %466 : vector<8x1xf32> to vector<8x1xf32>
    %468 = vector.broadcast %467 : vector<8x1xf32> to vector<8x8xf32>
    %469 = vector.broadcast %cst_135 : f32 to vector<8x8xf32>
    %470 = arith.select %465, %468, %469 : vector<8x8xi1>, vector<8x8xf32>
    %471 = arith.addf %463, %470 : vector<8x8xf32>
    %c3_i32_136 = arith.constant 3 : i32
    %472 = vector.broadcast %c3_i32_136 : i32 to vector<8x8xi32>
    %473 = arith.cmpi eq, %46, %472 : vector<8x8xi32>
    %474 = vector.extract_strided_slice %446 {offsets = [0, 3], sizes = [8, 1], strides = [1, 1]} : vector<8x8xf32> to vector<8x1xf32>
    %cst_137 = arith.constant 0.000000e+00 : f32
    %475 = vector.shape_cast %474 : vector<8x1xf32> to vector<8x1xf32>
    %476 = vector.broadcast %475 : vector<8x1xf32> to vector<8x8xf32>
    %477 = vector.broadcast %cst_137 : f32 to vector<8x8xf32>
    %478 = arith.select %473, %476, %477 : vector<8x8xi1>, vector<8x8xf32>
    %479 = arith.addf %471, %478 : vector<8x8xf32>
    %c4_i32_138 = arith.constant 4 : i32
    %480 = vector.broadcast %c4_i32_138 : i32 to vector<8x8xi32>
    %481 = arith.cmpi eq, %46, %480 : vector<8x8xi32>
    %482 = vector.extract_strided_slice %446 {offsets = [0, 4], sizes = [8, 1], strides = [1, 1]} : vector<8x8xf32> to vector<8x1xf32>
    %cst_139 = arith.constant 0.000000e+00 : f32
    %483 = vector.shape_cast %482 : vector<8x1xf32> to vector<8x1xf32>
    %484 = vector.broadcast %483 : vector<8x1xf32> to vector<8x8xf32>
    %485 = vector.broadcast %cst_139 : f32 to vector<8x8xf32>
    %486 = arith.select %481, %484, %485 : vector<8x8xi1>, vector<8x8xf32>
    %487 = arith.addf %479, %486 : vector<8x8xf32>
    %c5_i32_140 = arith.constant 5 : i32
    %488 = vector.broadcast %c5_i32_140 : i32 to vector<8x8xi32>
    %489 = arith.cmpi eq, %46, %488 : vector<8x8xi32>
    %490 = vector.extract_strided_slice %446 {offsets = [0, 5], sizes = [8, 1], strides = [1, 1]} : vector<8x8xf32> to vector<8x1xf32>
    %cst_141 = arith.constant 0.000000e+00 : f32
    %491 = vector.shape_cast %490 : vector<8x1xf32> to vector<8x1xf32>
    %492 = vector.broadcast %491 : vector<8x1xf32> to vector<8x8xf32>
    %493 = vector.broadcast %cst_141 : f32 to vector<8x8xf32>
    %494 = arith.select %489, %492, %493 : vector<8x8xi1>, vector<8x8xf32>
    %495 = arith.addf %487, %494 : vector<8x8xf32>
    %c6_i32_142 = arith.constant 6 : i32
    %496 = vector.broadcast %c6_i32_142 : i32 to vector<8x8xi32>
    %497 = arith.cmpi eq, %46, %496 : vector<8x8xi32>
    %498 = vector.extract_strided_slice %446 {offsets = [0, 6], sizes = [8, 1], strides = [1, 1]} : vector<8x8xf32> to vector<8x1xf32>
    %cst_143 = arith.constant 0.000000e+00 : f32
    %499 = vector.shape_cast %498 : vector<8x1xf32> to vector<8x1xf32>
    %500 = vector.broadcast %499 : vector<8x1xf32> to vector<8x8xf32>
    %501 = vector.broadcast %cst_143 : f32 to vector<8x8xf32>
    %502 = arith.select %497, %500, %501 : vector<8x8xi1>, vector<8x8xf32>
    %503 = arith.addf %495, %502 : vector<8x8xf32>
    %c7_i32_144 = arith.constant 7 : i32
    %504 = vector.broadcast %c7_i32_144 : i32 to vector<8x8xi32>
    %505 = arith.cmpi eq, %46, %504 : vector<8x8xi32>
    %506 = vector.extract_strided_slice %446 {offsets = [0, 7], sizes = [8, 1], strides = [1, 1]} : vector<8x8xf32> to vector<8x1xf32>
    %cst_145 = arith.constant 0.000000e+00 : f32
    %507 = vector.shape_cast %506 : vector<8x1xf32> to vector<8x1xf32>
    %508 = vector.broadcast %507 : vector<8x1xf32> to vector<8x8xf32>
    %509 = vector.broadcast %cst_145 : f32 to vector<8x8xf32>
    %510 = arith.select %505, %508, %509 : vector<8x8xi1>, vector<8x8xf32>
    %511 = arith.addf %503, %510 : vector<8x8xf32>
    %512 = arith.addf %445, %511 : vector<8x8xf32>
    %cst_146 = arith.constant -1.000000e+30 : f32
    %513 = vector.broadcast %cst_146 : f32 to vector<8x8xf32>
    %514 = arith.select %43, %513, %512 : vector<8x8xi1>, vector<8x8xf32>
    %cst_147 = arith.constant dense<0xFF800000> : vector<8xf32>
    %515 = vector.multi_reduction <maximumf>, %514, %cst_147 [1] : vector<8x8xf32> to vector<8xf32>
    %516 = vector.shape_cast %515 : vector<8xf32> to vector<8x1xf32>
    %517 = vector.broadcast %516 : vector<8x1xf32> to vector<8x8xf32>
    %518 = arith.subf %514, %517 : vector<8x8xf32>
    %519 = math.exp %518 : vector<8x8xf32>
    %cst_148 = arith.constant dense<0.000000e+00> : vector<8xf32>
    %520 = vector.multi_reduction <add>, %519, %cst_148 [1] : vector<8x8xf32> to vector<8xf32>
    %521 = vector.shape_cast %520 : vector<8xf32> to vector<8x1xf32>
    %522 = tpu.reciprocal %521 {approx = true} : vector<8x1xf32> -> vector<8x1xf32>
    %523 = vector.broadcast %522 : vector<8x1xf32> to vector<8x8xf32>
    %524 = arith.mulf %519, %523 : vector<8x8xf32>
    %cst_149 = arith.constant dense<0.000000e+00> : vector<8x16xf32>
    %525 = tpu.matmul %524, %433, %cst_149 {dimension_numbers = #tpu.dot_dimension_numbers<[1], [0], [0], [1], [0, 0, 1, 1], [], []>} : vector<8x8xf32>, vector<8x16xf32>, vector<8x16xf32> -> vector<8x16xf32>
    %c8 = arith.constant 8 : index
    %c0_150 = arith.constant 0 : index
    %526 = vector.load %arg32[%c8, %c0_150] : memref<16x64xf32, #tpu.memory_space<vmem>>, vector<8x16xf32>
    tpu.vector_store %arg32[%c8, %c0_150], %525 {strides = array<i32>} : memref<16x64xf32, #tpu.memory_space<vmem>>, vector<8x16xf32>,
    %527 = vector.extract_strided_slice %34 {offsets = [8, 16], sizes = [8, 16], strides = [1, 1]} : vector<16x192xf32> to vector<8x16xf32>
    %528 = vector.extract_strided_slice %34 {offsets = [8, 80], sizes = [8, 16], strides = [1, 1]} : vector<16x192xf32> to vector<8x16xf32>
    %529 = vector.extract_strided_slice %34 {offsets = [8, 144], sizes = [8, 16], strides = [1, 1]} : vector<16x192xf32> to vector<8x16xf32>
    %530 = vector.extract_strided_slice %38 {offsets = [0, 16], sizes = [8, 16], strides = [1, 1]} : vector<8x64xf32> to vector<8x16xf32>
    %531 = vector.extract_strided_slice %39 {offsets = [1, 0], sizes = [1, 16], strides = [1, 1]} : vector<4x16xf32> to vector<1x16xf32>
    %532 = vector.broadcast %531 : vector<1x16xf32> to vector<8x16xf32>
    %533 = arith.addf %527, %532 : vector<8x16xf32>
    %cst_151 = arith.constant 2.500000e-01 : f32
    %534 = vector.broadcast %cst_151 : f32 to vector<8x16xf32>
    %535 = arith.mulf %533, %534 : vector<8x16xf32>
    %536 = vector.extract_strided_slice %40 {offsets = [1, 0], sizes = [1, 16], strides = [1, 1]} : vector<4x16xf32> to vector<1x16xf32>
    %537 = vector.broadcast %536 : vector<1x16xf32> to vector<8x16xf32>
    %538 = arith.addf %527, %537 : vector<8x16xf32>
    %cst_152 = arith.constant 2.500000e-01 : f32
    %539 = vector.broadcast %cst_152 : f32 to vector<8x16xf32>
    %540 = arith.mulf %538, %539 : vector<8x16xf32>
    %cst_153 = arith.constant dense<0.000000e+00> : vector<8x8xf32>
    %541 = tpu.matmul %535, %528, %cst_153 {dimension_numbers = #tpu.dot_dimension_numbers<[1], [1], [0], [0], [0, 0, 1, 0], [], []>} : vector<8x16xf32>, vector<8x16xf32>, vector<8x8xf32> -> vector<8x8xf32>
    %cst_154 = arith.constant dense<0.000000e+00> : vector<8x8xf32>
    %542 = tpu.matmul %540, %530, %cst_154 {dimension_numbers = #tpu.dot_dimension_numbers<[1], [1], [0], [0], [0, 0, 1, 0], [], []>} : vector<8x16xf32>, vector<8x16xf32>, vector<8x8xf32> -> vector<8x8xf32>
    %cst_155 = arith.constant 0.000000e+00 : f32
    %543 = vector.broadcast %cst_155 : f32 to vector<8x8xf32>
    %c0_i32_156 = arith.constant 0 : i32
    %544 = vector.broadcast %c0_i32_156 : i32 to vector<8x8xi32>
    %545 = arith.cmpi eq, %46, %544 : vector<8x8xi32>
    %546 = vector.extract_strided_slice %542 {offsets = [0, 0], sizes = [8, 1], strides = [1, 1]} : vector<8x8xf32> to vector<8x1xf32>
    %cst_157 = arith.constant 0.000000e+00 : f32
    %547 = vector.shape_cast %546 : vector<8x1xf32> to vector<8x1xf32>
    %548 = vector.broadcast %547 : vector<8x1xf32> to vector<8x8xf32>
    %549 = vector.broadcast %cst_157 : f32 to vector<8x8xf32>
    %550 = arith.select %545, %548, %549 : vector<8x8xi1>, vector<8x8xf32>
    %551 = arith.addf %543, %550 : vector<8x8xf32>
    %c1_i32_158 = arith.constant 1 : i32
    %552 = vector.broadcast %c1_i32_158 : i32 to vector<8x8xi32>
    %553 = arith.cmpi eq, %46, %552 : vector<8x8xi32>
    %554 = vector.extract_strided_slice %542 {offsets = [0, 1], sizes = [8, 1], strides = [1, 1]} : vector<8x8xf32> to vector<8x1xf32>
    %cst_159 = arith.constant 0.000000e+00 : f32
    %555 = vector.shape_cast %554 : vector<8x1xf32> to vector<8x1xf32>
    %556 = vector.broadcast %555 : vector<8x1xf32> to vector<8x8xf32>
    %557 = vector.broadcast %cst_159 : f32 to vector<8x8xf32>
    %558 = arith.select %553, %556, %557 : vector<8x8xi1>, vector<8x8xf32>
    %559 = arith.addf %551, %558 : vector<8x8xf32>
    %c2_i32_160 = arith.constant 2 : i32
    %560 = vector.broadcast %c2_i32_160 : i32 to vector<8x8xi32>
    %561 = arith.cmpi eq, %46, %560 : vector<8x8xi32>
    %562 = vector.extract_strided_slice %542 {offsets = [0, 2], sizes = [8, 1], strides = [1, 1]} : vector<8x8xf32> to vector<8x1xf32>
    %cst_161 = arith.constant 0.000000e+00 : f32
    %563 = vector.shape_cast %562 : vector<8x1xf32> to vector<8x1xf32>
    %564 = vector.broadcast %563 : vector<8x1xf32> to vector<8x8xf32>
    %565 = vector.broadcast %cst_161 : f32 to vector<8x8xf32>
    %566 = arith.select %561, %564, %565 : vector<8x8xi1>, vector<8x8xf32>
    %567 = arith.addf %559, %566 : vector<8x8xf32>
    %c3_i32_162 = arith.constant 3 : i32
    %568 = vector.broadcast %c3_i32_162 : i32 to vector<8x8xi32>
    %569 = arith.cmpi eq, %46, %568 : vector<8x8xi32>
    %570 = vector.extract_strided_slice %542 {offsets = [0, 3], sizes = [8, 1], strides = [1, 1]} : vector<8x8xf32> to vector<8x1xf32>
    %cst_163 = arith.constant 0.000000e+00 : f32
    %571 = vector.shape_cast %570 : vector<8x1xf32> to vector<8x1xf32>
    %572 = vector.broadcast %571 : vector<8x1xf32> to vector<8x8xf32>
    %573 = vector.broadcast %cst_163 : f32 to vector<8x8xf32>
    %574 = arith.select %569, %572, %573 : vector<8x8xi1>, vector<8x8xf32>
    %575 = arith.addf %567, %574 : vector<8x8xf32>
    %c4_i32_164 = arith.constant 4 : i32
    %576 = vector.broadcast %c4_i32_164 : i32 to vector<8x8xi32>
    %577 = arith.cmpi eq, %46, %576 : vector<8x8xi32>
    %578 = vector.extract_strided_slice %542 {offsets = [0, 4], sizes = [8, 1], strides = [1, 1]} : vector<8x8xf32> to vector<8x1xf32>
    %cst_165 = arith.constant 0.000000e+00 : f32
    %579 = vector.shape_cast %578 : vector<8x1xf32> to vector<8x1xf32>
    %580 = vector.broadcast %579 : vector<8x1xf32> to vector<8x8xf32>
    %581 = vector.broadcast %cst_165 : f32 to vector<8x8xf32>
    %582 = arith.select %577, %580, %581 : vector<8x8xi1>, vector<8x8xf32>
    %583 = arith.addf %575, %582 : vector<8x8xf32>
    %c5_i32_166 = arith.constant 5 : i32
    %584 = vector.broadcast %c5_i32_166 : i32 to vector<8x8xi32>
    %585 = arith.cmpi eq, %46, %584 : vector<8x8xi32>
    %586 = vector.extract_strided_slice %542 {offsets = [0, 5], sizes = [8, 1], strides = [1, 1]} : vector<8x8xf32> to vector<8x1xf32>
    %cst_167 = arith.constant 0.000000e+00 : f32
    %587 = vector.shape_cast %586 : vector<8x1xf32> to vector<8x1xf32>
    %588 = vector.broadcast %587 : vector<8x1xf32> to vector<8x8xf32>
    %589 = vector.broadcast %cst_167 : f32 to vector<8x8xf32>
    %590 = arith.select %585, %588, %589 : vector<8x8xi1>, vector<8x8xf32>
    %591 = arith.addf %583, %590 : vector<8x8xf32>
    %c6_i32_168 = arith.constant 6 : i32
    %592 = vector.broadcast %c6_i32_168 : i32 to vector<8x8xi32>
    %593 = arith.cmpi eq, %46, %592 : vector<8x8xi32>
    %594 = vector.extract_strided_slice %542 {offsets = [0, 6], sizes = [8, 1], strides = [1, 1]} : vector<8x8xf32> to vector<8x1xf32>
    %cst_169 = arith.constant 0.000000e+00 : f32
    %595 = vector.shape_cast %594 : vector<8x1xf32> to vector<8x1xf32>
    %596 = vector.broadcast %595 : vector<8x1xf32> to vector<8x8xf32>
    %597 = vector.broadcast %cst_169 : f32 to vector<8x8xf32>
    %598 = arith.select %593, %596, %597 : vector<8x8xi1>, vector<8x8xf32>
    %599 = arith.addf %591, %598 : vector<8x8xf32>
    %c7_i32_170 = arith.constant 7 : i32
    %600 = vector.broadcast %c7_i32_170 : i32 to vector<8x8xi32>
    %601 = arith.cmpi eq, %46, %600 : vector<8x8xi32>
    %602 = vector.extract_strided_slice %542 {offsets = [0, 7], sizes = [8, 1], strides = [1, 1]} : vector<8x8xf32> to vector<8x1xf32>
    %cst_171 = arith.constant 0.000000e+00 : f32
    %603 = vector.shape_cast %602 : vector<8x1xf32> to vector<8x1xf32>
    %604 = vector.broadcast %603 : vector<8x1xf32> to vector<8x8xf32>
    %605 = vector.broadcast %cst_171 : f32 to vector<8x8xf32>
    %606 = arith.select %601, %604, %605 : vector<8x8xi1>, vector<8x8xf32>
    %607 = arith.addf %599, %606 : vector<8x8xf32>
    %608 = arith.addf %541, %607 : vector<8x8xf32>
    %cst_172 = arith.constant -1.000000e+30 : f32
    %609 = vector.broadcast %cst_172 : f32 to vector<8x8xf32>
    %610 = arith.select %43, %609, %608 : vector<8x8xi1>, vector<8x8xf32>
    %cst_173 = arith.constant dense<0xFF800000> : vector<8xf32>
    %611 = vector.multi_reduction <maximumf>, %610, %cst_173 [1] : vector<8x8xf32> to vector<8xf32>
    %612 = vector.shape_cast %611 : vector<8xf32> to vector<8x1xf32>
    %613 = vector.broadcast %612 : vector<8x1xf32> to vector<8x8xf32>
    %614 = arith.subf %610, %613 : vector<8x8xf32>
    %615 = math.exp %614 : vector<8x8xf32>
    %cst_174 = arith.constant dense<0.000000e+00> : vector<8xf32>
    %616 = vector.multi_reduction <add>, %615, %cst_174 [1] : vector<8x8xf32> to vector<8xf32>
    %617 = vector.shape_cast %616 : vector<8xf32> to vector<8x1xf32>
    %618 = tpu.reciprocal %617 {approx = true} : vector<8x1xf32> -> vector<8x1xf32>
    %619 = vector.broadcast %618 : vector<8x1xf32> to vector<8x8xf32>
    %620 = arith.mulf %615, %619 : vector<8x8xf32>
    %cst_175 = arith.constant dense<0.000000e+00> : vector<8x16xf32>
    %621 = tpu.matmul %620, %529, %cst_175 {dimension_numbers = #tpu.dot_dimension_numbers<[1], [0], [0], [1], [0, 0, 1, 1], [], []>} : vector<8x8xf32>, vector<8x16xf32>, vector<8x16xf32> -> vector<8x16xf32>
    %c8_176 = arith.constant 8 : index
    %c16_177 = arith.constant 16 : index
    %622 = vector.load %arg32[%c8_176, %c16_177] : memref<16x64xf32, #tpu.memory_space<vmem>>, vector<8x16xf32>
    tpu.vector_store %arg32[%c8_176, %c16_177], %621 {strides = array<i32>} : memref<16x64xf32, #tpu.memory_space<vmem>>, vector<8x16xf32>,
    %623 = vector.extract_strided_slice %34 {offsets = [8, 32], sizes = [8, 16], strides = [1, 1]} : vector<16x192xf32> to vector<8x16xf32>
    %624 = vector.extract_strided_slice %34 {offsets = [8, 96], sizes = [8, 16], strides = [1, 1]} : vector<16x192xf32> to vector<8x16xf32>
    %625 = vector.extract_strided_slice %34 {offsets = [8, 160], sizes = [8, 16], strides = [1, 1]} : vector<16x192xf32> to vector<8x16xf32>
    %626 = vector.extract_strided_slice %38 {offsets = [0, 32], sizes = [8, 16], strides = [1, 1]} : vector<8x64xf32> to vector<8x16xf32>
    %627 = vector.extract_strided_slice %39 {offsets = [2, 0], sizes = [1, 16], strides = [1, 1]} : vector<4x16xf32> to vector<1x16xf32>
    %628 = vector.broadcast %627 : vector<1x16xf32> to vector<8x16xf32>
    %629 = arith.addf %623, %628 : vector<8x16xf32>
    %cst_178 = arith.constant 2.500000e-01 : f32
    %630 = vector.broadcast %cst_178 : f32 to vector<8x16xf32>
    %631 = arith.mulf %629, %630 : vector<8x16xf32>
    %632 = vector.extract_strided_slice %40 {offsets = [2, 0], sizes = [1, 16], strides = [1, 1]} : vector<4x16xf32> to vector<1x16xf32>
    %633 = vector.broadcast %632 : vector<1x16xf32> to vector<8x16xf32>
    %634 = arith.addf %623, %633 : vector<8x16xf32>
    %cst_179 = arith.constant 2.500000e-01 : f32
    %635 = vector.broadcast %cst_179 : f32 to vector<8x16xf32>
    %636 = arith.mulf %634, %635 : vector<8x16xf32>
    %cst_180 = arith.constant dense<0.000000e+00> : vector<8x8xf32>
    %637 = tpu.matmul %631, %624, %cst_180 {dimension_numbers = #tpu.dot_dimension_numbers<[1], [1], [0], [0], [0, 0, 1, 0], [], []>} : vector<8x16xf32>, vector<8x16xf32>, vector<8x8xf32> -> vector<8x8xf32>
    %cst_181 = arith.constant dense<0.000000e+00> : vector<8x8xf32>
    %638 = tpu.matmul %636, %626, %cst_181 {dimension_numbers = #tpu.dot_dimension_numbers<[1], [1], [0], [0], [0, 0, 1, 0], [], []>} : vector<8x16xf32>, vector<8x16xf32>, vector<8x8xf32> -> vector<8x8xf32>
    %cst_182 = arith.constant 0.000000e+00 : f32
    %639 = vector.broadcast %cst_182 : f32 to vector<8x8xf32>
    %c0_i32_183 = arith.constant 0 : i32
    %640 = vector.broadcast %c0_i32_183 : i32 to vector<8x8xi32>
    %641 = arith.cmpi eq, %46, %640 : vector<8x8xi32>
    %642 = vector.extract_strided_slice %638 {offsets = [0, 0], sizes = [8, 1], strides = [1, 1]} : vector<8x8xf32> to vector<8x1xf32>
    %cst_184 = arith.constant 0.000000e+00 : f32
    %643 = vector.shape_cast %642 : vector<8x1xf32> to vector<8x1xf32>
    %644 = vector.broadcast %643 : vector<8x1xf32> to vector<8x8xf32>
    %645 = vector.broadcast %cst_184 : f32 to vector<8x8xf32>
    %646 = arith.select %641, %644, %645 : vector<8x8xi1>, vector<8x8xf32>
    %647 = arith.addf %639, %646 : vector<8x8xf32>
    %c1_i32_185 = arith.constant 1 : i32
    %648 = vector.broadcast %c1_i32_185 : i32 to vector<8x8xi32>
    %649 = arith.cmpi eq, %46, %648 : vector<8x8xi32>
    %650 = vector.extract_strided_slice %638 {offsets = [0, 1], sizes = [8, 1], strides = [1, 1]} : vector<8x8xf32> to vector<8x1xf32>
    %cst_186 = arith.constant 0.000000e+00 : f32
    %651 = vector.shape_cast %650 : vector<8x1xf32> to vector<8x1xf32>
    %652 = vector.broadcast %651 : vector<8x1xf32> to vector<8x8xf32>
    %653 = vector.broadcast %cst_186 : f32 to vector<8x8xf32>
    %654 = arith.select %649, %652, %653 : vector<8x8xi1>, vector<8x8xf32>
    %655 = arith.addf %647, %654 : vector<8x8xf32>
    %c2_i32_187 = arith.constant 2 : i32
    %656 = vector.broadcast %c2_i32_187 : i32 to vector<8x8xi32>
    %657 = arith.cmpi eq, %46, %656 : vector<8x8xi32>
    %658 = vector.extract_strided_slice %638 {offsets = [0, 2], sizes = [8, 1], strides = [1, 1]} : vector<8x8xf32> to vector<8x1xf32>
    %cst_188 = arith.constant 0.000000e+00 : f32
    %659 = vector.shape_cast %658 : vector<8x1xf32> to vector<8x1xf32>
    %660 = vector.broadcast %659 : vector<8x1xf32> to vector<8x8xf32>
    %661 = vector.broadcast %cst_188 : f32 to vector<8x8xf32>
    %662 = arith.select %657, %660, %661 : vector<8x8xi1>, vector<8x8xf32>
    %663 = arith.addf %655, %662 : vector<8x8xf32>
    %c3_i32_189 = arith.constant 3 : i32
    %664 = vector.broadcast %c3_i32_189 : i32 to vector<8x8xi32>
    %665 = arith.cmpi eq, %46, %664 : vector<8x8xi32>
    %666 = vector.extract_strided_slice %638 {offsets = [0, 3], sizes = [8, 1], strides = [1, 1]} : vector<8x8xf32> to vector<8x1xf32>
    %cst_190 = arith.constant 0.000000e+00 : f32
    %667 = vector.shape_cast %666 : vector<8x1xf32> to vector<8x1xf32>
    %668 = vector.broadcast %667 : vector<8x1xf32> to vector<8x8xf32>
    %669 = vector.broadcast %cst_190 : f32 to vector<8x8xf32>
    %670 = arith.select %665, %668, %669 : vector<8x8xi1>, vector<8x8xf32>
    %671 = arith.addf %663, %670 : vector<8x8xf32>
    %c4_i32_191 = arith.constant 4 : i32
    %672 = vector.broadcast %c4_i32_191 : i32 to vector<8x8xi32>
    %673 = arith.cmpi eq, %46, %672 : vector<8x8xi32>
    %674 = vector.extract_strided_slice %638 {offsets = [0, 4], sizes = [8, 1], strides = [1, 1]} : vector<8x8xf32> to vector<8x1xf32>
    %cst_192 = arith.constant 0.000000e+00 : f32
    %675 = vector.shape_cast %674 : vector<8x1xf32> to vector<8x1xf32>
    %676 = vector.broadcast %675 : vector<8x1xf32> to vector<8x8xf32>
    %677 = vector.broadcast %cst_192 : f32 to vector<8x8xf32>
    %678 = arith.select %673, %676, %677 : vector<8x8xi1>, vector<8x8xf32>
    %679 = arith.addf %671, %678 : vector<8x8xf32>
    %c5_i32_193 = arith.constant 5 : i32
    %680 = vector.broadcast %c5_i32_193 : i32 to vector<8x8xi32>
    %681 = arith.cmpi eq, %46, %680 : vector<8x8xi32>
    %682 = vector.extract_strided_slice %638 {offsets = [0, 5], sizes = [8, 1], strides = [1, 1]} : vector<8x8xf32> to vector<8x1xf32>
    %cst_194 = arith.constant 0.000000e+00 : f32
    %683 = vector.shape_cast %682 : vector<8x1xf32> to vector<8x1xf32>
    %684 = vector.broadcast %683 : vector<8x1xf32> to vector<8x8xf32>
    %685 = vector.broadcast %cst_194 : f32 to vector<8x8xf32>
    %686 = arith.select %681, %684, %685 : vector<8x8xi1>, vector<8x8xf32>
    %687 = arith.addf %679, %686 : vector<8x8xf32>
    %c6_i32_195 = arith.constant 6 : i32
    %688 = vector.broadcast %c6_i32_195 : i32 to vector<8x8xi32>
    %689 = arith.cmpi eq, %46, %688 : vector<8x8xi32>
    %690 = vector.extract_strided_slice %638 {offsets = [0, 6], sizes = [8, 1], strides = [1, 1]} : vector<8x8xf32> to vector<8x1xf32>
    %cst_196 = arith.constant 0.000000e+00 : f32
    %691 = vector.shape_cast %690 : vector<8x1xf32> to vector<8x1xf32>
    %692 = vector.broadcast %691 : vector<8x1xf32> to vector<8x8xf32>
    %693 = vector.broadcast %cst_196 : f32 to vector<8x8xf32>
    %694 = arith.select %689, %692, %693 : vector<8x8xi1>, vector<8x8xf32>
    %695 = arith.addf %687, %694 : vector<8x8xf32>
    %c7_i32_197 = arith.constant 7 : i32
    %696 = vector.broadcast %c7_i32_197 : i32 to vector<8x8xi32>
    %697 = arith.cmpi eq, %46, %696 : vector<8x8xi32>
    %698 = vector.extract_strided_slice %638 {offsets = [0, 7], sizes = [8, 1], strides = [1, 1]} : vector<8x8xf32> to vector<8x1xf32>
    %cst_198 = arith.constant 0.000000e+00 : f32
    %699 = vector.shape_cast %698 : vector<8x1xf32> to vector<8x1xf32>
    %700 = vector.broadcast %699 : vector<8x1xf32> to vector<8x8xf32>
    %701 = vector.broadcast %cst_198 : f32 to vector<8x8xf32>
    %702 = arith.select %697, %700, %701 : vector<8x8xi1>, vector<8x8xf32>
    %703 = arith.addf %695, %702 : vector<8x8xf32>
    %704 = arith.addf %637, %703 : vector<8x8xf32>
    %cst_199 = arith.constant -1.000000e+30 : f32
    %705 = vector.broadcast %cst_199 : f32 to vector<8x8xf32>
    %706 = arith.select %43, %705, %704 : vector<8x8xi1>, vector<8x8xf32>
    %cst_200 = arith.constant dense<0xFF800000> : vector<8xf32>
    %707 = vector.multi_reduction <maximumf>, %706, %cst_200 [1] : vector<8x8xf32> to vector<8xf32>
    %708 = vector.shape_cast %707 : vector<8xf32> to vector<8x1xf32>
    %709 = vector.broadcast %708 : vector<8x1xf32> to vector<8x8xf32>
    %710 = arith.subf %706, %709 : vector<8x8xf32>
    %711 = math.exp %710 : vector<8x8xf32>
    %cst_201 = arith.constant dense<0.000000e+00> : vector<8xf32>
    %712 = vector.multi_reduction <add>, %711, %cst_201 [1] : vector<8x8xf32> to vector<8xf32>
    %713 = vector.shape_cast %712 : vector<8xf32> to vector<8x1xf32>
    %714 = tpu.reciprocal %713 {approx = true} : vector<8x1xf32> -> vector<8x1xf32>
    %715 = vector.broadcast %714 : vector<8x1xf32> to vector<8x8xf32>
    %716 = arith.mulf %711, %715 : vector<8x8xf32>
    %cst_202 = arith.constant dense<0.000000e+00> : vector<8x16xf32>
    %717 = tpu.matmul %716, %625, %cst_202 {dimension_numbers = #tpu.dot_dimension_numbers<[1], [0], [0], [1], [0, 0, 1, 1], [], []>} : vector<8x8xf32>, vector<8x16xf32>, vector<8x16xf32> -> vector<8x16xf32>
    %c8_203 = arith.constant 8 : index
    %c32_204 = arith.constant 32 : index
    %718 = vector.load %arg32[%c8_203, %c32_204] : memref<16x64xf32, #tpu.memory_space<vmem>>, vector<8x16xf32>
    tpu.vector_store %arg32[%c8_203, %c32_204], %717 {strides = array<i32>} : memref<16x64xf32, #tpu.memory_space<vmem>>, vector<8x16xf32>,
    %719 = vector.extract_strided_slice %34 {offsets = [8, 48], sizes = [8, 16], strides = [1, 1]} : vector<16x192xf32> to vector<8x16xf32>
    %720 = vector.extract_strided_slice %34 {offsets = [8, 112], sizes = [8, 16], strides = [1, 1]} : vector<16x192xf32> to vector<8x16xf32>
    %721 = vector.extract_strided_slice %34 {offsets = [8, 176], sizes = [8, 16], strides = [1, 1]} : vector<16x192xf32> to vector<8x16xf32>
    %722 = vector.extract_strided_slice %38 {offsets = [0, 48], sizes = [8, 16], strides = [1, 1]} : vector<8x64xf32> to vector<8x16xf32>
    %723 = vector.extract_strided_slice %39 {offsets = [3, 0], sizes = [1, 16], strides = [1, 1]} : vector<4x16xf32> to vector<1x16xf32>
    %724 = vector.broadcast %723 : vector<1x16xf32> to vector<8x16xf32>
    %725 = arith.addf %719, %724 : vector<8x16xf32>
    %cst_205 = arith.constant 2.500000e-01 : f32
    %726 = vector.broadcast %cst_205 : f32 to vector<8x16xf32>
    %727 = arith.mulf %725, %726 : vector<8x16xf32>
    %728 = vector.extract_strided_slice %40 {offsets = [3, 0], sizes = [1, 16], strides = [1, 1]} : vector<4x16xf32> to vector<1x16xf32>
    %729 = vector.broadcast %728 : vector<1x16xf32> to vector<8x16xf32>
    %730 = arith.addf %719, %729 : vector<8x16xf32>
    %cst_206 = arith.constant 2.500000e-01 : f32
    %731 = vector.broadcast %cst_206 : f32 to vector<8x16xf32>
    %732 = arith.mulf %730, %731 : vector<8x16xf32>
    %cst_207 = arith.constant dense<0.000000e+00> : vector<8x8xf32>
    %733 = tpu.matmul %727, %720, %cst_207 {dimension_numbers = #tpu.dot_dimension_numbers<[1], [1], [0], [0], [0, 0, 1, 0], [], []>} : vector<8x16xf32>, vector<8x16xf32>, vector<8x8xf32> -> vector<8x8xf32>
    %cst_208 = arith.constant dense<0.000000e+00> : vector<8x8xf32>
    %734 = tpu.matmul %732, %722, %cst_208 {dimension_numbers = #tpu.dot_dimension_numbers<[1], [1], [0], [0], [0, 0, 1, 0], [], []>} : vector<8x16xf32>, vector<8x16xf32>, vector<8x8xf32> -> vector<8x8xf32>
    %cst_209 = arith.constant 0.000000e+00 : f32
    %735 = vector.broadcast %cst_209 : f32 to vector<8x8xf32>
    %c0_i32_210 = arith.constant 0 : i32
    %736 = vector.broadcast %c0_i32_210 : i32 to vector<8x8xi32>
    %737 = arith.cmpi eq, %46, %736 : vector<8x8xi32>
    %738 = vector.extract_strided_slice %734 {offsets = [0, 0], sizes = [8, 1], strides = [1, 1]} : vector<8x8xf32> to vector<8x1xf32>
    %cst_211 = arith.constant 0.000000e+00 : f32
    %739 = vector.shape_cast %738 : vector<8x1xf32> to vector<8x1xf32>
    %740 = vector.broadcast %739 : vector<8x1xf32> to vector<8x8xf32>
    %741 = vector.broadcast %cst_211 : f32 to vector<8x8xf32>
    %742 = arith.select %737, %740, %741 : vector<8x8xi1>, vector<8x8xf32>
    %743 = arith.addf %735, %742 : vector<8x8xf32>
    %c1_i32_212 = arith.constant 1 : i32
    %744 = vector.broadcast %c1_i32_212 : i32 to vector<8x8xi32>
    %745 = arith.cmpi eq, %46, %744 : vector<8x8xi32>
    %746 = vector.extract_strided_slice %734 {offsets = [0, 1], sizes = [8, 1], strides = [1, 1]} : vector<8x8xf32> to vector<8x1xf32>
    %cst_213 = arith.constant 0.000000e+00 : f32
    %747 = vector.shape_cast %746 : vector<8x1xf32> to vector<8x1xf32>
    %748 = vector.broadcast %747 : vector<8x1xf32> to vector<8x8xf32>
    %749 = vector.broadcast %cst_213 : f32 to vector<8x8xf32>
    %750 = arith.select %745, %748, %749 : vector<8x8xi1>, vector<8x8xf32>
    %751 = arith.addf %743, %750 : vector<8x8xf32>
    %c2_i32_214 = arith.constant 2 : i32
    %752 = vector.broadcast %c2_i32_214 : i32 to vector<8x8xi32>
    %753 = arith.cmpi eq, %46, %752 : vector<8x8xi32>
    %754 = vector.extract_strided_slice %734 {offsets = [0, 2], sizes = [8, 1], strides = [1, 1]} : vector<8x8xf32> to vector<8x1xf32>
    %cst_215 = arith.constant 0.000000e+00 : f32
    %755 = vector.shape_cast %754 : vector<8x1xf32> to vector<8x1xf32>
    %756 = vector.broadcast %755 : vector<8x1xf32> to vector<8x8xf32>
    %757 = vector.broadcast %cst_215 : f32 to vector<8x8xf32>
    %758 = arith.select %753, %756, %757 : vector<8x8xi1>, vector<8x8xf32>
    %759 = arith.addf %751, %758 : vector<8x8xf32>
    %c3_i32_216 = arith.constant 3 : i32
    %760 = vector.broadcast %c3_i32_216 : i32 to vector<8x8xi32>
    %761 = arith.cmpi eq, %46, %760 : vector<8x8xi32>
    %762 = vector.extract_strided_slice %734 {offsets = [0, 3], sizes = [8, 1], strides = [1, 1]} : vector<8x8xf32> to vector<8x1xf32>
    %cst_217 = arith.constant 0.000000e+00 : f32
    %763 = vector.shape_cast %762 : vector<8x1xf32> to vector<8x1xf32>
    %764 = vector.broadcast %763 : vector<8x1xf32> to vector<8x8xf32>
    %765 = vector.broadcast %cst_217 : f32 to vector<8x8xf32>
    %766 = arith.select %761, %764, %765 : vector<8x8xi1>, vector<8x8xf32>
    %767 = arith.addf %759, %766 : vector<8x8xf32>
    %c4_i32_218 = arith.constant 4 : i32
    %768 = vector.broadcast %c4_i32_218 : i32 to vector<8x8xi32>
    %769 = arith.cmpi eq, %46, %768 : vector<8x8xi32>
    %770 = vector.extract_strided_slice %734 {offsets = [0, 4], sizes = [8, 1], strides = [1, 1]} : vector<8x8xf32> to vector<8x1xf32>
    %cst_219 = arith.constant 0.000000e+00 : f32
    %771 = vector.shape_cast %770 : vector<8x1xf32> to vector<8x1xf32>
    %772 = vector.broadcast %771 : vector<8x1xf32> to vector<8x8xf32>
    %773 = vector.broadcast %cst_219 : f32 to vector<8x8xf32>
    %774 = arith.select %769, %772, %773 : vector<8x8xi1>, vector<8x8xf32>
    %775 = arith.addf %767, %774 : vector<8x8xf32>
    %c5_i32_220 = arith.constant 5 : i32
    %776 = vector.broadcast %c5_i32_220 : i32 to vector<8x8xi32>
    %777 = arith.cmpi eq, %46, %776 : vector<8x8xi32>
    %778 = vector.extract_strided_slice %734 {offsets = [0, 5], sizes = [8, 1], strides = [1, 1]} : vector<8x8xf32> to vector<8x1xf32>
    %cst_221 = arith.constant 0.000000e+00 : f32
    %779 = vector.shape_cast %778 : vector<8x1xf32> to vector<8x1xf32>
    %780 = vector.broadcast %779 : vector<8x1xf32> to vector<8x8xf32>
    %781 = vector.broadcast %cst_221 : f32 to vector<8x8xf32>
    %782 = arith.select %777, %780, %781 : vector<8x8xi1>, vector<8x8xf32>
    %783 = arith.addf %775, %782 : vector<8x8xf32>
    %c6_i32_222 = arith.constant 6 : i32
    %784 = vector.broadcast %c6_i32_222 : i32 to vector<8x8xi32>
    %785 = arith.cmpi eq, %46, %784 : vector<8x8xi32>
    %786 = vector.extract_strided_slice %734 {offsets = [0, 6], sizes = [8, 1], strides = [1, 1]} : vector<8x8xf32> to vector<8x1xf32>
    %cst_223 = arith.constant 0.000000e+00 : f32
    %787 = vector.shape_cast %786 : vector<8x1xf32> to vector<8x1xf32>
    %788 = vector.broadcast %787 : vector<8x1xf32> to vector<8x8xf32>
    %789 = vector.broadcast %cst_223 : f32 to vector<8x8xf32>
    %790 = arith.select %785, %788, %789 : vector<8x8xi1>, vector<8x8xf32>
    %791 = arith.addf %783, %790 : vector<8x8xf32>
    %c7_i32_224 = arith.constant 7 : i32
    %792 = vector.broadcast %c7_i32_224 : i32 to vector<8x8xi32>
    %793 = arith.cmpi eq, %46, %792 : vector<8x8xi32>
    %794 = vector.extract_strided_slice %734 {offsets = [0, 7], sizes = [8, 1], strides = [1, 1]} : vector<8x8xf32> to vector<8x1xf32>
    %cst_225 = arith.constant 0.000000e+00 : f32
    %795 = vector.shape_cast %794 : vector<8x1xf32> to vector<8x1xf32>
    %796 = vector.broadcast %795 : vector<8x1xf32> to vector<8x8xf32>
    %797 = vector.broadcast %cst_225 : f32 to vector<8x8xf32>
    %798 = arith.select %793, %796, %797 : vector<8x8xi1>, vector<8x8xf32>
    %799 = arith.addf %791, %798 : vector<8x8xf32>
    %800 = arith.addf %733, %799 : vector<8x8xf32>
    %cst_226 = arith.constant -1.000000e+30 : f32
    %801 = vector.broadcast %cst_226 : f32 to vector<8x8xf32>
    %802 = arith.select %43, %801, %800 : vector<8x8xi1>, vector<8x8xf32>
    %cst_227 = arith.constant dense<0xFF800000> : vector<8xf32>
    %803 = vector.multi_reduction <maximumf>, %802, %cst_227 [1] : vector<8x8xf32> to vector<8xf32>
    %804 = vector.shape_cast %803 : vector<8xf32> to vector<8x1xf32>
    %805 = vector.broadcast %804 : vector<8x1xf32> to vector<8x8xf32>
    %806 = arith.subf %802, %805 : vector<8x8xf32>
    %807 = math.exp %806 : vector<8x8xf32>
    %cst_228 = arith.constant dense<0.000000e+00> : vector<8xf32>
    %808 = vector.multi_reduction <add>, %807, %cst_228 [1] : vector<8x8xf32> to vector<8xf32>
    %809 = vector.shape_cast %808 : vector<8xf32> to vector<8x1xf32>
    %810 = tpu.reciprocal %809 {approx = true} : vector<8x1xf32> -> vector<8x1xf32>
    %811 = vector.broadcast %810 : vector<8x1xf32> to vector<8x8xf32>
    %812 = arith.mulf %807, %811 : vector<8x8xf32>
    %cst_229 = arith.constant dense<0.000000e+00> : vector<8x16xf32>
    %813 = tpu.matmul %812, %721, %cst_229 {dimension_numbers = #tpu.dot_dimension_numbers<[1], [0], [0], [1], [0, 0, 1, 1], [], []>} : vector<8x8xf32>, vector<8x16xf32>, vector<8x16xf32> -> vector<8x16xf32>
    %c8_230 = arith.constant 8 : index
    %c48_231 = arith.constant 48 : index
    %814 = vector.load %arg32[%c8_230, %c48_231] : memref<16x64xf32, #tpu.memory_space<vmem>>, vector<8x16xf32>
    tpu.vector_store %arg32[%c8_230, %c48_231], %813 {strides = array<i32>} : memref<16x64xf32, #tpu.memory_space<vmem>>, vector<8x16xf32>,
    %c0_232 = arith.constant 0 : index
    %c0_233 = arith.constant 0 : index
    %815 = vector.load %arg32[%c0_232, %c0_233] : memref<16x64xf32, #tpu.memory_space<vmem>>, vector<16x64xf32>
    %c0_234 = arith.constant 0 : index
    %c0_235 = arith.constant 0 : index
    %c0_236 = arith.constant 0 : index
    %816 = vector.load %arg11[%c0_234, %c0_235, %c0_236] : memref<1x64x32xf32, #tpu.memory_space<vmem>>, vector<1x64x32xf32>
    %817 = vector.shape_cast %816 : vector<1x64x32xf32> to vector<64x32xf32>
    %cst_237 = arith.constant dense<0.000000e+00> : vector<16x32xf32>
    %818 = tpu.matmul %815, %817, %cst_237 {dimension_numbers = #tpu.dot_dimension_numbers<[1], [0], [0], [1], [0, 0, 1, 1], [], []>} : vector<16x64xf32>, vector<64x32xf32>, vector<16x32xf32> -> vector<16x32xf32>
    %c0_238 = arith.constant 0 : index
    %c0_239 = arith.constant 0 : index
    %c0_240 = arith.constant 0 : index
    %819 = vector.load %arg12[%c0_238, %c0_239, %c0_240] : memref<1x32x96xf32, #tpu.memory_space<vmem>>, vector<1x32x96xf32>
    %820 = vector.shape_cast %819 : vector<1x32x96xf32> to vector<32x96xf32>
    %c0_241 = arith.constant 0 : index
    %c0_242 = arith.constant 0 : index
    %c0_243 = arith.constant 0 : index
    %821 = vector.load %arg13[%c0_241, %c0_242, %c0_243] : memref<1x1x96xf32, #tpu.memory_space<vmem>>, vector<1x1x96xf32>
    %822 = vector.shape_cast %821 : vector<1x1x96xf32> to vector<1x96xf32>
    %c0_244 = arith.constant 0 : index
    %c0_245 = arith.constant 0 : index
    %c0_246 = arith.constant 0 : index
    %823 = vector.load %arg14[%c0_244, %c0_245, %c0_246] : memref<1x32x64xf32, #tpu.memory_space<vmem>>, vector<1x32x64xf32>
    %824 = vector.shape_cast %823 : vector<1x32x64xf32> to vector<32x64xf32>
    %c0_247 = arith.constant 0 : index
    %c0_248 = arith.constant 0 : index
    %c0_249 = arith.constant 0 : index
    %825 = vector.load %arg15[%c0_247, %c0_248, %c0_249] : memref<1x1x64xf32, #tpu.memory_space<vmem>>, vector<1x1x64xf32>
    %826 = vector.shape_cast %825 : vector<1x1x64xf32> to vector<1x64xf32>
    %c0_250 = arith.constant 0 : index
    %c0_251 = arith.constant 0 : index
    %c0_252 = arith.constant 0 : index
    %827 = vector.load %arg16[%c0_250, %c0_251, %c0_252] : memref<1x32x32xf32, #tpu.memory_space<vmem>>, vector<1x32x32xf32>
    %828 = vector.shape_cast %827 : vector<1x32x32xf32> to vector<32x32xf32>
    %c0_253 = arith.constant 0 : index
    %c0_254 = arith.constant 0 : index
    %c0_255 = arith.constant 0 : index
    %829 = vector.load %arg17[%c0_253, %c0_254, %c0_255] : memref<1x1x32xf32, #tpu.memory_space<vmem>>, vector<1x1x32xf32>
    %830 = vector.shape_cast %829 : vector<1x1x32xf32> to vector<1x32xf32>
    %cst_256 = arith.constant dense<0.000000e+00> : vector<16x96xf32>
    %831 = tpu.matmul %818, %820, %cst_256 {dimension_numbers = #tpu.dot_dimension_numbers<[1], [0], [0], [1], [0, 0, 1, 1], [], []>} : vector<16x32xf32>, vector<32x96xf32>, vector<16x96xf32> -> vector<16x96xf32>
    %832 = vector.broadcast %822 : vector<1x96xf32> to vector<16x96xf32>
    %833 = arith.addf %831, %832 : vector<16x96xf32>
    %cst_257 = arith.constant dense<0.000000e+00> : vector<16x64xf32>
    %834 = tpu.matmul %3, %824, %cst_257 {dimension_numbers = #tpu.dot_dimension_numbers<[1], [0], [0], [1], [0, 0, 1, 1], [], []>} : vector<16x32xf32>, vector<32x64xf32>, vector<16x64xf32> -> vector<16x64xf32>
    %835 = vector.broadcast %826 : vector<1x64xf32> to vector<16x64xf32>
    %836 = arith.addf %834, %835 : vector<16x64xf32>
    %837 = vector.extract_strided_slice %833 {offsets = [0, 0], sizes = [16, 32], strides = [1, 1]} : vector<16x96xf32> to vector<16x32xf32>
    %838 = vector.extract_strided_slice %836 {offsets = [0, 0], sizes = [16, 32], strides = [1, 1]} : vector<16x64xf32> to vector<16x32xf32>
    %839 = arith.addf %837, %838 : vector<16x32xf32>
    %840 = arith.negf %839 : vector<16x32xf32>
    %841 = math.exp %840 : vector<16x32xf32>
    %cst_258 = arith.constant 1.000000e+00 : f32
    %842 = vector.broadcast %cst_258 : f32 to vector<16x32xf32>
    %843 = arith.addf %842, %841 : vector<16x32xf32>
    %844 = arith.divf %842, %843 : vector<16x32xf32>
    %845 = vector.extract_strided_slice %833 {offsets = [0, 32], sizes = [16, 32], strides = [1, 1]} : vector<16x96xf32> to vector<16x32xf32>
    %846 = vector.extract_strided_slice %836 {offsets = [0, 32], sizes = [16, 32], strides = [1, 1]} : vector<16x64xf32> to vector<16x32xf32>
    %847 = arith.addf %845, %846 : vector<16x32xf32>
    %cst_259 = arith.constant 1.000000e-01 : f32
    %848 = vector.broadcast %cst_259 : f32 to vector<16x32xf32>
    %849 = arith.subf %847, %848 : vector<16x32xf32>
    %850 = arith.negf %849 : vector<16x32xf32>
    %851 = math.exp %850 : vector<16x32xf32>
    %cst_260 = arith.constant 1.000000e+00 : f32
    %852 = vector.broadcast %cst_260 : f32 to vector<16x32xf32>
    %853 = arith.addf %852, %851 : vector<16x32xf32>
    %854 = arith.divf %852, %853 : vector<16x32xf32>
    %855 = vector.extract_strided_slice %833 {offsets = [0, 64], sizes = [16, 32], strides = [1, 1]} : vector<16x96xf32> to vector<16x32xf32>
    %856 = arith.mulf %844, %3 : vector<16x32xf32>
    %cst_261 = arith.constant dense<0.000000e+00> : vector<16x32xf32>
    %857 = tpu.matmul %856, %828, %cst_261 {dimension_numbers = #tpu.dot_dimension_numbers<[1], [0], [0], [1], [0, 0, 1, 1], [], []>} : vector<16x32xf32>, vector<32x32xf32>, vector<16x32xf32> -> vector<16x32xf32>
    %858 = arith.addf %855, %857 : vector<16x32xf32>
    %859 = vector.broadcast %830 : vector<1x32xf32> to vector<16x32xf32>
    %860 = arith.addf %858, %859 : vector<16x32xf32>
    %861 = math.tanh %860 : vector<16x32xf32>
    %cst_262 = arith.constant 1.000000e+00 : f32
    %862 = vector.broadcast %cst_262 : f32 to vector<16x32xf32>
    %863 = arith.subf %862, %854 : vector<16x32xf32>
    %864 = arith.mulf %863, %3 : vector<16x32xf32>
    %865 = arith.mulf %854, %861 : vector<16x32xf32>
    %866 = arith.addf %864, %865 : vector<16x32xf32>
    %c0_263 = arith.constant 0 : index
    %c0_264 = arith.constant 0 : index
    %c0_265 = arith.constant 0 : index
    %867 = vector.load %arg18[%c0_263, %c0_264, %c0_265] : memref<1x1x32xf32, #tpu.memory_space<vmem>>, vector<1x1x32xf32>
    %868 = vector.shape_cast %867 : vector<1x1x32xf32> to vector<1x32xf32>
    %c0_266 = arith.constant 0 : index
    %c0_267 = arith.constant 0 : index
    %c0_268 = arith.constant 0 : index
    %869 = vector.load %arg19[%c0_266, %c0_267, %c0_268] : memref<1x1x32xf32, #tpu.memory_space<vmem>>, vector<1x1x32xf32>
    %870 = vector.shape_cast %869 : vector<1x1x32xf32> to vector<1x32xf32>
    %cst_269 = arith.constant dense<0.000000e+00> : vector<16xf32>
    %871 = vector.multi_reduction <add>, %866, %cst_269 [1] : vector<16x32xf32> to vector<16xf32>
    %872 = vector.shape_cast %871 : vector<16xf32> to vector<16x1xf32>
    %cst_270 = arith.constant 3.200000e+01 : f32
    %873 = vector.broadcast %cst_270 : f32 to vector<16x1xf32>
    %874 = arith.divf %872, %873 : vector<16x1xf32>
    %875 = vector.broadcast %874 : vector<16x1xf32> to vector<16x32xf32>
    %876 = arith.subf %866, %875 : vector<16x32xf32>
    %877 = vector.broadcast %874 : vector<16x1xf32> to vector<16x32xf32>
    %878 = arith.subf %866, %877 : vector<16x32xf32>
    %879 = arith.mulf %876, %878 : vector<16x32xf32>
    %cst_271 = arith.constant dense<0.000000e+00> : vector<16xf32>
    %880 = vector.multi_reduction <add>, %879, %cst_271 [1] : vector<16x32xf32> to vector<16xf32>
    %881 = vector.shape_cast %880 : vector<16xf32> to vector<16x1xf32>
    %cst_272 = arith.constant 3.200000e+01 : f32
    %882 = vector.broadcast %cst_272 : f32 to vector<16x1xf32>
    %883 = arith.divf %881, %882 : vector<16x1xf32>
    %884 = vector.broadcast %874 : vector<16x1xf32> to vector<16x32xf32>
    %885 = arith.subf %866, %884 : vector<16x32xf32>
    %cst_273 = arith.constant 9.99999974E-6 : f32
    %886 = vector.broadcast %cst_273 : f32 to vector<16x1xf32>
    %887 = arith.addf %883, %886 : vector<16x1xf32>
    %888 = math.rsqrt %887 : vector<16x1xf32>
    %889 = vector.broadcast %888 : vector<16x1xf32> to vector<16x32xf32>
    %890 = arith.mulf %885, %889 : vector<16x32xf32>
    %891 = vector.broadcast %868 : vector<1x32xf32> to vector<16x32xf32>
    %892 = arith.mulf %890, %891 : vector<16x32xf32>
    %893 = vector.broadcast %870 : vector<1x32xf32> to vector<16x32xf32>
    %894 = arith.addf %892, %893 : vector<16x32xf32>
    %c0_274 = arith.constant 0 : index
    %c0_275 = arith.constant 0 : index
    %c0_276 = arith.constant 0 : index
    %895 = vector.load %arg20[%c0_274, %c0_275, %c0_276] : memref<1x32x64xf32, #tpu.memory_space<vmem>>, vector<1x32x64xf32>
    %896 = vector.shape_cast %895 : vector<1x32x64xf32> to vector<32x64xf32>
    %cst_277 = arith.constant dense<0.000000e+00> : vector<16x64xf32>
    %897 = tpu.matmul %894, %896, %cst_277 {dimension_numbers = #tpu.dot_dimension_numbers<[1], [0], [0], [1], [0, 0, 1, 1], [], []>} : vector<16x32xf32>, vector<32x64xf32>, vector<16x64xf32> -> vector<16x64xf32>
    %c0_278 = arith.constant 0 : index
    %c0_279 = arith.constant 0 : index
    %c0_280 = arith.constant 0 : index
    %898 = vector.load %arg21[%c0_278, %c0_279, %c0_280] : memref<1x1x64xf32, #tpu.memory_space<vmem>>, vector<1x1x64xf32>
    %899 = vector.shape_cast %898 : vector<1x1x64xf32> to vector<1x64xf32>
    %900 = vector.broadcast %899 : vector<1x64xf32> to vector<16x64xf32>
    %901 = arith.addf %897, %900 : vector<16x64xf32>
    %cst_281 = arith.constant 0.000000e+00 : f32
    %902 = vector.broadcast %cst_281 : f32 to vector<16x64xf32>
    %903 = arith.maximumf %901, %902 : vector<16x64xf32>
    %c0_282 = arith.constant 0 : index
    %c0_283 = arith.constant 0 : index
    %c0_284 = arith.constant 0 : index
    %904 = vector.load %arg22[%c0_282, %c0_283, %c0_284] : memref<1x64x32xf32, #tpu.memory_space<vmem>>, vector<1x64x32xf32>
    %905 = vector.shape_cast %904 : vector<1x64x32xf32> to vector<64x32xf32>
    %cst_285 = arith.constant dense<0.000000e+00> : vector<16x32xf32>
    %906 = tpu.matmul %903, %905, %cst_285 {dimension_numbers = #tpu.dot_dimension_numbers<[1], [0], [0], [1], [0, 0, 1, 1], [], []>} : vector<16x64xf32>, vector<64x32xf32>, vector<16x32xf32> -> vector<16x32xf32>
    %c0_286 = arith.constant 0 : index
    %c0_287 = arith.constant 0 : index
    %c0_288 = arith.constant 0 : index
    %907 = vector.load %arg23[%c0_286, %c0_287, %c0_288] : memref<1x1x32xf32, #tpu.memory_space<vmem>>, vector<1x1x32xf32>
    %908 = vector.shape_cast %907 : vector<1x1x32xf32> to vector<1x32xf32>
    %909 = vector.broadcast %908 : vector<1x32xf32> to vector<16x32xf32>
    %910 = arith.addf %906, %909 : vector<16x32xf32>
    %c0_289 = arith.constant 0 : index
    %c0_290 = arith.constant 0 : index
    %c0_291 = arith.constant 0 : index
    %911 = vector.load %arg24[%c0_289, %c0_290, %c0_291] : memref<1x32x96xf32, #tpu.memory_space<vmem>>, vector<1x32x96xf32>
    %912 = vector.shape_cast %911 : vector<1x32x96xf32> to vector<32x96xf32>
    %c0_292 = arith.constant 0 : index
    %c0_293 = arith.constant 0 : index
    %c0_294 = arith.constant 0 : index
    %913 = vector.load %arg25[%c0_292, %c0_293, %c0_294] : memref<1x1x96xf32, #tpu.memory_space<vmem>>, vector<1x1x96xf32>
    %914 = vector.shape_cast %913 : vector<1x1x96xf32> to vector<1x96xf32>
    %c0_295 = arith.constant 0 : index
    %c0_296 = arith.constant 0 : index
    %c0_297 = arith.constant 0 : index
    %915 = vector.load %arg26[%c0_295, %c0_296, %c0_297] : memref<1x32x64xf32, #tpu.memory_space<vmem>>, vector<1x32x64xf32>
    %916 = vector.shape_cast %915 : vector<1x32x64xf32> to vector<32x64xf32>
    %c0_298 = arith.constant 0 : index
    %c0_299 = arith.constant 0 : index
    %c0_300 = arith.constant 0 : index
    %917 = vector.load %arg27[%c0_298, %c0_299, %c0_300] : memref<1x1x64xf32, #tpu.memory_space<vmem>>, vector<1x1x64xf32>
    %918 = vector.shape_cast %917 : vector<1x1x64xf32> to vector<1x64xf32>
    %c0_301 = arith.constant 0 : index
    %c0_302 = arith.constant 0 : index
    %c0_303 = arith.constant 0 : index
    %919 = vector.load %arg28[%c0_301, %c0_302, %c0_303] : memref<1x32x32xf32, #tpu.memory_space<vmem>>, vector<1x32x32xf32>
    %920 = vector.shape_cast %919 : vector<1x32x32xf32> to vector<32x32xf32>
    %c0_304 = arith.constant 0 : index
    %c0_305 = arith.constant 0 : index
    %c0_306 = arith.constant 0 : index
    %921 = vector.load %arg29[%c0_304, %c0_305, %c0_306] : memref<1x1x32xf32, #tpu.memory_space<vmem>>, vector<1x1x32xf32>
    %922 = vector.shape_cast %921 : vector<1x1x32xf32> to vector<1x32xf32>
    %cst_307 = arith.constant dense<0.000000e+00> : vector<16x96xf32>
    %923 = tpu.matmul %910, %912, %cst_307 {dimension_numbers = #tpu.dot_dimension_numbers<[1], [0], [0], [1], [0, 0, 1, 1], [], []>} : vector<16x32xf32>, vector<32x96xf32>, vector<16x96xf32> -> vector<16x96xf32>
    %924 = vector.broadcast %914 : vector<1x96xf32> to vector<16x96xf32>
    %925 = arith.addf %923, %924 : vector<16x96xf32>
    %cst_308 = arith.constant dense<0.000000e+00> : vector<16x64xf32>
    %926 = tpu.matmul %866, %916, %cst_308 {dimension_numbers = #tpu.dot_dimension_numbers<[1], [0], [0], [1], [0, 0, 1, 1], [], []>} : vector<16x32xf32>, vector<32x64xf32>, vector<16x64xf32> -> vector<16x64xf32>
    %927 = vector.broadcast %918 : vector<1x64xf32> to vector<16x64xf32>
    %928 = arith.addf %926, %927 : vector<16x64xf32>
    %929 = vector.extract_strided_slice %925 {offsets = [0, 0], sizes = [16, 32], strides = [1, 1]} : vector<16x96xf32> to vector<16x32xf32>
    %930 = vector.extract_strided_slice %928 {offsets = [0, 0], sizes = [16, 32], strides = [1, 1]} : vector<16x64xf32> to vector<16x32xf32>
    %931 = arith.addf %929, %930 : vector<16x32xf32>
    %932 = arith.negf %931 : vector<16x32xf32>
    %933 = math.exp %932 : vector<16x32xf32>
    %cst_309 = arith.constant 1.000000e+00 : f32
    %934 = vector.broadcast %cst_309 : f32 to vector<16x32xf32>
    %935 = arith.addf %934, %933 : vector<16x32xf32>
    %936 = arith.divf %934, %935 : vector<16x32xf32>
    %937 = vector.extract_strided_slice %925 {offsets = [0, 32], sizes = [16, 32], strides = [1, 1]} : vector<16x96xf32> to vector<16x32xf32>
    %938 = vector.extract_strided_slice %928 {offsets = [0, 32], sizes = [16, 32], strides = [1, 1]} : vector<16x64xf32> to vector<16x32xf32>
    %939 = arith.addf %937, %938 : vector<16x32xf32>
    %cst_310 = arith.constant 1.000000e-01 : f32
    %940 = vector.broadcast %cst_310 : f32 to vector<16x32xf32>
    %941 = arith.subf %939, %940 : vector<16x32xf32>
    %942 = arith.negf %941 : vector<16x32xf32>
    %943 = math.exp %942 : vector<16x32xf32>
    %cst_311 = arith.constant 1.000000e+00 : f32
    %944 = vector.broadcast %cst_311 : f32 to vector<16x32xf32>
    %945 = arith.addf %944, %943 : vector<16x32xf32>
    %946 = arith.divf %944, %945 : vector<16x32xf32>
    %947 = vector.extract_strided_slice %925 {offsets = [0, 64], sizes = [16, 32], strides = [1, 1]} : vector<16x96xf32> to vector<16x32xf32>
    %948 = arith.mulf %936, %866 : vector<16x32xf32>
    %cst_312 = arith.constant dense<0.000000e+00> : vector<16x32xf32>
    %949 = tpu.matmul %948, %920, %cst_312 {dimension_numbers = #tpu.dot_dimension_numbers<[1], [0], [0], [1], [0, 0, 1, 1], [], []>} : vector<16x32xf32>, vector<32x32xf32>, vector<16x32xf32> -> vector<16x32xf32>
    %950 = arith.addf %947, %949 : vector<16x32xf32>
    %951 = vector.broadcast %922 : vector<1x32xf32> to vector<16x32xf32>
    %952 = arith.addf %950, %951 : vector<16x32xf32>
    %953 = math.tanh %952 : vector<16x32xf32>
    %cst_313 = arith.constant 1.000000e+00 : f32
    %954 = vector.broadcast %cst_313 : f32 to vector<16x32xf32>
    %955 = arith.subf %954, %946 : vector<16x32xf32>
    %956 = arith.mulf %955, %866 : vector<16x32xf32>
    %957 = arith.mulf %946, %953 : vector<16x32xf32>
    %958 = arith.addf %956, %957 : vector<16x32xf32>
    %c0_314 = arith.constant 0 : index
    %c0_315 = arith.constant 0 : index
    %959 = vector.load %arg31[%c0_314, %c0_315] : memref<16x32xf32, #tpu.memory_space<vmem>>, vector<16x32xf32>
    tpu.vector_store %arg31[%c0_314, %c0_315], %958 {strides = array<i32>} : memref<16x32xf32, #tpu.memory_space<vmem>>, vector<16x32xf32>,
    %c1_i32_316 = arith.constant 1 : i32
    %960 = arith.cmpi eq, %arg0, %c1_i32_316 : i32
    %961 = arith.extui %960 : i1 to i32
    %c0_i32_317 = arith.constant 0 : i32
    %962 = arith.cmpi ne, %961, %c0_i32_317 : i32
    scf.if %962 {
      %c0_318 = arith.constant 0 : index
      %c0_319 = arith.constant 0 : index
      %963 = vector.load %arg5[%c0_318, %c0_319] : memref<32x4xf32, #tpu.memory_space<vmem>>, vector<32x4xf32>
      %cst_320 = arith.constant dense<0.000000e+00> : vector<16x4xf32>
      %964 = tpu.matmul %958, %963, %cst_320 {dimension_numbers = #tpu.dot_dimension_numbers<[1], [0], [0], [1], [0, 0, 1, 1], [], []>} : vector<16x32xf32>, vector<32x4xf32>, vector<16x4xf32> -> vector<16x4xf32>
      %c0_321 = arith.constant 0 : index
      %c0_322 = arith.constant 0 : index
      %965 = vector.load %arg6[%c0_321, %c0_322] : memref<1x4xf32, #tpu.memory_space<vmem>>, vector<1x4xf32>
      %966 = vector.broadcast %965 : vector<1x4xf32> to vector<16x4xf32>
      %967 = arith.addf %964, %966 : vector<16x4xf32>
      %cst_323 = arith.constant dense<0xFF800000> : vector<16xf32>
      %968 = vector.multi_reduction <maximumf>, %967, %cst_323 [1] : vector<16x4xf32> to vector<16xf32>
      %969 = vector.shape_cast %968 : vector<16xf32> to vector<16x1xf32>
      %970 = vector.broadcast %969 : vector<16x1xf32> to vector<16x4xf32>
      %971 = arith.subf %967, %970 : vector<16x4xf32>
      %972 = math.exp %971 : vector<16x4xf32>
      %cst_324 = arith.constant dense<0.000000e+00> : vector<16xf32>
      %973 = vector.multi_reduction <add>, %972, %cst_324 [1] : vector<16x4xf32> to vector<16xf32>
      %974 = vector.shape_cast %973 : vector<16xf32> to vector<16x1xf32>
      %975 = vector.broadcast %974 : vector<16x1xf32> to vector<16x4xf32>
      %976 = arith.divf %972, %975 : vector<16x4xf32>
      %c0_325 = arith.constant 0 : index
      %c0_326 = arith.constant 0 : index
      %977 = vector.load %arg30[%c0_325, %c0_326] : memref<16x4xf32, #tpu.memory_space<vmem>>, vector<16x4xf32>
      tpu.vector_store %arg30[%c0_325, %c0_326], %976 {strides = array<i32>} : memref<16x4xf32, #tpu.memory_space<vmem>>, vector<16x4xf32>,
    } else {
    }
    return
  }
  func.func @transform_0(%arg0: i32) -> (i32, i32) {
    %c0_i32 = arith.constant 0 : i32
    %c0_i32_0 = arith.constant 0 : i32
    %c0_i32_1 = arith.constant 0 : i32
    return %c0_i32, %c0_i32_0 : i32, i32
  }
  func.func @transform_1(%arg0: i32) -> (i32, i32) {
    %c0_i32 = arith.constant 0 : i32
    %c0_i32_0 = arith.constant 0 : i32
    %c0_i32_1 = arith.constant 0 : i32
    return %c0_i32, %c0_i32_0 : i32, i32
  }
  func.func @transform_2(%arg0: i32) -> (i32, i32) {
    %c0_i32 = arith.constant 0 : i32
    %c0_i32_0 = arith.constant 0 : i32
    %c0_i32_1 = arith.constant 0 : i32
    return %c0_i32, %c0_i32_0 : i32, i32
  }
  func.func @transform_3(%arg0: i32) -> (i32, i32) {
    %c0_i32 = arith.constant 0 : i32
    %c0_i32_0 = arith.constant 0 : i32
    %c0_i32_1 = arith.constant 0 : i32
    return %c0_i32, %c0_i32_0 : i32, i32
  }
  func.func @transform_4(%arg0: i32) -> (i32, i32) {
    %c0_i32 = arith.constant 0 : i32
    %c0_i32_0 = arith.constant 0 : i32
    %c0_i32_1 = arith.constant 0 : i32
    return %c0_i32, %c0_i32_0 : i32, i32
  }
  func.func @transform_5(%arg0: i32) -> (i32, i32) {
    %c0_i32 = arith.constant 0 : i32
    %c0_i32_0 = arith.constant 0 : i32
    %c0_i32_1 = arith.constant 0 : i32
    return %c0_i32, %c0_i32_0 : i32, i32
  }
  func.func @transform_6(%arg0: i32) -> (i32, i32, i32) {
    %c0_i32 = arith.constant 0 : i32
    %c0_i32_0 = arith.constant 0 : i32
    %c0_i32_1 = arith.constant 0 : i32
    return %arg0, %c0_i32, %c0_i32_0 : i32, i32, i32
  }
  func.func @transform_7(%arg0: i32) -> (i32, i32, i32) {
    %c0_i32 = arith.constant 0 : i32
    %c0_i32_0 = arith.constant 0 : i32
    %c0_i32_1 = arith.constant 0 : i32
    return %arg0, %c0_i32, %c0_i32_0 : i32, i32, i32
  }
  func.func @transform_8(%arg0: i32) -> (i32, i32, i32) {
    %c0_i32 = arith.constant 0 : i32
    %c0_i32_0 = arith.constant 0 : i32
    %c0_i32_1 = arith.constant 0 : i32
    return %arg0, %c0_i32, %c0_i32_0 : i32, i32, i32
  }
  func.func @transform_9(%arg0: i32) -> (i32, i32, i32) {
    %c0_i32 = arith.constant 0 : i32
    %c0_i32_0 = arith.constant 0 : i32
    %c0_i32_1 = arith.constant 0 : i32
    return %arg0, %c0_i32, %c0_i32_0 : i32, i32, i32
  }
  func.func @transform_10(%arg0: i32) -> (i32, i32, i32) {
    %c0_i32 = arith.constant 0 : i32
    %c0_i32_0 = arith.constant 0 : i32
    %c0_i32_1 = arith.constant 0 : i32
    return %arg0, %c0_i32, %c0_i32_0 : i32, i32, i32
  }
  func.func @transform_11(%arg0: i32) -> (i32, i32, i32) {
    %c0_i32 = arith.constant 0 : i32
    %c0_i32_0 = arith.constant 0 : i32
    %c0_i32_1 = arith.constant 0 : i32
    return %arg0, %c0_i32, %c0_i32_0 : i32, i32, i32
  }
  func.func @transform_12(%arg0: i32) -> (i32, i32, i32) {
    %c0_i32 = arith.constant 0 : i32
    %c0_i32_0 = arith.constant 0 : i32
    %c0_i32_1 = arith.constant 0 : i32
    return %arg0, %c0_i32, %c0_i32_0 : i32, i32, i32
  }
  func.func @transform_13(%arg0: i32) -> (i32, i32, i32) {
    %c0_i32 = arith.constant 0 : i32
    %c0_i32_0 = arith.constant 0 : i32
    %c0_i32_1 = arith.constant 0 : i32
    return %arg0, %c0_i32, %c0_i32_0 : i32, i32, i32
  }
  func.func @transform_14(%arg0: i32) -> (i32, i32, i32) {
    %c0_i32 = arith.constant 0 : i32
    %c0_i32_0 = arith.constant 0 : i32
    %c0_i32_1 = arith.constant 0 : i32
    return %arg0, %c0_i32, %c0_i32_0 : i32, i32, i32
  }
  func.func @transform_15(%arg0: i32) -> (i32, i32, i32) {
    %c0_i32 = arith.constant 0 : i32
    %c0_i32_0 = arith.constant 0 : i32
    %c0_i32_1 = arith.constant 0 : i32
    return %arg0, %c0_i32, %c0_i32_0 : i32, i32, i32
  }
  func.func @transform_16(%arg0: i32) -> (i32, i32, i32) {
    %c0_i32 = arith.constant 0 : i32
    %c0_i32_0 = arith.constant 0 : i32
    %c0_i32_1 = arith.constant 0 : i32
    return %arg0, %c0_i32, %c0_i32_0 : i32, i32, i32
  }
  func.func @transform_17(%arg0: i32) -> (i32, i32, i32) {
    %c0_i32 = arith.constant 0 : i32
    %c0_i32_0 = arith.constant 0 : i32
    %c0_i32_1 = arith.constant 0 : i32
    return %arg0, %c0_i32, %c0_i32_0 : i32, i32, i32
  }
  func.func @transform_18(%arg0: i32) -> (i32, i32, i32) {
    %c0_i32 = arith.constant 0 : i32
    %c0_i32_0 = arith.constant 0 : i32
    %c0_i32_1 = arith.constant 0 : i32
    return %arg0, %c0_i32, %c0_i32_0 : i32, i32, i32
  }
  func.func @transform_19(%arg0: i32) -> (i32, i32, i32) {
    %c0_i32 = arith.constant 0 : i32
    %c0_i32_0 = arith.constant 0 : i32
    %c0_i32_1 = arith.constant 0 : i32
    return %arg0, %c0_i32, %c0_i32_0 : i32, i32, i32
  }
  func.func @transform_20(%arg0: i32) -> (i32, i32, i32) {
    %c0_i32 = arith.constant 0 : i32
    %c0_i32_0 = arith.constant 0 : i32
    %c0_i32_1 = arith.constant 0 : i32
    return %arg0, %c0_i32, %c0_i32_0 : i32, i32, i32
  }
  func.func @transform_21(%arg0: i32) -> (i32, i32, i32) {
    %c0_i32 = arith.constant 0 : i32
    %c0_i32_0 = arith.constant 0 : i32
    %c0_i32_1 = arith.constant 0 : i32
    return %arg0, %c0_i32, %c0_i32_0 : i32, i32, i32
  }
  func.func @transform_22(%arg0: i32) -> (i32, i32, i32) {
    %c0_i32 = arith.constant 0 : i32
    %c0_i32_0 = arith.constant 0 : i32
    %c0_i32_1 = arith.constant 0 : i32
    return %arg0, %c0_i32, %c0_i32_0 : i32, i32, i32
  }
  func.func @transform_23(%arg0: i32) -> (i32, i32, i32) {
    %c0_i32 = arith.constant 0 : i32
    %c0_i32_0 = arith.constant 0 : i32
    %c0_i32_1 = arith.constant 0 : i32
    return %arg0, %c0_i32, %c0_i32_0 : i32, i32, i32
  }
  func.func @transform_24(%arg0: i32) -> (i32, i32, i32) {
    %c0_i32 = arith.constant 0 : i32
    %c0_i32_0 = arith.constant 0 : i32
    %c0_i32_1 = arith.constant 0 : i32
    return %arg0, %c0_i32, %c0_i32_0 : i32, i32, i32
  }
  func.func @transform_25(%arg0: i32) -> (i32, i32, i32) {
    %c0_i32 = arith.constant 0 : i32
    %c0_i32_0 = arith.constant 0 : i32
    %c0_i32_1 = arith.constant 0 : i32
    return %arg0, %c0_i32, %c0_i32_0 : i32, i32, i32
  }
  func.func @transform_26(%arg0: i32) -> (i32, i32, i32) {
    %c0_i32 = arith.constant 0 : i32
    %c0_i32_0 = arith.constant 0 : i32
    %c0_i32_1 = arith.constant 0 : i32
    return %arg0, %c0_i32, %c0_i32_0 : i32, i32, i32
  }
  func.func @transform_27(%arg0: i32) -> (i32, i32, i32) {
    %c0_i32 = arith.constant 0 : i32
    %c0_i32_0 = arith.constant 0 : i32
    %c0_i32_1 = arith.constant 0 : i32
    return %arg0, %c0_i32, %c0_i32_0 : i32, i32, i32
  }
  func.func @transform_28(%arg0: i32) -> (i32, i32, i32) {
    %c0_i32 = arith.constant 0 : i32
    %c0_i32_0 = arith.constant 0 : i32
    %c0_i32_1 = arith.constant 0 : i32
    return %arg0, %c0_i32, %c0_i32_0 : i32, i32, i32
  }
  func.func @transform_29(%arg0: i32) -> (i32, i32) {
    %c0_i32 = arith.constant 0 : i32
    %c0_i32_0 = arith.constant 0 : i32
    %c0_i32_1 = arith.constant 0 : i32
    return %c0_i32, %c0_i32_0 : i32, i32
  }
}

</mosaic_0001>

<bundles_post_ra>
// kernel: transformer_policy_forward.1
= control target key start
LH: loop header
LB: loop body
LE: loop exit
PB: predicated region body
PF: predicated region fallthrough
CT: control target
= control target key end

     0   :  { %s7191_s6 = smov 1   ;;  %s7192_s10 = smov 2   ;;  %s8589_s0 = inlined_call_operand.smem [shape: u32[30], index: -1, kind: input, shape index: {}] }
   0x1   :  { %s7264_s5 = sld [smem:[%s8589_s0]]   ;;  %s7193_s14 = smov 3  }
   0x2   :  { %s7269_s9 = sld [smem:[%s8589_s0 + %s7191_s6]]   ;;  %s7194_s18 = smov 4  }
   0x3   :  { %s7274_s13 = sld [smem:[%s8589_s0 + %s7192_s10]]   ;;  %s7195_s22 = smov 5  }
   0x4   :  { %s7279_s17 = sld [smem:[%s8589_s0 + %s7193_s14]]   ;;  %s7196_s26 = smov 6  }
   0x5   :  { %s7284_s21 = sld [smem:[%s8589_s0 + %s7194_s18]]   ;;  %s7197_s30 = smov 7  }
   0x6   :  { %s7289_s25 = sld [smem:[%s8589_s0 + %s7195_s22]]   ;;  %s7198_s4 = smov 8  }
   0x7   :  { %8618 = sst [smem:[#allocation39_spill]] %s7264_s5  ;;  %s7199_s10 = smov 9  }
   0x8   :  { %8619 = sst [smem:[#allocation40_spill]] %s7269_s9  ;;  %s7200_s15 = smov 10  }
   0x9   :  { %8620 = sst [smem:[#allocation41_spill]] %s7274_s13  ;;  %s7201_s20 = smov 11  }
   0xa   :  { %8621 = sst [smem:[#allocation42_spill]] %s7279_s17  ;;  %s7203_s1 = smov 13  }
   0xb   :  { %8622 = sst [smem:[#allocation43_spill]] %s7284_s21  ;;  %s7204_s7 = smov 14  }
   0xc   :  { %8623 = sst [smem:[#allocation44_spill]] %s7289_s25  ;;  %s7206_s22 = smov 16  }
   0xd   :  { %s7294_s29 = sld [smem:[%s8589_s0 + %s7196_s26]]   ;;  %s7202_s26 = smov 12  }
   0xe   :  { %s7299_s3 = sld [smem:[%s8589_s0 + %s7197_s30]]   ;;  %s7207_s28 = smov 17  }
   0xf   :  { %s7304_s8 = sld [smem:[%s8589_s0 + %s7198_s4]]  }
  0x10   :  { %s7309_s14 = sld [smem:[%s8589_s0 + %s7199_s10]]  }
  0x11   :  { %s7314_s19 = sld [smem:[%s8589_s0 + %s7200_s15]]   ;;  %s7205_s15 = smov 15  }
  0x12   :  { %s7319_s24 = sld [smem:[%s8589_s0 + %s7201_s20]]  }
  0x13   :  { %8624 = sst [smem:[#allocation45_spill]] %s7294_s29 }
  0x14   :  { %8625 = sst [smem:[#allocation46_spill]] %s7299_s3 }
  0x15   :  { %8626 = sst [smem:[#allocation47_spill]] %s7304_s8 }
  0x16   :  { %8627 = sst [smem:[#allocation48_spill]] %s7309_s14 }
  0x17   :  { %8628 = sst [smem:[#allocation49_spill]] %s7314_s19 }
  0x18   :  { %8629 = sst [smem:[#allocation50_spill]] %s7319_s24 }
  0x19   :  { %s7324_s30 = sld [smem:[%s8589_s0 + %s7202_s26]]  }
  0x1a   :  { %s7329_s6 = sld [smem:[%s8589_s0 + %s7203_s1]]  }
  0x1b   :  { %s7334_s12 = sld [smem:[%s8589_s0 + %s7204_s7]]   ;;  %s7208_s7 = smov 18  }
  0x1c   :  { %s7339_s20 = sld [smem:[%s8589_s0 + %s7205_s15]]   ;;  %s7209_s15 = smov 19  }
  0x1d   :  { %s7344_s27 = sld [smem:[%s8589_s0 + %s7206_s22]]   ;;  %s7210_s22 = smov 20  }
  0x1e   :  { %s7349_s4 = sld [smem:[%s8589_s0 + %s7207_s28]]   ;;  %s7211_s28 = smov 21  }
  0x1f   :  { %s7354_s21 = sld [smem:[%s8589_s0 + %s7208_s7]]   ;;  %s7212_s7 = smov 22  }
  0x20   :  { %8630 = sst [smem:[#allocation51_spill]] %s7329_s6 }
  0x21   :  { %8631 = sst [smem:[#allocation52_spill]] %s7334_s12 }
  0x22   :  { %8632 = sst [smem:[#allocation53_spill]] %s7339_s20 }
  0x23   :  { %8633 = sst [smem:[#allocation54_spill]] %s7344_s27 }
  0x24   :  { %8634 = sst [smem:[#allocation55_spill]] %s7349_s4 }
  0x25   :  { %8635 = sst [smem:[#allocation56_spill]] %s7354_s21 }
  0x26   :  { %s7359_s13 = sld [smem:[%s8589_s0 + %s7209_s15]]   ;;  %s7213_s15 = smov 23  }
  0x27   :  { %s7364_s17 = sld [smem:[%s8589_s0 + %s7210_s22]]   ;;  %s7214_s22 = smov 24  }
  0x28   :  { %s7369_s9 = sld [smem:[%s8589_s0 + %s7211_s28]]   ;;  %s7215_s28 = smov 25  }
  0x29   :  { %s7374_s5 = sld [smem:[%s8589_s0 + %s7212_s7]]   ;;  %s7216_s7 = smov 26  }
  0x2a   :  { %s7379_s20 = sld [smem:[%s8589_s0 + %s7213_s15]]   ;;  %s7217_s15 = smov 27  }
  0x2b   :  { %s7384_s6 = sld [smem:[%s8589_s0 + %s7214_s22]]   ;;  %s7218_s22 = smov 28  }
  0x2c   :  { %s7394_s24 = sld [smem:[%s8589_s0 + %s7216_s7]]  }
  0x2d   :  { %8636 = sst [smem:[#allocation57_spill]] %s7364_s17 }
  0x2e   :  { %8637 = sst [smem:[#allocation58_spill]] %s7369_s9 }
  0x2f   :  { %8638 = sst [smem:[#allocation59_spill]] %s7374_s5 }
  0x30   :  { %s7389_s9 = sld [smem:[%s8589_s0 + %s7215_s28]]   ;;  %s7219_s28 = smov 29  }
  0x31   :  { %8639 = sst [smem:[#allocation60_spill]] %s7384_s6 }
  0x32   :  { %s7399_s19 = sld [smem:[%s8589_s0 + %s7217_s15]]  }
  0x33   :  { %s7404_s14 = sld [smem:[%s8589_s0 + %s7218_s22]]  }
  0x34   :  { %s7409_s8 = sld [smem:[%s8589_s0 + %s7219_s28]]  }
  0x36   :  { %8640 = sst [smem:[#allocation61_spill]] %s7389_s9 }
  0x3a   :  { %8641 = sst [smem:[#allocation62_spill]] %s7409_s8 }
  0x3b   :  { %64 = vsyncpa [#allocation5], 0 }
  0x3c   :  { %65 = vsyncpa [#allocation7], 0 }
  0x3d   :  { %67 = vsyncpa [#allocation7 + $0x1], 0 }
  0x3e   :  { %68 = vsyncpa [#allocation10], 0 }
  0x3f   :  { %70 = vsyncpa [#allocation10 + $0x1], 0 }
  0x40   :  { %71 = vsyncpa [#allocation13], 0 }
  0x41   :  { %73 = vsyncpa [#allocation13 + $0x1], 0 }
  0x42   :  { %74 = vsyncpa [#allocation16], 0 }
  0x43   :  { %76 = vsyncpa [#allocation16 + $0x1], 0 }
  0x44   :  { %77 = vsyncpa [#allocation19], 0 }
  0x45   :  { %79 = vsyncpa [#allocation19 + $0x1], 0 }
  0x46   :  { %80 = vsyncpa [#allocation22], 0 }
  0x47   :  { %82 = vsyncpa [#allocation22 + $0x1], 0 }
  0x48   :  { %83 = vsyncpa [#allocation25], 0 }
  0x49   :  { %85 = vsyncpa [#allocation25 + $0x1], 0 }
  0x4a   :  { %86 = vsyncpa [#allocation28], 0 }
  0x4b   :  { %88 = vsyncpa [#allocation28 + $0x1], 0  ;;  %s7411_s7 = smov 0   ;;  %s7413_s0 = smov 0  }
  0x4c   :  { %s7415_s10 = smov 0   ;;  %s7417_s11 = smov 0  }
  0x4d LB: > { %s8642_s12 = sld [smem:[#allocation52_spill]]  ;;  %s7430_s15 = sadd.s32 4294967295, %s7189_s11   ;;  %s7181_s0 = sphi %s7413_s0, %s8704_s0   ;;  %s7177_s7 = sphi %s7411_s7, %s8703_s7   ;;  %s7189_s11 = sphi %s7417_s11, %s8702_s11   ;;  %s7185_s10 = sphi %s7415_s10, %s8705_s10  }
  0x4e   : > { %s8643_s9 = sld [smem:[#allocation61_spill]]  ;;  %s7433_s16 = sadd.s32 1, %s7189_s11  }
  0x4f   : > { %s8644_s6 = sld [smem:[#allocation60_spill]]  ;;  %s224_s18 = ssub.s32 %s7189_s11, %s7433_s16 }
  0x50   : > { %s8645_s5 = sld [smem:[#allocation59_spill]]  ;;  %s227_s22 = sadd.s32 1, %s7185_s10 }
  0x51   : > { %s8646_s4 = sld [smem:[#allocation55_spill]]  ;;  %p225_p0 = scmp.eq.s32.totalorder %s224_s18, 0 }
  0x52   : > { %s8647_s3 = sld [smem:[#allocation46_spill]]  ;;  %p234_p1 = scmp.ne.s32.totalorder %s7185_s10, %s7181_s0 }
  0x53   : > { %s8648_s17 = sld [smem:[#allocation57_spill]]  ;;  %p235_p2 = scmp.eq.s32.totalorder %s7189_s11, 0 }
  0x54   : > { %s8649_s27 = sld [smem:[#allocation54_spill]]  ;;  %p240_p3 = scmp.ne.s32.totalorder %s7181_s0, %s7177_s7 }
  0x55   : > { %s8650_s21 = sld [smem:[#allocation56_spill]]  ;;  %p7445_p4 = por %p235_p2, %p234_p1 }
  0x56   : > { %s8651_s29 = sld [smem:[#allocation45_spill]]  ;;  %p8600_p5 = scmp.eq.s32.totalorder %s7430_s15, 0 }
  0x57   : > { %8652 = sst [smem:[#allocation63_spill]] %s7181_s0  ;;  %p5875_p6 = scmp.ge.s32.totalorder %s7189_s11, 1 }
  0x58   : > { %8653 = sst [smem:[#allocation64_spill]] %s7185_s10  ;;  %p844_p7 = scmp.lt.s32.totalorder %s7189_s11, 3 }
  0x59   : > { %8654 = sst [smem:[#allocation65_spill]] %s7433_s16  ;;  %p7454_p8 = por %p8600_p5, %p240_p3 }
  0x5a   : > { %s7443_s23 = scalar_select %p225_p0, %s7185_s10, %s227_s22  }
  0x5b   : > { %s8657_s28 = scalar_select %p7454_p8, 1, 0 }
  0x5c   : > { %8655 = sst [smem:[#allocation66_spill]] %s7443_s23  ;;  %p7459_p10 = pnand %p5875_p6, %p844_p7 }
  0x5d   : > { %8658 = sst [smem:[#allocation67_spill]] %s8657_s28  ;;  %s7220_s2 = smov [#allocation4]  }
  0x5e   : > { %s872_s7 = sshll.u32 %s7220_s2, 4  ;;  %p6439_p11 = pneg %p7459_p10  ;;  %s873_s7 = int_to_ptr.vmem [resolvable:$true] %s872_s7 }
  0x5f   : > { %s6692_s18 = scalar_lea.vmem %s873_s7, 16  ;;  %s6699_s22 = scalar_lea.vmem %s873_s7, 32 }
  0x60   : > { %p6440_p12 = pnand %p6439_p11, %p8600_p5  ;;  %p6693_p0 = scmp.ne.s32.totalorder %s873_s7, %s6692_s18 }
  0x61   : > { %p6700_p3 = scmp.lt.s32.totalorder %s873_s7, %s873_s7  ;;  %p6701_p9 = scmp.lt.s32.totalorder %s6699_s22, %s6692_s18 }
  0x62   : > { %p6683_p13 = pneg %p6440_p12 }
  0x63   : > { %p6702_p6 = por %p6701_p9, %p6700_p3 }
  0x64   : > { %p6695_p1 = pnand %p6693_p0, %p6683_p13 }
  0x66   : > { %p6696_p2 = pneg %p6695_p1 }
  0x68   : > { %p6703_p7 = pnand %p6702_p6, %p6696_p2 }
  0x6a   : > { %6706 = shalt.err (!%p6703_p7)
}
  0x6b   : > { %s8660_s25 = sld [smem:[#allocation44_spill]]  ;;  %p5877_p8 = scmp.ge.s32.totalorder %s7189_s11, 2 }
  0x6c   : > { %s7470_s2 = sand.u32 (!%p5877_p8), 1, %s7189_s11   ;;  %s7473_s23 = sand.u32 (!%p5877_p8), 1, %s7185_s10  }
  0x6d   : > { %879 = sbr.rel (%p5877_p8) target bundleno = 476 (0x1dc), region = 40  ;;  %s7476_s18 = sshll.u32 (!%p5877_p8), %s7189_s11, 4 }
  0x6e   : > { %s6711_s28 = scalar_lea.hbm (!%p5877_p8), %s8651_s29, 32 }
  0x71   : > { %6442 = dma.hbm_to_vmem [thread:$0]  (!%p6440_p12), %s8660_s25, 16, %s873_s7, [#allocation5]  }
  0x72   : > { %s886_s7 = scalar_lea.vmem [#allocation6], %s7473_s23  ;;  %s891_s25 = scalar_lea.hbm %s8651_s29, %s7476_s18 }
  0x73   : > { %s893_s22 = sshll.u32 %s886_s7, 4  ;;  %s6707_s8 = scalar_lea.hbm %s891_s25, 16  ;;  %s894_s22 = int_to_ptr.vmem [resolvable:$true] %s893_s22 }
  0x74   : > { %p6708_p8 = scmp.ne.s32.totalorder %s891_s25, %s6707_s8  ;;  %p6712_p12 = scmp.lt.s32.totalorder %s891_s25, %s8651_s29 }
  0x75   : > { %p6713_p13 = scmp.lt.s32.totalorder %s6711_s28, %s6707_s8 }
  0x76   : > { %p6709_p9 = pnand %p6708_p8, %p7445_p4 }
  0x77   : > { %p6714_p0 = por %p6713_p13, %p6712_p12 }
  0x78   : > { %p6710_p11 = pneg %p6709_p9 }
  0x7a   : > { %p6715_p1 = pnand %p6714_p0, %p6710_p11 }
  0x7c   : > { %6718 = shalt.err (!%p6715_p1)
}
  0x7d   : > { %s6719_s10 = scalar_lea.vmem %s894_s22, 16  ;;  %s7221_s7 = smov [#allocation6]  }
  0x7e   : > { %p6720_p2 = scmp.ne.s32.totalorder %s894_s22, %s6719_s10  ;;  %s6723_s0 = sshll.u32 %s7221_s7, 4  ;;  %s6724_s0 = int_to_ptr.vmem [resolvable:$false] %s6723_s0 }
  0x7f   : > { %s6725_s16 = scalar_lea.vmem %s6724_s0, 32  ;;  %p6726_p7 = scmp.lt.s32.totalorder %s894_s22, %s6724_s0 }
  0x80   : > { %p6721_p3 = pnand %p6720_p2, %p7445_p4  ;;  %p6727_p5 = scmp.lt.s32.totalorder %s6725_s16, %s6719_s10 }
  0x82   : > { %p6722_p6 = pneg %p6721_p3  ;;  %p6728_p8 = por %p6727_p5, %p6726_p7 }
  0x84   : > { %p6729_p9 = pnand %p6728_p8, %p6722_p6 }
  0x86   : > { %6732 = shalt.err (!%p6729_p9)
}
  0x87   : > { %s8661_s8 = scalar_lea.sflag [#allocation7], %s7470_s2  ;;  %s7494_s28 = scalar_lea.hbm %s7324_s30, %s7476_s18 }
  0x88   : > { %6405 = dma.hbm_to_vmem [thread:$0]  (%p7445_p4), %s891_s25, 16, %s894_s22, %s8661_s8  }
  0x89   : > { %s952_s0 = scalar_lea.vmem [#allocation9], %s7473_s23  ;;  %s8602_s16 = scalar_lea.sflag [#allocation10], %s7470_s2 }
  0x8a   : > { %s959_s10 = sshll.u32 %s952_s0, 4  ;;  %s6733_s7 = scalar_lea.hbm %s7494_s28, 16  ;;  %s960_s10 = int_to_ptr.vmem [resolvable:$true] %s959_s10 }
  0x8b   : > { %p6734_p5 = scmp.ne.s32.totalorder %s7494_s28, %s6733_s7  ;;  %s6737_s29 = scalar_lea.hbm %s7324_s30, 32 }
  0x8c   : > { %p6738_p13 = scmp.lt.s32.totalorder %s7494_s28, %s7324_s30  ;;  %p6739_p0 = scmp.lt.s32.totalorder %s6737_s29, %s6733_s7 }
  0x8d   : > { %p6735_p11 = pnand %p6734_p5, %p7445_p4 }
  0x8e   : > { %p6740_p1 = por %p6739_p0, %p6738_p13 }
  0x8f   : > { %p6736_p12 = pneg %p6735_p11 }
  0x91   : > { %p6741_p2 = pnand %p6740_p1, %p6736_p12 }
  0x93   : > { %6744 = shalt.err (!%p6741_p2)
}
  0x94   : > { %s6745_s25 = scalar_lea.vmem %s960_s10, 16  ;;  %s7222_s22 = smov [#allocation9]  }
  0x95   : > { %p6746_p3 = scmp.ne.s32.totalorder %s960_s10, %s6745_s25  ;;  %s6749_s8 = sshll.u32 %s7222_s22, 4  ;;  %s6750_s8 = int_to_ptr.vmem [resolvable:$false] %s6749_s8 }
  0x96   : > { %s6751_s0 = scalar_lea.vmem %s6750_s8, 32  ;;  %p6752_p8 = scmp.lt.s32.totalorder %s960_s10, %s6750_s8 }
  0x97   : > { %p6747_p6 = pnand %p6746_p3, %p7445_p4  ;;  %p6753_p9 = scmp.lt.s32.totalorder %s6751_s0, %s6745_s25 }
  0x99   : > { %p6748_p7 = pneg %p6747_p6  ;;  %p6754_p5 = por %p6753_p9, %p6752_p8 }
  0x9b   : > { %p6755_p11 = pnand %p6754_p5, %p6748_p7 }
  0x9d   : > { %6758 = shalt.err (!%p6755_p11)
}
  0x9e   : > { %6407 = dma.hbm_to_vmem [thread:$0]  (%p7445_p4), %s7494_s28, 16, %s960_s10, %s8602_s16  }
  0x9f   : > { %s7514_s29 = scalar_lea.hbm %s8649_s27, %s7476_s18  ;;  %s1002_s7 = scalar_lea.vmem [#allocation12], %s7473_s23 }
  0xa0   : > { %s1009_s25 = sshll.u32 %s1002_s7, 4  ;;  %s8603_s22 = scalar_lea.sflag [#allocation13], %s7470_s2  ;;  %s1010_s25 = int_to_ptr.vmem [resolvable:$true] %s1009_s25 }
  0xa1   : > { %s6759_s8 = scalar_lea.hbm %s7514_s29, 16  ;;  %s6763_s0 = scalar_lea.hbm %s8649_s27, 32 }
  0xa2   : > { %p6760_p12 = scmp.ne.s32.totalorder %s7514_s29, %s6759_s8  ;;  %p6764_p1 = scmp.lt.s32.totalorder %s7514_s29, %s8649_s27 }
  0xa3   : > { %p6765_p2 = scmp.lt.s32.totalorder %s6763_s0, %s6759_s8 }
  0xa4   : > { %p6761_p13 = pnand %p6760_p12, %p7445_p4 }
  0xa5   : > { %p6766_p3 = por %p6765_p2, %p6764_p1 }
  0xa6   : > { %p6762_p0 = pneg %p6761_p13 }
  0xa8   : > { %p6767_p6 = pnand %p6766_p3, %p6762_p0 }
  0xaa   : > { %6770 = shalt.err (!%p6767_p6)
}
  0xab   : > { %s6771_s28 = scalar_lea.vmem %s1010_s25, 16  ;;  %s7223_s10 = smov [#allocation12]  }
  0xac   : > { %p6772_p7 = scmp.ne.s32.totalorder %s1010_s25, %s6771_s28  ;;  %s6775_s7 = sshll.u32 %s7223_s10, 4  ;;  %s6776_s7 = int_to_ptr.vmem [resolvable:$false] %s6775_s7 }
  0xad   : > { %s6777_s16 = scalar_lea.vmem %s6776_s7, 32  ;;  %p6778_p5 = scmp.lt.s32.totalorder %s1010_s25, %s6776_s7 }
  0xae   : > { %p6773_p8 = pnand %p6772_p7, %p7445_p4  ;;  %p6779_p11 = scmp.lt.s32.totalorder %s6777_s16, %s6771_s28 }
  0xb0   : > { %p6774_p9 = pneg %p6773_p8  ;;  %p6780_p12 = por %p6779_p11, %p6778_p5 }
  0xb2   : > { %p6781_p13 = pnand %p6780_p12, %p6774_p9 }
  0xb4   : > { %6784 = shalt.err (!%p6781_p13)
}
  0xb5   : > { %6409 = dma.hbm_to_vmem [thread:$0]  (%p7445_p4), %s7514_s29, 16, %s1010_s25, %s8603_s22  }
  0xb6   : > { %s7534_s8 = scalar_lea.hbm %s8650_s21, %s7476_s18  ;;  %s1036_s16 = scalar_lea.vmem [#allocation15], %s7473_s23 }
  0xb7   : > { %s1043_s0 = sshll.u32 %s1036_s16, 4  ;;  %s8607_s28 = scalar_lea.sflag [#allocation16], %s7470_s2  ;;  %s1044_s0 = int_to_ptr.vmem [resolvable:$true] %s1043_s0 }
  0xb8   : > { %s6785_s10 = scalar_lea.hbm %s7534_s8, 16  ;;  %s6789_s7 = scalar_lea.hbm %s8650_s21, 32 }
  0xb9   : > { %p6786_p0 = scmp.ne.s32.totalorder %s7534_s8, %s6785_s10  ;;  %p6790_p3 = scmp.lt.s32.totalorder %s7534_s8, %s8650_s21 }
  0xba   : > { %p6791_p6 = scmp.lt.s32.totalorder %s6789_s7, %s6785_s10 }
  0xbb   : > { %p6787_p1 = pnand %p6786_p0, %p7445_p4 }
  0xbc   : > { %p6792_p7 = por %p6791_p6, %p6790_p3 }
  0xbd   : > { %p6788_p2 = pneg %p6787_p1 }
  0xbf   : > { %p6793_p8 = pnand %p6792_p7, %p6788_p2 }
  0xc1   : > { %6796 = shalt.err (!%p6793_p8)
}
  0xc2   : > { %s6797_s29 = scalar_lea.vmem %s1044_s0, 16  ;;  %s7224_s25 = smov [#allocation15]  }
  0xc3   : > { %p6798_p9 = scmp.ne.s32.totalorder %s1044_s0, %s6797_s29  ;;  %s6801_s16 = sshll.u32 %s7224_s25, 4  ;;  %s6802_s16 = int_to_ptr.vmem [resolvable:$false] %s6801_s16 }
  0xc4   : > { %s6803_s22 = scalar_lea.vmem %s6802_s16, 32  ;;  %p6804_p12 = scmp.lt.s32.totalorder %s1044_s0, %s6802_s16 }
  0xc5   : > { %p6799_p5 = pnand %p6798_p9, %p7445_p4  ;;  %p6805_p13 = scmp.lt.s32.totalorder %s6803_s22, %s6797_s29 }
  0xc7   : > { %p6800_p11 = pneg %p6799_p5  ;;  %p6806_p0 = por %p6805_p13, %p6804_p12 }
  0xc9   : > { %p6807_p1 = pnand %p6806_p0, %p6800_p11 }
  0xcb   : > { %6810 = shalt.err (!%p6807_p1)
}
  0xcc   : > { %6411 = dma.hbm_to_vmem [thread:$0]  (%p7445_p4), %s7534_s8, 16, %s1044_s0, %s8607_s28  }
  0xcd   : > { %s7554_s10 = scalar_lea.hbm %s8648_s17, %s7476_s18  ;;  %s1074_s22 = scalar_lea.vmem [#allocation18], %s7473_s23 }
  0xce   : > { %s1081_s7 = sshll.u32 %s1074_s22, 4  ;;  %s7558_s29 = sshll.u32 %s7473_s23, 5  ;;  %s1082_s7 = int_to_ptr.vmem [resolvable:$true] %s1081_s7 }
  0xcf   : > { %s7561_s25 = sshll.u32 %s7189_s11, 9  ;;  %s8606_s16 = scalar_lea.sflag [#allocation19], %s7470_s2 }
  0xd0   : > { %s6811_s21 = scalar_lea.hbm %s7554_s10, 16  ;;  %s6815_s27 = scalar_lea.hbm %s8648_s17, 32 }
  0xd1   : > { %p6812_p2 = scmp.ne.s32.totalorder %s7554_s10, %s6811_s21  ;;  %p6816_p7 = scmp.lt.s32.totalorder %s7554_s10, %s8648_s17 }
  0xd2   : > { %p6817_p8 = scmp.lt.s32.totalorder %s6815_s27, %s6811_s21 }
  0xd3   : > { %p6813_p3 = pnand %p6812_p2, %p7445_p4 }
  0xd4   : > { %p6818_p9 = por %p6817_p8, %p6816_p7 }
  0xd5   : > { %p6814_p6 = pneg %p6813_p3 }
  0xd7   : > { %p6819_p5 = pnand %p6818_p9, %p6814_p6 }
  0xd9   : > { %6822 = shalt.err (!%p6819_p5)
}
  0xda   : > { %s6823_s8 = scalar_lea.vmem %s1082_s7, 16  ;;  %s7225_s11 = smov [#allocation18]  }
  0xdb   : > { %p6824_p11 = scmp.ne.s32.totalorder %s1082_s7, %s6823_s8  ;;  %s6827_s0 = sshll.u32 %s7225_s11, 4  ;;  %s6828_s0 = int_to_ptr.vmem [resolvable:$false] %s6827_s0 }
  0xdc   : > { %s6829_s22 = scalar_lea.vmem %s6828_s0, 32  ;;  %p6830_p0 = scmp.lt.s32.totalorder %s1082_s7, %s6828_s0 }
  0xdd   : > { %p6825_p12 = pnand %p6824_p11, %p7445_p4  ;;  %p6831_p1 = scmp.lt.s32.totalorder %s6829_s22, %s6823_s8 }
  0xdf   : > { %p6826_p13 = pneg %p6825_p12  ;;  %p6832_p2 = por %p6831_p1, %p6830_p0 }
  0xe1   : > { %p6833_p3 = pnand %p6832_p2, %p6826_p13 }
  0xe3   : > { %6836 = shalt.err (!%p6833_p3)
}
  0xe4   : > { %6413 = dma.hbm_to_vmem [thread:$0]  (%p7445_p4), %s7554_s10, 16, %s1082_s7, %s8606_s16  }
  0xe5   : > { %s7580_s21 = scalar_lea.hbm %s7379_s20, %s7561_s25  ;;  %s1117_s27 = scalar_lea.vmem [#allocation21], %s7558_s29 }
  0xe6   : > { %s1124_s8 = sshll.u32 %s1117_s27, 4  ;;  %s8609_s11 = scalar_lea.sflag [#allocation22], %s7470_s2  ;;  %s7583_s8 = int_to_ptr.vmem [resolvable:$true] %s1124_s8 }
  0xe7   : > { %s6837_s0 = scalar_lea.hbm %s7580_s21, 512  ;;  %s6841_s22 = scalar_lea.hbm %s7379_s20, 1024 }
  0xe8   : > { %p6838_p6 = scmp.ne.s32.totalorder %s7580_s21, %s6837_s0  ;;  %p6842_p9 = scmp.lt.s32.totalorder %s7580_s21, %s7379_s20 }
  0xe9   : > { %p6843_p5 = scmp.lt.s32.totalorder %s6841_s22, %s6837_s0 }
  0xea   : > { %p6839_p7 = pnand %p6838_p6, %p7445_p4 }
  0xeb   : > { %p6844_p11 = por %p6843_p5, %p6842_p9 }
  0xec   : > { %p6840_p8 = pneg %p6839_p7 }
  0xee   : > { %p6845_p12 = pnand %p6844_p11, %p6840_p8 }
  0xf0   : > { %6848 = shalt.err (!%p6845_p12)
}
  0xf1   : > { %s6849_s10 = scalar_lea.vmem %s7583_s8, 512  ;;  %s7226_s7 = smov [#allocation21]  }
  0xf2   : > { %p6850_p13 = scmp.ne.s32.totalorder %s7583_s8, %s6849_s10  ;;  %s6853_s27 = sshll.u32 %s7226_s7, 4  ;;  %s6854_s27 = int_to_ptr.vmem [resolvable:$false] %s6853_s27 }
  0xf3   : > { %s6855_s16 = scalar_lea.vmem %s6854_s27, 1024  ;;  %p6856_p2 = scmp.lt.s32.totalorder %s7583_s8, %s6854_s27 }
  0xf4   : > { %p6851_p0 = pnand %p6850_p13, %p7445_p4  ;;  %p6857_p3 = scmp.lt.s32.totalorder %s6855_s16, %s6849_s10 }
  0xf6   : > { %p6852_p1 = pneg %p6851_p0  ;;  %p6858_p6 = por %p6857_p3, %p6856_p2 }
  0xf8   : > { %p6859_p7 = pnand %p6858_p6, %p6852_p1 }
  0xfa   : > { %6862 = shalt.err (!%p6859_p7)
}
  0xfb   : > { %s7227_s0 = smov 128   ;;  %s7228_s22 = smov 8  }
  0xfc   : > { %6415 = dma.hbm_to_vmem [thread:$0]  (%p7445_p4), %s7580_s21, 512, %s7583_s8, %s8609_s11, %s7227_s0, %s7227_s0, %s7228_s22  }
  0xfd   : > { %s7609_s16 = scalar_lea.hbm %s8643_s9, %s7561_s25  ;;  %s1155_s10 = scalar_lea.vmem [#allocation24], %s7558_s29 }
  0xfe   : > { %s1162_s7 = sshll.u32 %s1155_s10, 4  ;;  %s8610_s27 = scalar_lea.sflag [#allocation25], %s7470_s2  ;;  %s7612_s7 = int_to_ptr.vmem [resolvable:$true] %s1162_s7 }
  0xff   : > { %s6863_s28 = scalar_lea.hbm %s7609_s16, 512  ;;  %s6867_s17 = scalar_lea.hbm %s8643_s9, 1024 }
 0x100   : > { %p6864_p8 = scmp.ne.s32.totalorder %s7609_s16, %s6863_s28  ;;  %p6868_p11 = scmp.lt.s32.totalorder %s7609_s16, %s8643_s9 }
 0x101   : > { %p6869_p12 = scmp.lt.s32.totalorder %s6867_s17, %s6863_s28 }
 0x102   : > { %p6865_p9 = pnand %p6864_p8, %p7445_p4 }
 0x103   : > { %p6870_p13 = por %p6869_p12, %p6868_p11 }
 0x104   : > { %p6866_p5 = pneg %p6865_p9 }
 0x106   : > { %p6871_p0 = pnand %p6870_p13, %p6866_p5 }
 0x108   : > { %6874 = shalt.err (!%p6871_p0)
}
 0x109   : > { %s6875_s21 = scalar_lea.vmem %s7612_s7, 512  ;;  %s7229_s8 = smov [#allocation24]  }
 0x10a   : > { %p6876_p1 = scmp.ne.s32.totalorder %s7612_s7, %s6875_s21  ;;  %s6879_s10 = sshll.u32 %s7229_s8, 4  ;;  %s6880_s10 = int_to_ptr.vmem [resolvable:$false] %s6879_s10 }
 0x10b   : > { %s6881_s11 = scalar_lea.vmem %s6880_s10, 1024  ;;  %p6882_p6 = scmp.lt.s32.totalorder %s7612_s7, %s6880_s10 }
 0x10c   : > { %p6877_p2 = pnand %p6876_p1, %p7445_p4  ;;  %p6883_p7 = scmp.lt.s32.totalorder %s6881_s11, %s6875_s21 }
 0x10e   : > { %p6878_p3 = pneg %p6877_p2  ;;  %p6884_p8 = por %p6883_p7, %p6882_p6 }
 0x110   : > { %p6885_p9 = pnand %p6884_p8, %p6878_p3 }
 0x112   : > { %6888 = shalt.err (!%p6885_p9)
}
 0x113   : > { %6417 = dma.hbm_to_vmem [thread:$0]  (%p7445_p4), %s7609_s16, 512, %s7612_s7, %s8610_s27, %s7227_s0, %s7227_s0, %s7228_s22  }
 0x114   : > { %s7638_s17 = scalar_lea.hbm %s7399_s19, %s7561_s25  ;;  %s1193_s28 = scalar_lea.vmem [#allocation27], %s7558_s29 }
 0x115   : > { %s1200_s11 = sshll.u32 %s1193_s28, 4  ;;  %s8611_s21 = scalar_lea.sflag [#allocation28], %s7470_s2  ;;  %s7641_s11 = int_to_ptr.vmem [resolvable:$true] %s1200_s11 }
 0x116   : > { %s6889_s8 = scalar_lea.hbm %s7638_s17, 512  ;;  %s6893_s10 = scalar_lea.hbm %s7399_s19, 1024 }
 0x117   : > { %p6890_p5 = scmp.ne.s32.totalorder %s7638_s17, %s6889_s8  ;;  %p6894_p13 = scmp.lt.s32.totalorder %s7638_s17, %s7399_s19 }
 0x118   : > { %p6895_p0 = scmp.lt.s32.totalorder %s6893_s10, %s6889_s8 }
 0x119   : > { %p6891_p11 = pnand %p6890_p5, %p7445_p4 }
 0x11a   : > { %p6896_p1 = por %p6895_p0, %p6894_p13 }
 0x11b   : > { %p6892_p12 = pneg %p6891_p11 }
 0x11d   : > { %p6897_p2 = pnand %p6896_p1, %p6892_p12 }
 0x11f   : > { %6900 = shalt.err (!%p6897_p2)
}
 0x120   : > { %s6901_s16 = scalar_lea.vmem %s7641_s11, 512  ;;  %s7230_s7 = smov [#allocation27]  }
 0x121   : > { %p6902_p3 = scmp.ne.s32.totalorder %s7641_s11, %s6901_s16  ;;  %s6905_s28 = sshll.u32 %s7230_s7, 4  ;;  %s6906_s28 = int_to_ptr.vmem [resolvable:$false] %s6905_s28 }
 0x122   : > { %s6907_s27 = scalar_lea.vmem %s6906_s28, 1024  ;;  %p6908_p8 = scmp.lt.s32.totalorder %s7641_s11, %s6906_s28 }
 0x123   : > { %p6903_p6 = pnand %p6902_p3, %p7445_p4  ;;  %p6909_p9 = scmp.lt.s32.totalorder %s6907_s27, %s6901_s16 }
 0x125   : > { %p6904_p7 = pneg %p6903_p6  ;;  %p6910_p5 = por %p6909_p9, %p6908_p8 }
 0x127   : > { %p6911_p11 = pnand %p6910_p5, %p6904_p7 }
 0x129   : > { %6914 = shalt.err (!%p6911_p11)
}
 0x12a   : > { %6419 = dma.hbm_to_vmem [thread:$0]  (%p7445_p4), %s7638_s17, 512, %s7641_s11, %s8611_s21, %s7227_s0, %s7227_s0, %s7228_s22  }
 0x12b   : > { %s908_s27 = scalar_lea.hbm %s8647_s3, %s7476_s18  ;;  %s903_s8 = scalar_lea.vmem [#allocation8], %s7473_s23 }
 0x12c   : > { %s910_s10 = sshll.u32 %s903_s8, 4  ;;  %s6915_s16 = scalar_lea.hbm %s908_s27, 16  ;;  %s911_s10 = int_to_ptr.vmem [resolvable:$true] %s910_s10 }
 0x12d   : > { %p6916_p12 = scmp.ne.s32.totalorder %s908_s27, %s6915_s16  ;;  %s6919_s7 = scalar_lea.hbm %s8647_s3, 32 }
 0x12e   : > { %p6920_p1 = scmp.lt.s32.totalorder %s908_s27, %s8647_s3  ;;  %p6921_p2 = scmp.lt.s32.totalorder %s6919_s7, %s6915_s16 }
 0x12f   : > { %p6917_p13 = pnand %p6916_p12, %p7445_p4 }
 0x130   : > { %p6922_p3 = por %p6921_p2, %p6920_p1 }
 0x131   : > { %p6918_p0 = pneg %p6917_p13 }
 0x133   : > { %p6923_p6 = pnand %p6922_p3, %p6918_p0 }
 0x135   : > { %6926 = shalt.err (!%p6923_p6)
}
 0x136   : > { %s6927_s28 = scalar_lea.vmem %s911_s10, 16  ;;  %s7231_s17 = smov [#allocation8]  }
 0x137   : > { %p6928_p7 = scmp.ne.s32.totalorder %s911_s10, %s6927_s28  ;;  %s6931_s11 = sshll.u32 %s7231_s17, 4  ;;  %s6932_s11 = int_to_ptr.vmem [resolvable:$false] %s6931_s11 }
 0x138   : > { %s6933_s8 = scalar_lea.vmem %s6932_s11, 32  ;;  %p6934_p5 = scmp.lt.s32.totalorder %s911_s10, %s6932_s11 }
 0x139   : > { %p6929_p8 = pnand %p6928_p7, %p7445_p4  ;;  %p6935_p11 = scmp.lt.s32.totalorder %s6933_s8, %s6927_s28 }
 0x13b   : > { %p6930_p9 = pneg %p6929_p8  ;;  %p6936_p12 = por %p6935_p11, %p6934_p5 }
 0x13d   : > { %p6937_p13 = pnand %p6936_p12, %p6930_p9 }
 0x13f   : > { %6940 = shalt.err (!%p6937_p13)
}
 0x140   : > { %s8662_s16 = scalar_lea.sflag [#allocation7], %s7470_s2  ;;  %s982_s7 = scalar_lea.hbm %s8642_s12, %s7476_s18 }
 0x141   : > { %6406 = dma.hbm_to_vmem [thread:$0]  (%p7445_p4), %s908_s27, 16, %s911_s10, %s8662_s16  }
 0x142   : > { %s977_s17 = scalar_lea.vmem [#allocation11], %s7473_s23  ;;  %s6941_s11 = scalar_lea.hbm %s982_s7, 16 }
 0x143   : > { %s984_s21 = sshll.u32 %s977_s17, 4  ;;  %p6942_p0 = scmp.ne.s32.totalorder %s982_s7, %s6941_s11  ;;  %s985_s21 = int_to_ptr.vmem [resolvable:$true] %s984_s21 }
 0x144   : > { %s6945_s28 = scalar_lea.hbm %s8642_s12, 32  ;;  %p6946_p3 = scmp.lt.s32.totalorder %s982_s7, %s8642_s12 }
 0x145   : > { %p6943_p1 = pnand %p6942_p0, %p7445_p4  ;;  %p6947_p6 = scmp.lt.s32.totalorder %s6945_s28, %s6941_s11 }
 0x147   : > { %p6944_p2 = pneg %p6943_p1  ;;  %p6948_p7 = por %p6947_p6, %p6946_p3 }
 0x149   : > { %p6949_p8 = pnand %p6948_p7, %p6944_p2 }
 0x14b   : > { %6952 = shalt.err (!%p6949_p8)
}
 0x14c   : > { %s6953_s8 = scalar_lea.vmem %s985_s21, 16  ;;  %s7232_s27 = smov [#allocation11]  }
 0x14d   : > { %p6954_p9 = scmp.ne.s32.totalorder %s985_s21, %s6953_s8  ;;  %s6957_s10 = sshll.u32 %s7232_s27, 4  ;;  %s6958_s10 = int_to_ptr.vmem [resolvable:$false] %s6957_s10 }
 0x14e   : > { %s6959_s16 = scalar_lea.vmem %s6958_s10, 32  ;;  %p6960_p12 = scmp.lt.s32.totalorder %s985_s21, %s6958_s10 }
 0x14f   : > { %p6955_p5 = pnand %p6954_p9, %p7445_p4  ;;  %p6961_p13 = scmp.lt.s32.totalorder %s6959_s16, %s6953_s8 }
 0x151   : > { %p6956_p11 = pneg %p6955_p5  ;;  %p6962_p0 = por %p6961_p13, %p6960_p12 }
 0x153   : > { %p6963_p1 = pnand %p6962_p0, %p6956_p11 }
 0x155   : > { %6966 = shalt.err (!%p6963_p1)
}
 0x156   : > { %s8663_s17 = scalar_lea.sflag [#allocation10], %s7470_s2  ;;  %s1024_s11 = scalar_lea.hbm %s8646_s4, %s7476_s18 }
 0x157   : > { %6408 = dma.hbm_to_vmem [thread:$0]  (%p7445_p4), %s982_s7, 16, %s985_s21, %s8663_s17  }
 0x158   : > { %s1019_s28 = scalar_lea.vmem [#allocation14], %s7473_s23  ;;  %s6967_s10 = scalar_lea.hbm %s1024_s11, 16 }
 0x159   : > { %s1026_s27 = sshll.u32 %s1019_s28, 4  ;;  %p6968_p2 = scmp.ne.s32.totalorder %s1024_s11, %s6967_s10  ;;  %s1027_s27 = int_to_ptr.vmem [resolvable:$true] %s1026_s27 }
 0x15a   : > { %s6971_s8 = scalar_lea.hbm %s8646_s4, 32  ;;  %p6972_p7 = scmp.lt.s32.totalorder %s1024_s11, %s8646_s4 }
 0x15b   : > { %p6969_p3 = pnand %p6968_p2, %p7445_p4  ;;  %p6973_p8 = scmp.lt.s32.totalorder %s6971_s8, %s6967_s10 }
 0x15d   : > { %p6970_p6 = pneg %p6969_p3  ;;  %p6974_p9 = por %p6973_p8, %p6972_p7 }
 0x15f   : > { %p6975_p5 = pnand %p6974_p9, %p6970_p6 }
 0x161   : > { %6978 = shalt.err (!%p6975_p5)
}
 0x162   : > { %s6979_s16 = scalar_lea.vmem %s1027_s27, 16  ;;  %s7233_s21 = smov [#allocation14]  }
 0x163   : > { %p6980_p11 = scmp.ne.s32.totalorder %s1027_s27, %s6979_s16  ;;  %s6983_s7 = sshll.u32 %s7233_s21, 4  ;;  %s6984_s7 = int_to_ptr.vmem [resolvable:$false] %s6983_s7 }
 0x164   : > { %s6985_s17 = scalar_lea.vmem %s6984_s7, 32  ;;  %p6986_p0 = scmp.lt.s32.totalorder %s1027_s27, %s6984_s7 }
 0x165   : > { %p6981_p12 = pnand %p6980_p11, %p7445_p4  ;;  %p6987_p1 = scmp.lt.s32.totalorder %s6985_s17, %s6979_s16 }
 0x167   : > { %p6982_p13 = pneg %p6981_p12  ;;  %p6988_p2 = por %p6987_p1, %p6986_p0 }
 0x169   : > { %p6989_p3 = pnand %p6988_p2, %p6982_p13 }
 0x16b   : > { %6992 = shalt.err (!%p6989_p3)
}
 0x16c   : > { %s8664_s28 = scalar_lea.sflag [#allocation13], %s7470_s2  ;;  %s7706_s10 = scalar_lea.hbm %s7359_s13, %s7561_s25 }
 0x16d   : > { %6410 = dma.hbm_to_vmem [thread:$0]  (%p7445_p4), %s1024_s11, 16, %s1027_s27, %s8664_s28  }
 0x16e   : > { %s1054_s8 = scalar_lea.vmem [#allocation17], %s7558_s29  ;;  %s6993_s21 = scalar_lea.hbm %s7706_s10, 512 }
 0x16f   : > { %s1061_s16 = sshll.u32 %s1054_s8, 4  ;;  %p6994_p6 = scmp.ne.s32.totalorder %s7706_s10, %s6993_s21  ;;  %s1062_s16 = int_to_ptr.vmem [resolvable:$true] %s1061_s16 }
 0x170   : > { %s6997_s7 = scalar_lea.hbm %s7359_s13, 1024  ;;  %p6998_p9 = scmp.lt.s32.totalorder %s7706_s10, %s7359_s13 }
 0x171   : > { %p6995_p7 = pnand %p6994_p6, %p7445_p4  ;;  %p6999_p5 = scmp.lt.s32.totalorder %s6997_s7, %s6993_s21 }
 0x173   : > { %p6996_p8 = pneg %p6995_p7  ;;  %p7000_p11 = por %p6999_p5, %p6998_p9 }
 0x175   : > { %p7001_p12 = pnand %p7000_p11, %p6996_p8 }
 0x177   : > { %7004 = shalt.err (!%p7001_p12)
}
 0x178   : > { %s7005_s11 = scalar_lea.vmem %s1062_s16, 512  ;;  %s7234_s29 = smov [#allocation17]  }
 0x179   : > { %p7006_p13 = scmp.ne.s32.totalorder %s1062_s16, %s7005_s11  ;;  %s7009_s25 = sshll.u32 %s7234_s29, 4  ;;  %s7010_s25 = int_to_ptr.vmem [resolvable:$false] %s7009_s25 }
 0x17a   : > { %s7011_s27 = scalar_lea.vmem %s7010_s25, 1024  ;;  %p7012_p2 = scmp.lt.s32.totalorder %s1062_s16, %s7010_s25 }
 0x17b   : > { %p7007_p0 = pnand %p7006_p13, %p7445_p4  ;;  %p7013_p3 = scmp.lt.s32.totalorder %s7011_s27, %s7005_s11 }
 0x17d   : > { %p7008_p1 = pneg %p7007_p0  ;;  %p7014_p6 = por %p7013_p3, %p7012_p2 }
 0x17f   : > { %p7015_p7 = pnand %p7014_p6, %p7008_p1 }
 0x181   : > { %7018 = shalt.err (!%p7015_p7)
}
 0x182   : > { %s8665_s17 = scalar_lea.sflag [#allocation16], %s7470_s2  ;;  %s1104_s28 = scalar_lea.hbm %s8645_s5, %s7476_s18 }
 0x183   : > { %6412 = dma.hbm_to_vmem [thread:$0]  (%p7445_p4), %s7706_s10, 512, %s1062_s16, %s8665_s17, %s7227_s0, %s7227_s0, %s7228_s22  }
 0x184   : > { %s1099_s8 = scalar_lea.vmem [#allocation20], %s7473_s23  ;;  %s7019_s7 = scalar_lea.hbm %s1104_s28, 16 }
 0x185   : > { %s1106_s21 = sshll.u32 %s1099_s8, 4  ;;  %p7020_p8 = scmp.ne.s32.totalorder %s1104_s28, %s7019_s7  ;;  %s1107_s21 = int_to_ptr.vmem [resolvable:$true] %s1106_s21 }
 0x186   : > { %s7023_s11 = scalar_lea.hbm %s8645_s5, 32  ;;  %p7024_p11 = scmp.lt.s32.totalorder %s1104_s28, %s8645_s5 }
 0x187   : > { %p7021_p9 = pnand %p7020_p8, %p7445_p4  ;;  %p7025_p12 = scmp.lt.s32.totalorder %s7023_s11, %s7019_s7 }
 0x189   : > { %p7022_p5 = pneg %p7021_p9  ;;  %p7026_p13 = por %p7025_p12, %p7024_p11 }
 0x18b   : > { %p7027_p0 = pnand %p7026_p13, %p7022_p5 }
 0x18d   : > { %7030 = shalt.err (!%p7027_p0)
}
 0x18e   : > { %s7031_s29 = scalar_lea.vmem %s1107_s21, 16  ;;  %s7235_s0 = smov [#allocation20]  }
 0x18f   : > { %p7032_p1 = scmp.ne.s32.totalorder %s1107_s21, %s7031_s29  ;;  %s7035_s22 = sshll.u32 %s7235_s0, 4  ;;  %s7036_s22 = int_to_ptr.vmem [resolvable:$false] %s7035_s22 }
 0x190   : > { %s7037_s10 = scalar_lea.vmem %s7036_s22, 32  ;;  %p7038_p6 = scmp.lt.s32.totalorder %s1107_s21, %s7036_s22 }
 0x191   : > { %p7033_p2 = pnand %p7032_p1, %p7445_p4  ;;  %p7039_p7 = scmp.lt.s32.totalorder %s7037_s10, %s7031_s29 }
 0x193   : > { %p7034_p3 = pneg %p7033_p2  ;;  %p7040_p8 = por %p7039_p7, %p7038_p6 }
 0x195   : > { %p7041_p9 = pnand %p7040_p8, %p7034_p3 }
 0x197   : > { %7044 = shalt.err (!%p7041_p9)
}
 0x198   : > { %s8666_s16 = scalar_lea.sflag [#allocation19], %s7470_s2  ;;  %s1142_s25 = scalar_lea.hbm %s8644_s6, %s7476_s18 }
 0x199   : > { %6414 = dma.hbm_to_vmem [thread:$0]  (%p7445_p4), %s1104_s28, 16, %s1107_s21, %s8666_s16  }
 0x19a   : > { %s1137_s27 = scalar_lea.vmem [#allocation23], %s7473_s23  ;;  %s7045_s8 = scalar_lea.hbm %s1142_s25, 16 }
 0x19b   : > { %s1144_s17 = sshll.u32 %s1137_s27, 4  ;;  %p7046_p5 = scmp.ne.s32.totalorder %s1142_s25, %s7045_s8  ;;  %s1145_s17 = int_to_ptr.vmem [resolvable:$true] %s1144_s17 }
 0x19c   : > { %s7049_s7 = scalar_lea.hbm %s8644_s6, 32  ;;  %p7050_p13 = scmp.lt.s32.totalorder %s1142_s25, %s8644_s6 }
 0x19d   : > { %p7047_p11 = pnand %p7046_p5, %p7445_p4  ;;  %p7051_p0 = scmp.lt.s32.totalorder %s7049_s7, %s7045_s8 }
 0x19f   : > { %p7048_p12 = pneg %p7047_p11  ;;  %p7052_p1 = por %p7051_p0, %p7050_p13 }
 0x1a1   : > { %p7053_p2 = pnand %p7052_p1, %p7048_p12 }
 0x1a3   : > { %7056 = shalt.err (!%p7053_p2)
}
 0x1a4   : > { %s7057_s11 = scalar_lea.vmem %s1145_s17, 16  ;;  %s7236_s28 = smov [#allocation23]  }
 0x1a5   : > { %p7058_p3 = scmp.ne.s32.totalorder %s1145_s17, %s7057_s11  ;;  %s7061_s21 = sshll.u32 %s7236_s28, 4  ;;  %s7062_s21 = int_to_ptr.vmem [resolvable:$false] %s7061_s21 }
 0x1a6   : > { %s7063_s29 = scalar_lea.vmem %s7062_s21, 32  ;;  %p7064_p8 = scmp.lt.s32.totalorder %s1145_s17, %s7062_s21 }
 0x1a7   : > { %p7059_p6 = pnand %p7058_p3, %p7445_p4  ;;  %p7065_p9 = scmp.lt.s32.totalorder %s7063_s29, %s7057_s11 }
 0x1a9   : > { %p7060_p7 = pneg %p7059_p6  ;;  %p7066_p5 = por %p7065_p9, %p7064_p8 }
 0x1ab   : > { %p7067_p11 = pnand %p7066_p5, %p7060_p7 }
 0x1ad   : > { %7070 = shalt.err (!%p7067_p11)
}
 0x1ae   : > { %s8667_s0 = scalar_lea.sflag [#allocation22], %s7470_s2  ;;  %s1180_s22 = scalar_lea.hbm %s7394_s24, %s7476_s18 }
 0x1af   : > { %6416 = dma.hbm_to_vmem [thread:$0]  (%p7445_p4), %s1142_s25, 16, %s1145_s17, %s8667_s0  }
 0x1b0   : > { %s1175_s10 = scalar_lea.vmem [#allocation26], %s7473_s23  ;;  %s7071_s27 = scalar_lea.hbm %s1180_s22, 16 }
 0x1b1   : > { %s1182_s16 = sshll.u32 %s1175_s10, 4  ;;  %p7072_p12 = scmp.ne.s32.totalorder %s1180_s22, %s7071_s27  ;;  %s1183_s16 = int_to_ptr.vmem [resolvable:$true] %s1182_s16 }
 0x1b2   : > { %s7075_s8 = scalar_lea.hbm %s7394_s24, 32  ;;  %p7076_p1 = scmp.lt.s32.totalorder %s1180_s22, %s7394_s24 }
 0x1b3   : > { %p7073_p13 = pnand %p7072_p12, %p7445_p4  ;;  %p7077_p2 = scmp.lt.s32.totalorder %s7075_s8, %s7071_s27 }
 0x1b5   : > { %p7074_p0 = pneg %p7073_p13  ;;  %p7078_p3 = por %p7077_p2, %p7076_p1 }
 0x1b7   : > { %p7079_p6 = pnand %p7078_p3, %p7074_p0 }
 0x1b9   : > { %7082 = shalt.err (!%p7079_p6)
}
 0x1ba   : > { %s7083_s7 = scalar_lea.vmem %s1183_s16, 16  ;;  %s7237_s25 = smov [#allocation26]  }
 0x1bb   : > { %p7084_p7 = scmp.ne.s32.totalorder %s1183_s16, %s7083_s7  ;;  %s7087_s17 = sshll.u32 %s7237_s25, 4  ;;  %s7088_s17 = int_to_ptr.vmem [resolvable:$false] %s7087_s17 }
 0x1bc   : > { %s7089_s11 = scalar_lea.vmem %s7088_s17, 32  ;;  %p7090_p5 = scmp.lt.s32.totalorder %s1183_s16, %s7088_s17 }
 0x1bd   : > { %p7085_p8 = pnand %p7084_p7, %p7445_p4  ;;  %p7091_p11 = scmp.lt.s32.totalorder %s7089_s11, %s7083_s7 }
 0x1bf   : > { %p7086_p9 = pneg %p7085_p8  ;;  %p7092_p12 = por %p7091_p11, %p7090_p5 }
 0x1c1   : > { %p7093_p13 = pnand %p7092_p12, %p7086_p9 }
 0x1c3   : > { %7096 = shalt.err (!%p7093_p13)
}
 0x1c4   : > { %s8668_s28 = scalar_lea.sflag [#allocation25], %s7470_s2  ;;  %s1218_s21 = scalar_lea.hbm %s7404_s14, %s7476_s18 }
 0x1c5   : > { %6418 = dma.hbm_to_vmem [thread:$0]  (%p7445_p4), %s1180_s22, 16, %s1183_s16, %s8668_s28  }
 0x1c6   : > { %s1213_s29 = scalar_lea.vmem [#allocation29], %s7473_s23  ;;  %s7097_s10 = scalar_lea.hbm %s1218_s21, 16 }
 0x1c7   : > { %s1220_s0 = sshll.u32 %s1213_s29, 4  ;;  %p7098_p0 = scmp.ne.s32.totalorder %s1218_s21, %s7097_s10  ;;  %s1221_s0 = int_to_ptr.vmem [resolvable:$true] %s1220_s0 }
 0x1c8   : > { %s7101_s27 = scalar_lea.hbm %s7404_s14, 32  ;;  %p7102_p3 = scmp.lt.s32.totalorder %s1218_s21, %s7404_s14 }
 0x1c9   : > { %p7099_p1 = pnand %p7098_p0, %p7445_p4  ;;  %p7103_p6 = scmp.lt.s32.totalorder %s7101_s27, %s7097_s10 }
 0x1cb   : > { %p7100_p2 = pneg %p7099_p1  ;;  %p7104_p7 = por %p7103_p6, %p7102_p3 }
 0x1cd   : > { %p7105_p8 = pnand %p7104_p7, %p7100_p2 }
 0x1cf   : > { %7108 = shalt.err (!%p7105_p8)
}
 0x1d0   : > { %s7109_s8 = scalar_lea.vmem %s1221_s0, 16  ;;  %s7238_s23 = smov [#allocation29]  }
 0x1d1   : > { %p7110_p9 = scmp.ne.s32.totalorder %s1221_s0, %s7109_s8  ;;  %s7113_s18 = sshll.u32 %s7238_s23, 4  ;;  %s7114_s18 = int_to_ptr.vmem [resolvable:$false] %s7113_s18 }
 0x1d2   : > { %s7115_s22 = scalar_lea.vmem %s7114_s18, 32  ;;  %p7116_p12 = scmp.lt.s32.totalorder %s1221_s0, %s7114_s18 }
 0x1d3   : > { %p7111_p5 = pnand %p7110_p9, %p7445_p4  ;;  %p7117_p13 = scmp.lt.s32.totalorder %s7115_s22, %s7109_s8 }
 0x1d5   : > { %p7112_p11 = pneg %p7111_p5  ;;  %p7118_p0 = por %p7117_p13, %p7116_p12 }
 0x1d7   : > { %p7119_p1 = pnand %p7118_p0, %p7112_p11 }
 0x1d9   : > { %7122 = shalt.err (!%p7119_p1)
}
 0x1da   : > { %s8669_s16 = scalar_lea.sflag [#allocation28], %s7470_s2 }
 0x1db   : > { %6420 = dma.hbm_to_vmem [thread:$0]  (%p7445_p4), %s1218_s21, 16, %s1221_s0, %s8669_s16  }
 0x1dc PF: > { %1229 = sbr.rel (%p7459_p10) target bundleno = 8872 (0x22a8), region = 136  ;;  %p8670_p2 = scmp.eq.s32.totalorder (!%p7459_p10), %s7430_s15, 0 }
 0x1e1   : > { %7140 = dma.done.wait (%p8670_p2), [#allocation5], 16   ;;  %p8671_p3 = pmov %p8670_p2 }
 0x1e2   : > { %s8672_s7 = sld [smem:[#allocation63_spill]]  ;;  %s7785_s17 = sand.u32 1, %s7430_s15  }
 0x1e3   : > { %7142 = vsyncadd (%p8671_p3), [#allocation5], 4294967280  ;;  %s8673_s25 = sld [smem:[#allocation67_spill]]  ;;  %s1236_s2 = scalar_lea.sflag [#allocation7], %s7785_s17 }
 0x1e8   : > { %s7788_s26 = sand.u32 1, %s8672_s7  }
 0x1e9   : > { %p8674_p4 = scmp.ne.s32.totalorder %s8673_s25, 0 }
 0x1eb   : > { %7144 = dma.done.wait (%p8674_p4), %s1236_s2, 32  }
 0x1ec   : > { %7146 = vsyncadd (%p8674_p4), %s1236_s2, 4294967264  ;;  %s1252_s28 = scalar_lea.sflag [#allocation10], %s7785_s17 }
 0x1ed   : > { %7148 = dma.done.wait (%p8674_p4), %s1252_s28, 32  }
 0x1ee   : > { %7150 = vsyncadd (%p8674_p4), %s1252_s28, 4294967264  ;;  %s1268_s0 = scalar_lea.sflag [#allocation13], %s7785_s17 }
 0x1ef   : > { %7152 = dma.done.wait (%p8674_p4), %s1268_s0, 32  }
 0x1f0   : > { %7154 = vsyncadd (%p8674_p4), %s1268_s0, 4294967264  ;;  %s1284_s8 = scalar_lea.sflag [#allocation16], %s7785_s17 }
 0x1f1   : > { %7156 = dma.done.wait (%p8674_p4), %s1284_s8, 528  }
 0x1f2   : > { %7158 = vsyncadd (%p8674_p4), %s1284_s8, 4294966768  ;;  %s5904_s18 = sshll.u32 %s7788_s26, 5  ;;  %s1301_s16 = scalar_lea.sflag [#allocation19], %s7785_s17 }
 0x1f3   : > { %s7818_s22 = scalar_lea.vmem [#allocation17], %s5904_s18 }
 0x1f4   : > { %7160 = dma.done.wait (%p8674_p4), %s1301_s16, 32  }
 0x1f5   : > { %7162 = vsyncadd (%p8674_p4), %s1301_s16, 4294967264  ;;  %s1317_s28 = scalar_lea.sflag [#allocation22], %s7785_s17  ;;  %s7828_s0 = scalar_lea.vmem [#allocation21], %s5904_s18 }
 0x1f6   : > { %7164 = dma.done.wait (%p8674_p4), %s1317_s28, 528  }
 0x1f7   : > { %7166 = vsyncadd (%p8674_p4), %s1317_s28, 4294966768  ;;  %s1334_s7 = scalar_lea.sflag [#allocation25], %s7785_s17  ;;  %s7836_s27 = scalar_lea.vmem [#allocation24], %s5904_s18 }
 0x1f8   : > { %7168 = dma.done.wait (%p8674_p4), %s1334_s7, 528  }
 0x1f9   : > { %7170 = vsyncadd (%p8674_p4), %s1334_s7, 4294966768  ;;  %s1351_s2 = scalar_lea.sflag [#allocation28], %s7785_s17  ;;  %s7844_s23 = scalar_lea.vmem [#allocation27], %s5904_s18 }
 0x1fa   : > { %7172 = dma.done.wait (%p8674_p4), %s1351_s2, 528  }
 0x1fb   : > { %7174 = vsyncadd (%p8674_p4), %s1351_s2, 4294966768  ;;  %s8675_s28 = sld [smem:[#allocation47_spill]]  ;;  %p1530_p10 = scmp.lt.s32.totalorder %s7430_s15, 1 }
 0x1fc   : > { %s8676_s8 = sld [smem:[#allocation48_spill]]  ;;  %s1362_s9 = scalar_lea.vmem [#allocation29], %s7788_s26 }
 0x1fd   : > { %s8677_s10 = sld [smem:[#allocation49_spill]]  ;;  %p8682_p6 = scmp.ne.s32.totalorder %s7430_s15, 0 }
 0x1fe   : > { %s8678_s29 = sld [smem:[#allocation50_spill]] }
 0x1ff   : > { %s8679_s21 = sld [smem:[#allocation51_spill]] }
 0x200   : > { %s8680_s7 = sld [smem:[#allocation53_spill]] }
 0x201   : > { %s8681_s1 = sld [smem:[#allocation58_spill]] }
 0x202   : > { %s1531_s16 = scalar_select %p1530_p10, %s7430_s15, 1 }
 0x203   : > { %s8683_s12 = sld [smem:[#allocation39_spill]] (!%p8682_p6) }
 0x204   : > { %s6018_s17 = sshll.u32 %s1531_s16, 6  ;;  %s6019_s18 = sshll.u32 %s1531_s16, 5 }
 0x205   : > { %s7853_s11 = scalar_lea.vmem %s8675_s28, %s6018_s17  ;;  %s7856_s3 = scalar_lea.vmem %s8676_s8, %s6019_s18 }
 0x206   : > { %s7859_s25 = scalar_lea.vmem %s8677_s10, %s6018_s17  ;;  %s7862_s2 = scalar_lea.vmem %s8678_s29, %s6019_s18 }
 0x207   : > { %s7865_s4 = scalar_lea.vmem %s8679_s21, %s6019_s18  ;;  %s7868_s5 = scalar_lea.vmem %s8680_s7, %s6019_s18 }
 0x208   : > { %s7871_s6 = scalar_lea.vmem %s8681_s1, %s6018_s17  ;;  %1568 = sbr.rel (%p8682_p6) target bundleno = 527 (0x20f), region = 208 }
 0x20d   : > { %v1569_v0 = vld [vmem:[%s8683_s12] sm:$0xff]  ;;  %vm1571_vm0 = vcmask 261120   ;;  %v1570_v1 = vld [vmem:[%s8683_s12 + $0x8] sm:$0xff] }
 0x20e   : > { %1572 = vst.msk [vmem:[#allocation2] sm:$0xff] %vm1571_vm0, %v1569_v0  ;;  %1573 = vst.msk [vmem:[#allocation2 + $0x8] sm:$0xff] %vm1571_vm0, %v1570_v1 }
 0x20f PF: > { %vm1578_vm1 = vcmask 261120   ;;  %v1717_v11 = vld [vmem:[%s7856_s3 + $0x18] sm:$0xff]  ;;  %v1628_v13 = vld [vmem:[%s7853_s11 + $0x30] sm:$0xff]  ;;  %v7239_v14 = vmov 0.0   ;;  %v1627_v16 = vld [vmem:[%s7853_s11 + $0x28] sm:$0xff]  ;;  %s8684_s1 = sld [smem:[#allocation40_spill]]  ;;  %v1793_v48 = vlaneseq }
 0x210   : > { %v1629_v12 = vld [vmem:[%s7853_s11 + $0x38] sm:$0xff]  ;;  %6146 = vmatprep.subr.mxu1 %v7239_v14  ;;  %v1716_v15 = vld [vmem:[%s7856_s3 + $0x10] sm:$0xff]  ;;  %v1626_v17 = vld [vmem:[%s7853_s11 + $0x20] sm:$0xff]  ;;  %vm7240_vm2 = vmmov 0   ;;  %1700 = vmatprep.mubr.f32.mxu0 %v7239_v14  ;;  %s8687_s21 = sld [smem:[#allocation42_spill]]  ;;  %vm1812_vm3 = vcmask 130048  }
 0x211   : > { %1660 = vmatprep.subr.mxu0 %v1629_v12  ;;  %6147 = vmatpush3.msra.mxu1 %v1717_v11  ;;  %v1625_v18 = vld [vmem:[%s7853_s11 + $0x18] sm:$0xff]  ;;  %v1715_v19 = vld [vmem:[%s7856_s3 + $0x8] sm:$0xff]  ;;  %v1624_v20 = vld [vmem:[%s7853_s11 + $0x10] sm:$0xff]  ;;  %v7921_v49 = vshrl.u32 %v1793_v48, 7  ;;  %v7241_v50 = vmov 3   ;;  %s8688_s29 = sld [smem:[#allocation41_spill]] }
 0x212   : > { %1661 = vmatpush1.msra.mxu0 %v1628_v13  ;;  %6148 = vmatprep.subr.mxu1 %v7239_v14  ;;  %v1714_v21 = vld [vmem:[%s7856_s3] sm:$0xff]  ;;  %v1623_v22 = vld [vmem:[%s7853_s11 + $0x8] sm:$0xff]  ;;  %s8685_s3 = scalar_lea.vmem [#allocation6], %s7788_s26  ;;  %v7242_v51 = vmov 0   ;;  %s7243_s10 = smov 64   ;;  %vm2025_vm13 = vcmask 64512  }
 0x213   : > { %1662 = vmatprep.subr.mxu0 %v1627_v16  ;;  %6149 = vmatpush3.msra.mxu1 %v1716_v15  ;;  %v1622_v24 = vld [vmem:[%s7853_s11] sm:$0xff]  ;;  %s8686_s11 = scalar_lea.vmem [#allocation8], %s7788_s26  ;;  %v1802_v52 = vsub.s32 0, %v7921_v49  ;;  %s7250_s8 = smov 16   ;;  %v1796_v15 = vand.u32 127, %v1793_v48  ;;  %v1798_v16 = vsub.s32 7, %v7921_v49 }
 0x214   : > { %1663 = vmatpush1.msra.mxu0 %v1626_v17  ;;  %6150 = vmatprep.subr.mxu1 %v7239_v14  ;;  %v5923_v34 = vld [vmem:[%s8685_s3] ss:$0 sm:$0xff]  ;;  %s7251_s16 = smov 112   ;;  %s7252_s28 = smov 48   ;;  %vm2431_vm14 = vcmask 261248   ;;  %vm2752_vm15 = vcmask 392448  }
 0x215   : > { %v1574_v2 = vld [vmem:[#allocation2] sm:$0xff]  ;;  %v1575_v4 = vld [vmem:[#allocation2 + $0x8] sm:$0xff]  ;;  %1664 = vmatprep.subr.mxu0 %v1625_v18  ;;  %6151 = vmatpush3.msra.mxu1 %v1715_v19  ;;  %v7976_v18 = vadd.s32 %v1798_v16, %v1796_v15  ;;  %vm8003_vm12 = vcmp.gt.s32.totalorder %v1796_v15, %v7921_v49  ;;  %s7253_s7 = smov 32   ;;  %s7254_s17 = smov 96   ;;  %vm3073_vm0 = vcmask 523648  }
 0x216   : > { %v1579_v3 = vsel %vm1578_vm1, %v1574_v2, 0.0  ;;  %v1582_v5 = vsel %vm1578_vm1, %v1575_v4, 0.0  ;;  %1665 = vmatpush1.msra.mxu0 %v1624_v20  ;;  %v1713_v23 = vld [vmem:[%s8684_s1] sm:$0xff]  ;;  %6152 = vmatprep.subr.mxu1 %v7239_v14  ;;  %s7255_s18 = smov 80   ;;  %s8695_s1 = scalar_lea.vmem [#allocation14], %s7788_s26 }
 0x217   : > { %1580 = vadd.xlane.f32.xlu0 %v1579_v3  ;;  %1583 = vadd.xlane.f32.xlu1 %v1582_v5  ;;  %v5924_v36 = vld [vmem:[%s8686_s11] ss:$0 sm:$0xff]  ;;  %v7245_v3 = vmov 1   ;;  %v7247_v5 = vmov 4   ;;  %vm1897_vm4 = vcmp.eq.s32.totalorder %v7976_v18, 1  ;;  %vm1889_vm5 = vcmp.eq.s32.totalorder %v7976_v18, 0 }
 0x218   : > { %6154 = vmatprep.mubr.msk.f32.mxu1 %vm7240_vm2, %v7239_v14  ;;  %6153 = vmatpush3.msra.mxu1 %v1714_v21  ;;  %v7927_v53 = vld [vmem:[%s8687_s21] sm:$0xf]  ;;  %vm1904_vm6 = vcmp.eq.s32.totalorder %v7976_v18, 2  ;;  %vm1911_vm7 = vcmp.eq.s32.totalorder %v7976_v18, 3  ;;  %vm1918_vm8 = vcmp.eq.s32.totalorder %v7976_v18, 4  ;;  %vm1925_vm9 = vcmp.eq.s32.totalorder %v7976_v18, 5 }
 0x219   : > { %1666 = vmatprep.subr.mxu0 %v1623_v22  ;;  %6155 = vmatmul.mubr.msk.f32.vlgmr.msra.gmra.mxu1 %vm1578_vm1, %v1713_v23  ;;  %v7930_v54 = vrot.slane %v7927_v53, %v1802_v52  ;;  %v7946_v59 = vld [vmem:[%s8688_s29] sm:$0xf]  ;;  %vm1932_vm10 = vcmp.eq.s32.totalorder %v7976_v18, 6  ;;  %vm1939_vm11 = vcmp.eq.s32.totalorder %v7976_v18, 7  ;;  %p6008_p7 = scmp.ne.s32.totalorder %s7430_s15, 1 }
 0x21a   : > { %1667 = vmatpush1.msra.mxu0 %v1622_v24  ;;  %6157 = vmatprep.subr.mxu1 %v7239_v14  ;;  %v7949_v60 = vrot.slane %v7946_v59, %v1802_v52  ;;  %s8701_s15 = sld [smem:[#allocation62_spill]] (!%p6008_p7) }
 0x21b   : > { %6159 = vmatprep.mubr.msk.f32.mxu1 %vm7240_vm2, %v7239_v14  ;;  %6162 = vmatprep.subr.mxu0 %v7239_v14 }
 0x21c   : > { %6529 = vset.pattern.permute.xlu0 %v7241_v50  ;;  %6526 = vset.pattern.permute.xlu1 %v7242_v51 }
 0x2a0   : > { %v1581_v6 = vpop.xlane.xlu0 %1580  ;;  %v1584_v25 = vpop.xlane.xlu1 %1583 }
 0x2a1   : > { %v1586_v7 = vmul.f32 0.03125, %v1581_v6  ;;  %v1587_v26 = vmul.f32 0.03125, %v1584_v25  ;;  %v7248_v6 = vmov 5  }
 0x2a3   : > { %v1588_v8 = vsub.f32 %v1574_v2, %v1586_v7  ;;  %v1589_v27 = vsub.f32 %v1575_v4, %v1587_v26  ;;  %v7244_v2 = vmov 6   ;;  %v7246_v4 = vmov 2  }
 0x2a4   : > { %v2113_v7 = vsub.s32 1, %v7921_v49 }
 0x2a5   : > { %v1590_v9 = vmul.f32 %v1588_v8, %v1588_v8  ;;  %v1591_v28 = vmul.f32 %v1589_v27, %v1589_v27 }
 0x2a7   : > { %v1592_v10 = vsel %vm1578_vm1, %v1590_v9, 0.0  ;;  %v1595_v29 = vsel %vm1578_vm1, %v1591_v28, 0.0  ;;  %v2124_v9 = vrot.slane %v7927_v53, %v2113_v7 }
 0x2a8   : > { %1593 = vadd.xlane.f32.xlu0 %v1592_v10  ;;  %1596 = vadd.xlane.f32.xlu1 %v1595_v29 }
 0x2d9   : > { %v7916_v46 = vpop.f32.mrf.mxu1 }
 0x2da   : > { %6158 = vmatpush3.xpose.msk.msra.mxu1 %vm1812_vm3, %v7916_v46 }
 0x2db   : > { %v6156_v47 = vpop.f32.mrf.mxu1  ;;  %6167 = vmatprep.subr.mxu1 %v7239_v14 }
 0x331   : > { %v1594_v30 = vpop.xlane.xlu0 %1593  ;;  %v1597_v39 = vpop.xlane.xlu1 %1596 }
 0x332   : > { %v1598_v31 = vmul.f32 0.03125, %v1594_v30  ;;  %v1599_v40 = vmul.f32 0.03125, %v1597_v39 }
 0x334   : > { %v1600_v32 = vadd.f32 1e-05, %v1598_v31  ;;  %v1601_v41 = vadd.f32 1e-05, %v1599_v40 }
 0x336   : > { %6591 = vrsqrt.f32 %v1600_v32 }
 0x337   : > { %6593 = vrsqrt.f32 %v1601_v41 }
 0x343   : > { %v6592_v33 = vpop.eup %6591 }
 0x344   : > { %v1604_v35 = vmul.f32 %v6592_v33, %v1588_v8  ;;  %v6594_v42 = vpop.eup %6593  ;;  %v7249_v8 = vmov 7  }
 0x345   : > { %v1605_v43 = vmul.f32 %v6594_v42, %v1589_v27 }
 0x346   : > { %v1612_v37 = vmul.f32 %v5923_v34, %v1604_v35 }
 0x347   : > { %v1613_v44 = vmul.f32 %v5923_v34, %v1605_v43 }
 0x348   : > { %v1620_v38 = vadd.f32 %v5924_v36, %v1612_v37 }
 0x349   : > { %v1621_v45 = vadd.f32 %v5924_v36, %v1613_v44 }
 0x34a   : > { %5925 = vmatmul.mubr.msk.f32.vlgmr.msra.gmra.mxu0 %vm1578_vm1, %v1620_v38 }
 0x34b   : > { %1706 = vmatprep.mubr.f32.mxu0 %v7239_v14 }
 0x34e   : > { %5926 = vmatmul.mubr.msk.f32.gmra.mxu0 %vm1578_vm1, %v1621_v45 }
 0x34f   : > { %6164 = vmatprep.mubr.msk.f32.mxu0 %vm7240_vm2, %v7239_v14 }
 0x40a   : > { %v7932_v55 = vpop.f32.mrf.mxu0 }
 0x40b   : > { %1947 = vrot.lane.b32.xlu0 %v7932_v55, %s7243_s10  ;;  %v1810_v56 = vadd.f32 %v7930_v54, %v7932_v55  ;;  %v1804_v61 = vadd.f32 %v7949_v60, %v7932_v55 }
 0x40c   : > { %v7938_v58 = vpop.f32.mrf.mxu0 }
 0x40d   : > { %v1811_v57 = vmul.f32 0.25, %v1810_v56  ;;  %v1805_v63 = vmul.f32 0.25, %v1804_v61  ;;  %v2114_v56 = vrot.slane %v7946_v59, %v2113_v7 }
 0x40e   : > { %v7971_v10 = vpop.f32.mrf.mxu0 }
 0x40f   : > { %6160 = vmatmul.mubr.msk.f32.vlgmr.msra.gmra.mxu1 %vm1812_vm3, %v1811_v57 }
 0x410   : > { %6168 = vmatpush3.msra.mxu1 %v7938_v58  ;;  %6169 = vmatprep.mubr.msk.f32.mxu1 %vm7240_vm2, %v7239_v14  ;;  %v7973_v11 = vpop.f32.mrf.mxu0 }
 0x411   : > { %6177 = vmatprep.subr.mxu1 %v7239_v14 }
 0x47d   : > { %v1948_v62 = vpop.permute.xlu0 %1947 }
 0x47e   : > { %6163 = vmatpush3.xpose.msk.msra.mxu0 %vm1812_vm3, %v1948_v62 }
 0x47f   : > { %6172 = vmatprep.subr.mxu0 %v7239_v14 }
 0x481   : > { %6165 = vmatmul.mubr.msk.f32.vlgmr.msra.gmra.mxu0 %vm1812_vm3, %v1805_v63 }
 0x482   : > { %6174 = vmatprep.mubr.msk.f32.mxu0 %vm7240_vm2, %v7239_v14 }
 0x4cf   : > { %v1885_v0 = vpop.f32.mrf.mxu1 }
 0x4d0   : > { %1913 = vperm.xlu0 %6529, %v1885_v0   ;;  %1892 = vperm.xlu1 %6526, %v1885_v0  }
 0x4d1   : > { %v6161_v1 = vpop.f32.mrf.mxu1 }
 0x4d4   : > { %6532 = vset.pattern.permute.xlu0 %v7244_v2  ;;  %6527 = vset.pattern.permute.xlu1 %v7245_v3 }
 0x4d5   : > { %1934 = vperm.xlu0 %6532, %v1885_v0   ;;  %1899 = vperm.xlu1 %6527, %v1885_v0  }
 0x4d9   : > { %6528 = vset.pattern.permute.xlu1 %v7246_v4  ;;  %6534 = vset.pattern.permute.xlu0 %v7242_v51 }
 0x4da   : > { %1906 = vperm.xlu1 %6528, %v1885_v0  }
 0x4de   : > { %6530 = vset.pattern.permute.xlu1 %v7247_v5 }
 0x4df   : > { %1920 = vperm.xlu1 %6530, %v1885_v0  }
 0x4e3   : > { %6531 = vset.pattern.permute.xlu1 %v7248_v6 }
 0x4e4   : > { %1927 = vperm.xlu1 %6531, %v1885_v0  }
 0x4e8   : > { %6533 = vset.pattern.permute.xlu1 %v7249_v8 }
 0x4e9   : > { %1941 = vperm.xlu1 %6533, %v1885_v0  }
 0x4ed   : > { %2126 = vrot.lane.b32.xlu1 %v2124_v9, %s7250_s8 }
 0x4ee   : > { %6536 = vset.pattern.permute.xlu1 %v7246_v4 }
 0x4f1   : > { %2134 = vrot.lane.b32.xlu1 %v7916_v46, %s7251_s16 }
 0x541   : > { %v2020_v12 = vpop.f32.mrf.mxu0 }
 0x543   : > { %v6166_v13 = vpop.f32.mrf.mxu0 }
 0x54b   : > { %v1893_v17 = vpop.permute.xlu1 %1892  ;;  %v1914_v25 = vpop.permute.xlu0 %1913 }
 0x54c   : > { %v1895_v21 = vsel %vm1889_vm5, %v1893_v17, 0.0  ;;  %v1916_v27 = vsel %vm1911_vm7, %v1914_v25, 0.0 }
 0x550   : > { %v1900_v19 = vpop.permute.xlu1 %1899  ;;  %v1935_v31 = vpop.permute.xlu0 %1934 }
 0x551   : > { %v1902_v20 = vsel %vm1897_vm4, %v1900_v19, 0.0  ;;  %v1937_v36 = vsel %vm1932_vm10, %v1935_v31, 0.0 }
 0x552   : > { %v1903_v22 = vadd.f32 %v1902_v20, %v1895_v21 }
 0x555   : > { %v1907_v23 = vpop.permute.xlu1 %1906 }
 0x556   : > { %v1909_v24 = vsel %vm1904_vm6, %v1907_v23, 0.0 }
 0x557   : > { %v1910_v26 = vadd.f32 %v1909_v24, %v1903_v22  ;;  %v2435_v22 = vsub.s32 2, %v7921_v49 }
 0x559   : > { %v1917_v29 = vadd.f32 %v1916_v27, %v1910_v26  ;;  %v2446_v23 = vrot.slane %v7927_v53, %v2435_v22 }
 0x55a   : > { %v1921_v28 = vpop.permute.xlu1 %1920 }
 0x55b   : > { %v1923_v30 = vsel %vm1918_vm8, %v1921_v28, 0.0 }
 0x55c   : > { %v1924_v32 = vadd.f32 %v1923_v30, %v1917_v29 }
 0x55f   : > { %v1928_v33 = vpop.permute.xlu1 %1927 }
 0x560   : > { %v1930_v34 = vsel %vm1925_vm9, %v1928_v33, 0.0 }
 0x561   : > { %v1931_v35 = vadd.f32 %v1930_v34, %v1924_v32  ;;  %v2436_v32 = vrot.slane %v7946_v59, %v2435_v22 }
 0x563   : > { %v1938_v37 = vadd.f32 %v1937_v36, %v1931_v35 }
 0x564   : > { %v1942_v38 = vpop.permute.xlu1 %1941 }
 0x565   : > { %v1944_v39 = vsel %vm1939_vm11, %v1942_v38, 0.0 }
 0x566   : > { %v1945_v40 = vadd.f32 %v1944_v39, %v1938_v37 }
 0x568   : > { %v8007_v42 = vpop.permute.xlu1 %2126  ;;  %v2021_v43 = vadd.f32 %v2020_v12, %v1945_v40 }
 0x569   : > { %v2129_v44 = vadd.f32 %v8007_v42, %v7932_v55 }
 0x56a   : > { %v2024_v45 = vsel %vm8003_vm12, -1e+30, %v2021_v43 }
 0x56b   : > { %v2026_v47 = vsel %vm2025_vm13, %v2024_v45, -inf  ;;  %v2130_v48 = vmul.f32 0.25, %v2129_v44 }
 0x56c   : > { %v8014_v52 = vpop.permute.xlu1 %2134  ;;  %2027 = vmax.xlane.f32.xlu0 %v2026_v47 }
 0x56d   : > { %2132 = vrot.lane.b32.xlu1 %v2130_v48, %s7251_s16  ;;  %6173 = vmatpush3.xpose.msk.msra.mxu0 %vm1812_vm3, %v8014_v52 }
 0x56e   : > { %6182 = vmatprep.subr.mxu0 %v7239_v14 }
 0x571   : > { %2116 = vrot.lane.b32.xlu1 %v2114_v56, %s7250_s8 }
 0x582   : > { %2262 = vrot.lane.b32.xlu0 %v7932_v55, %s7252_s28 }
 0x5df   : > { %v2133_v57 = vpop.permute.xlu1 %2132 }
 0x5e0   : > { %6175 = vmatmul.mubr.msk.f32.vlgmr.msra.gmra.mxu0 %vm1812_vm3, %v2133_v57 }
 0x5e1   : > { %6184 = vmatprep.mubr.msk.f32.mxu0 %vm7240_vm2, %v7239_v14 }
 0x5e3   : > { %v8028_v7 = vpop.permute.xlu1 %2116 }
 0x5e4   : > { %v2119_v9 = vadd.f32 %v8028_v7, %v7932_v55 }
 0x5e6   : > { %v2120_v12 = vmul.f32 0.25, %v2119_v9 }
 0x5f5   : > { %v2028_v61 = vpop.xlane.xlu0 %2027 }
 0x5f6   : > { %v2029_v62 = vsub.f32 %v2024_v45, %v2028_v61 }
 0x5f8   : > { %v2030_v63 = vmul.f32 1.442695, %v2029_v62 }
 0x5f9   : > { %v2263_v20 = vpop.permute.xlu0 %2262 }
 0x5fa   : > { %6595 = vpow2.f32 %v2030_v63 }
 0x607   : > { %v6596_v0 = vpop.eup %6595 }
 0x608   : > { %v2032_v1 = vsel %vm2025_vm13, %v6596_v0, 0.0 }
 0x609   : > { %2033 = vadd.xlane.f32.xlu1 %v2032_v1 }
 0x61a   : > { %2260 = vrot.lane.b32.xlu1 %v2120_v12, %s7251_s16 }
 0x692   : > { %v2034_v13 = vpop.xlane.xlu1 %2033 }
 0x693   : > { %6597 = vrcp.f32 %v2034_v13 }
 0x696   : > { %v2261_v21 = vpop.permute.xlu1 %2260 }
 0x6a0   : > { %v6598_v15 = vpop.eup %6597  ;;  %v2206_v16 = vpop.f32.mrf.mxu0 }
 0x6a1   : > { %2224 = vperm.xlu1 %6536, %v2206_v16   ;;  %2212 = vperm.xlu0 %6534, %v2206_v16   ;;  %v2036_v17 = vmul.f32 %v6598_v15, %v6596_v0 }
 0x6a2   : > { %v6176_v19 = vpop.f32.mrf.mxu0 }
 0x6a3   : > { %6170 = vmatmul.mubr.msk.f32.vlgmr.msra.gmra.mxu1 %vm2025_vm13, %v2036_v17 }
 0x6a4   : > { %6178 = vmatpush3.xpose.msk.msra.mxu1 %vm1812_vm3, %v2263_v20  ;;  %6179 = vmatprep.mubr.msk.f32.mxu1 %vm7240_vm2, %v7239_v14 }
 0x6a5   : > { %6538 = vset.pattern.permute.xlu1 %v7247_v5  ;;  %6535 = vset.pattern.permute.xlu0 %v7245_v3 }
 0x6a6   : > { %2236 = vperm.xlu1 %6538, %v2206_v16   ;;  %2218 = vperm.xlu0 %6535, %v2206_v16  }
 0x6a7   : > { %6180 = vmatmul.mubr.msk.f32.vlgmr.msra.gmra.mxu1 %vm1812_vm3, %v2261_v21  ;;  %6187 = vmatprep.subr.mxu1 %v7239_v14 }
 0x6a8   : > { %6189 = vmatprep.mubr.msk.f32.mxu1 %vm7240_vm2, %v7239_v14 }
 0x6aa   : > { %6539 = vset.pattern.permute.xlu1 %v7248_v6  ;;  %6537 = vset.pattern.permute.xlu0 %v7241_v50 }
 0x6ab   : > { %2242 = vperm.xlu1 %6539, %v2206_v16   ;;  %2230 = vperm.xlu0 %6537, %v2206_v16  }
 0x6af   : > { %6541 = vset.pattern.permute.xlu1 %v7249_v8  ;;  %6540 = vset.pattern.permute.xlu0 %v7244_v2 }
 0x6b0   : > { %2254 = vperm.xlu1 %6541, %v2206_v16   ;;  %2248 = vperm.xlu0 %6540, %v2206_v16  }
 0x6b4   : > { %2448 = vrot.lane.b32.xlu1 %v2446_v23, %s7253_s7  ;;  %6542 = vset.pattern.permute.xlu0 %v7242_v51 }
 0x6b5   : > { %6544 = vset.pattern.permute.xlu1 %v7246_v4 }
 0x6b8   : > { %2456 = vrot.lane.b32.xlu1 %v7916_v46, %s7254_s17 }
 0x71c   : > { %v2225_v24 = vpop.permute.xlu1 %2224  ;;  %v2213_v33 = vpop.permute.xlu0 %2212 }
 0x71d   : > { %v2215_v36 = vsel %vm1889_vm5, %v2213_v33, 0.0  ;;  %v2227_v39 = vsel %vm1904_vm6, %v2225_v24, 0.0  ;;  %v2756_v33 = vsub.s32 3, %v7921_v49 }
 0x721   : > { %v2237_v25 = vpop.permute.xlu1 %2236  ;;  %v2219_v34 = vpop.permute.xlu0 %2218 }
 0x722   : > { %v2221_v35 = vsel %vm1897_vm4, %v2219_v34, 0.0  ;;  %v2239_v45 = vsel %vm1918_vm8, %v2237_v25, 0.0  ;;  %v2767_v34 = vrot.slane %v7927_v53, %v2756_v33 }
 0x723   : > { %v2222_v37 = vadd.f32 %v2221_v35, %v2215_v36 }
 0x725   : > { %v2228_v40 = vadd.f32 %v2227_v39, %v2222_v37 }
 0x726   : > { %v2243_v26 = vpop.permute.xlu1 %2242  ;;  %v2231_v38 = vpop.permute.xlu0 %2230 }
 0x727   : > { %v2233_v43 = vsel %vm1911_vm7, %v2231_v38, 0.0  ;;  %v2245_v56 = vsel %vm1925_vm9, %v2243_v26, 0.0 }
 0x728   : > { %v2234_v44 = vadd.f32 %v2233_v43, %v2228_v40 }
 0x72a   : > { %v2240_v47 = vadd.f32 %v2239_v45, %v2234_v44 }
 0x72b   : > { %v2255_v27 = vpop.permute.xlu1 %2254  ;;  %v2249_v48 = vpop.permute.xlu0 %2248 }
 0x72c   : > { %v2246_v57 = vadd.f32 %v2245_v56, %v2240_v47  ;;  %v2251_v61 = vsel %vm1932_vm10, %v2249_v48, 0.0  ;;  %v2257_v0 = vsel %vm1939_vm11, %v2255_v27, 0.0 }
 0x72e   : > { %v2252_v62 = vadd.f32 %v2251_v61, %v2246_v57 }
 0x72f   : > { %v8054_v28 = vpop.permute.xlu1 %2448 }
 0x730   : > { %v2451_v29 = vadd.f32 %v8054_v28, %v7932_v55  ;;  %v2258_v9 = vadd.f32 %v2257_v0, %v2252_v62 }
 0x732   : > { %v2452_v30 = vmul.f32 0.25, %v2451_v29 }
 0x733   : > { %v8058_v31 = vpop.permute.xlu1 %2456 }
 0x734   : > { %2454 = vrot.lane.b32.xlu1 %v2452_v30, %s7254_s17  ;;  %6188 = vmatpush3.xpose.msk.msra.mxu1 %vm1812_vm3, %v8058_v31 }
 0x735   : > { %6197 = vmatprep.subr.mxu1 %v7239_v14 }
 0x738   : > { %2438 = vrot.lane.b32.xlu1 %v2436_v32, %s7253_s7 }
 0x763   : > { %v2106_v63 = vpop.f32.mrf.mxu1 }
 0x764   : > { %2110 = vst.msk [vmem:[#allocation3] sm:$0xff] %vm1812_vm3, %v2106_v63 }
 0x765   : > { %v6171_v1 = vpop.f32.mrf.mxu1 }
 0x767   : > { %v2334_v12 = vpop.f32.mrf.mxu1 }
 0x768   : > { %v2335_v13 = vadd.f32 %v2334_v12, %v2258_v9 }
 0x769   : > { %v6181_v15 = vpop.f32.mrf.mxu1 }
 0x76a   : > { %v2338_v16 = vsel %vm8003_vm12, -1e+30, %v2335_v13 }
 0x76b   : > { %v2339_v17 = vsel %vm2025_vm13, %v2338_v16, -inf }
 0x76c   : > { %2340 = vmax.xlane.f32.xlu0 %v2339_v17 }
 0x782   : > { %2351 = vrot.lane.b32.xlu0 %v7938_v58, %s7251_s16 }
 0x7a6   : > { %v2455_v19 = vpop.permute.xlu1 %2454 }
 0x7a7   : > { %6190 = vmatmul.mubr.msk.f32.vlgmr.msra.gmra.mxu1 %vm1812_vm3, %v2455_v19 }
 0x7a8   : > { %6199 = vmatprep.mubr.msk.f32.mxu1 %vm7240_vm2, %v7239_v14 }
 0x7aa   : > { %v8091_v20 = vpop.permute.xlu1 %2438 }
 0x7ab   : > { %v2441_v21 = vadd.f32 %v8091_v20, %v7932_v55 }
 0x7ad   : > { %v2442_v22 = vmul.f32 0.25, %v2441_v21 }
 0x7af   : > { %2582 = vrot.lane.b32.xlu0 %v2442_v22, %s7254_s17 }
 0x7f5   : > { %v2341_v23 = vpop.xlane.xlu0 %2340 }
 0x7f6   : > { %v2342_v24 = vsub.f32 %v2338_v16, %v2341_v23 }
 0x7f8   : > { %v2343_v25 = vmul.f32 1.442695, %v2342_v24 }
 0x7f9   : > { %v2352_v26 = vpop.permute.xlu0 %2351 }
 0x7fa   : > { %6599 = vpow2.f32 %v2343_v25  ;;  %6183 = vmatpush3.msra.mxu0 %v2352_v26  ;;  %v2757_v26 = vrot.slane %v7946_v59, %v2756_v33 }
 0x7fb   : > { %6192 = vmatprep.subr.mxu0 %v7239_v14 }
 0x807   : > { %v6600_v27 = vpop.eup %6599 }
 0x808   : > { %v2345_v29 = vsel %vm2025_vm13, %v6600_v27, 0.0 }
 0x809   : > { %2346 = vadd.xlane.f32.xlu1 %v2345_v29 }
 0x81a   : > { %2584 = vrot.lane.b32.xlu1 %v7932_v55, %s7253_s7 }
 0x821   : > { %v2583_v53 = vpop.permute.xlu0 %2582 }
 0x867   : > { %v2528_v30 = vpop.f32.mrf.mxu1 }
 0x868   : > { %2534 = vperm.xlu0 %6542, %v2528_v30   ;;  %2546 = vperm.xlu1 %6544, %v2528_v30  }
 0x869   : > { %v6191_v32 = vpop.f32.mrf.mxu1 }
 0x86c   : > { %6543 = vset.pattern.permute.xlu0 %v7245_v3  ;;  %6545 = vset.pattern.permute.xlu1 %v7241_v50 }
 0x86d   : > { %2540 = vperm.xlu0 %6543, %v2528_v30   ;;  %2552 = vperm.xlu1 %6545, %v2528_v30  }
 0x871   : > { %6546 = vset.pattern.permute.xlu0 %v7247_v5  ;;  %6547 = vset.pattern.permute.xlu1 %v7248_v6 }
 0x872   : > { %2558 = vperm.xlu0 %6546, %v2528_v30   ;;  %2564 = vperm.xlu1 %6547, %v2528_v30  }
 0x876   : > { %6549 = vset.pattern.permute.xlu0 %v7249_v8  ;;  %6548 = vset.pattern.permute.xlu1 %v7244_v2 }
 0x877   : > { %2576 = vperm.xlu0 %6549, %v2528_v30   ;;  %2570 = vperm.xlu1 %6548, %v2528_v30  }
 0x87b   : > { %2777 = vrot.lane.b32.xlu0 %v7916_v46, %s7255_s18  ;;  %2769 = vrot.lane.b32.xlu1 %v2767_v34, %s7252_s28 }
 0x87c   : > { %6553 = vset.pattern.permute.xlu0 %v7241_v50  ;;  %6550 = vset.pattern.permute.xlu1 %v7242_v51 }
 0x892   : > { %v2347_v35 = vpop.xlane.xlu1 %2346 }
 0x893   : > { %6601 = vrcp.f32 %v2347_v35 }
 0x896   : > { %v2585_v37 = vpop.permute.xlu1 %2584 }
 0x8a0   : > { %v6602_v49 = vpop.eup %6601 }
 0x8a1   : > { %v2349_v36 = vmul.f32 %v6602_v49, %v6600_v27 }
 0x8a3   : > { %6185 = vmatmul.mubr.msk.f32.vlgmr.msra.gmra.mxu0 %vm2025_vm13, %v2349_v36 }
 0x8a4   : > { %6193 = vmatpush3.xpose.msk.msra.mxu0 %vm1812_vm3, %v2585_v37  ;;  %6194 = vmatprep.mubr.msk.f32.mxu0 %vm7240_vm2, %v7239_v14 }
 0x8a5   : > { %6202 = vmatprep.subr.mxu0 %v7239_v14 }
 0x8a7   : > { %6195 = vmatmul.mubr.msk.f32.vlgmr.msra.gmra.mxu0 %vm1812_vm3, %v2583_v53 }
 0x8a8   : > { %6204 = vmatprep.mubr.msk.f32.mxu0 %vm7240_vm2, %v7239_v14 }
 0x8e3   : > { %v2547_v38 = vpop.permute.xlu1 %2546  ;;  %v2535_v39 = vpop.permute.xlu0 %2534 }
 0x8e4   : > { %v2537_v44 = vsel %vm1889_vm5, %v2535_v39, 0.0  ;;  %v2549_v48 = vsel %vm1904_vm6, %v2547_v38, 0.0 }
 0x8e8   : > { %v2553_v40 = vpop.permute.xlu1 %2552  ;;  %v2541_v43 = vpop.permute.xlu0 %2540 }
 0x8e9   : > { %v2543_v45 = vsel %vm1897_vm4, %v2541_v43, 0.0  ;;  %v2555_v57 = vsel %vm1911_vm7, %v2553_v40, 0.0 }
 0x8ea   : > { %v2544_v47 = vadd.f32 %v2543_v45, %v2537_v44 }
 0x8ec   : > { %v2550_v56 = vadd.f32 %v2549_v48, %v2544_v47 }
 0x8ed   : > { %v2565_v61 = vpop.permute.xlu1 %2564  ;;  %v2559_v62 = vpop.permute.xlu0 %2558 }
 0x8ee   : > { %v2556_v63 = vadd.f32 %v2555_v57, %v2550_v56  ;;  %v2561_v0 = vsel %vm1918_vm8, %v2559_v62, 0.0  ;;  %v2567_v9 = vsel %vm1925_vm9, %v2565_v61, 0.0  ;;  %v3077_v61 = vadd.f32 %v7930_v54, %v7971_v10 }
 0x8f0   : > { %v2562_v1 = vadd.f32 %v2561_v0, %v2556_v63  ;;  %v3078_v63 = vmul.f32 0.25, %v3077_v61 }
 0x8f2   : > { %v2568_v12 = vadd.f32 %v2567_v9, %v2562_v1  ;;  %v2571_v13 = vpop.permute.xlu1 %2570  ;;  %v2577_v15 = vpop.permute.xlu0 %2576 }
 0x8f3   : > { %v2573_v16 = vsel %vm1932_vm10, %v2571_v13, 0.0  ;;  %v2579_v19 = vsel %vm1939_vm11, %v2577_v15, 0.0 }
 0x8f4   : > { %v2574_v17 = vadd.f32 %v2573_v16, %v2568_v12 }
 0x8f6   : > { %v2580_v21 = vadd.f32 %v2579_v19, %v2574_v17  ;;  %v8137_v22 = vpop.permute.xlu1 %2769  ;;  %v8139_v23 = vpop.permute.xlu0 %2777 }
 0x8f7   : > { %v2772_v24 = vadd.f32 %v8137_v22, %v7932_v55  ;;  %6203 = vmatpush3.xpose.msk.msra.mxu0 %vm1812_vm3, %v8139_v23 }
 0x8f8   : > { %6212 = vmatprep.subr.mxu0 %v7239_v14 }
 0x8f9   : > { %v2773_v25 = vmul.f32 0.25, %v2772_v24 }
 0x8fb   : > { %2775 = vrot.lane.b32.xlu0 %v2773_v25, %s7255_s18 }
 0x8ff   : > { %2759 = vrot.lane.b32.xlu0 %v2757_v26, %s7252_s28 }
 0x963   : > { %v8149_v27 = vpop.f32.mrf.mxu0 }
 0x965   : > { %v6186_v29 = vpop.f32.mrf.mxu0 }
 0x967   : > { %v2656_v30 = vpop.f32.mrf.mxu0 }
 0x968   : > { %v2657_v32 = vadd.f32 %v2656_v30, %v2580_v21 }
 0x969   : > { %v6196_v34 = vpop.f32.mrf.mxu0 }
 0x96a   : > { %v2660_v35 = vsel %vm8003_vm12, -1e+30, %v2657_v32 }
 0x96b   : > { %v2661_v49 = vsel %vm2025_vm13, %v2660_v35, -inf }
 0x96c   : > { %2662 = vmax.xlane.f32.xlu1 %v2661_v49 }
 0x96d   : > { %v2776_v36 = vpop.permute.xlu0 %2775 }
 0x96e   : > { %6205 = vmatmul.mubr.msk.f32.vlgmr.msra.gmra.mxu0 %vm1812_vm3, %v2776_v36 }
 0x96f   : > { %6214 = vmatprep.mubr.msk.f32.mxu0 %vm7240_vm2, %v7239_v14 }
 0x971   : > { %v8157_v59 = vpop.permute.xlu0 %2759 }
 0x972   : > { %v2762_v33 = vadd.f32 %v8157_v59, %v7932_v55 }
 0x974   : > { %v2763_v37 = vmul.f32 0.25, %v2762_v33 }
 0x97d   : > { %2672 = vrot.lane.b32.xlu1 %v7938_v58, %s7254_s17 }
 0x981   : > { %2903 = vrot.lane.b32.xlu1 %v2763_v37, %s7255_s18 }
 0x9f5   : > { %v2663_v53 = vpop.xlane.xlu1 %2662 }
 0x9f6   : > { %v2664_v38 = vsub.f32 %v2660_v35, %v2663_v53 }
 0x9f8   : > { %v2665_v39 = vmul.f32 1.442695, %v2664_v38 }
 0x9f9   : > { %v2673_v40 = vpop.permute.xlu1 %2672 }
 0x9fa   : > { %6603 = vpow2.f32 %v2665_v39  ;;  %6198 = vmatpush3.msra.mxu1 %v2673_v40 }
 0x9fb   : > { %6207 = vmatprep.subr.mxu1 %v7239_v14 }
 0x9fd   : > { %v2904_v62 = vpop.permute.xlu1 %2903 }
 0xa07   : > { %v6604_v43 = vpop.eup %6603 }
 0xa08   : > { %v2667_v44 = vsel %vm2025_vm13, %v6604_v43, 0.0 }
 0xa09   : > { %2668 = vadd.xlane.f32.xlu0 %v2667_v44 }
 0xa1f   : > { %2905 = vrot.lane.b32.xlu0 %v7932_v55, %s7250_s8 }
 0xa2e   : > { %v2849_v45 = vpop.f32.mrf.mxu0 }
 0xa2f   : > { %2873 = vperm.xlu0 %6553, %v2849_v45   ;;  %2855 = vperm.xlu1 %6550, %v2849_v45  }
 0xa30   : > { %v6206_v47 = vpop.f32.mrf.mxu0 }
 0xa33   : > { %6556 = vset.pattern.permute.xlu0 %v7244_v2  ;;  %6551 = vset.pattern.permute.xlu1 %v7245_v3 }
 0xa34   : > { %2891 = vperm.xlu0 %6556, %v2849_v45   ;;  %2861 = vperm.xlu1 %6551, %v2849_v45  }
 0xa38   : > { %6552 = vset.pattern.permute.xlu1 %v7246_v4  ;;  %6559 = vset.pattern.permute.xlu0 %v7245_v3 }
 0xa39   : > { %2867 = vperm.xlu1 %6552, %v2849_v45  }
 0xa3d   : > { %6554 = vset.pattern.permute.xlu1 %v7247_v5 }
 0xa3e   : > { %2879 = vperm.xlu1 %6554, %v2849_v45  }
 0xa42   : > { %6555 = vset.pattern.permute.xlu1 %v7248_v6 }
 0xa43   : > { %2885 = vperm.xlu1 %6555, %v2849_v45  }
 0xa47   : > { %6557 = vset.pattern.permute.xlu1 %v7249_v8 }
 0xa48   : > { %2897 = vperm.xlu1 %6557, %v2849_v45  }
 0xa4c   : > { %6558 = vset.pattern.permute.xlu1 %v7242_v51 }
 0xa92   : > { %v2669_v55 = vpop.xlane.xlu0 %2668 }
 0xa93   : > { %6605 = vrcp.f32 %v2669_v55 }
 0xa96   : > { %v2906_v57 = vpop.permute.xlu0 %2905 }
 0xaa0   : > { %v6606_v48 = vpop.eup %6605 }
 0xaa1   : > { %v2671_v56 = vmul.f32 %v6606_v48, %v6604_v43 }
 0xaa3   : > { %6200 = vmatmul.mubr.msk.f32.vlgmr.msra.gmra.mxu1 %vm2025_vm13, %v2671_v56 }
 0xaa4   : > { %6208 = vmatpush3.xpose.msk.msra.mxu1 %vm1812_vm3, %v2906_v57  ;;  %6209 = vmatprep.mubr.msk.f32.mxu1 %vm7240_vm2, %v7239_v14 }
 0xaa5   : > { %6217 = vmatprep.subr.mxu1 %v7239_v14 }
 0xaa7   : > { %6210 = vmatmul.mubr.msk.f32.vlgmr.msra.gmra.mxu1 %vm1812_vm3, %v2904_v62  ;;  %v3367_v62 = vadd.f32 %v8007_v42, %v7971_v10 }
 0xaa8   : > { %6218 = vmatpush3.xpose.msk.msra.mxu1 %vm1812_vm3, %v7916_v46  ;;  %6219 = vmatprep.mubr.msk.f32.mxu1 %vm7240_vm2, %v7239_v14 }
 0xaa9   : > { %6227 = vmatprep.subr.mxu1 %v7239_v14 }
 0xaaa   : > { %v2856_v54 = vpop.permute.xlu1 %2855  ;;  %v2874_v16 = vpop.permute.xlu0 %2873 }
 0xaab   : > { %6220 = vmatmul.mubr.msk.f32.vlgmr.msra.gmra.mxu1 %vm1812_vm3, %v3078_v63  ;;  %v2858_v9 = vsel %vm1889_vm5, %v2856_v54, 0.0  ;;  %v2876_v19 = vsel %vm1911_vm7, %v2874_v16, 0.0  ;;  %v3368_v63 = vmul.f32 0.25, %v3367_v62 }
 0xaac   : > { %6228 = vmatpush3.msra.mxu1 %v7973_v11  ;;  %6229 = vmatprep.mubr.msk.f32.mxu1 %vm7240_vm2, %v7239_v14 }
 0xaad   : > { %6237 = vmatprep.subr.mxu1 %v7239_v14 }
 0xaaf   : > { %v2862_v0 = vpop.permute.xlu1 %2861  ;;  %v2892_v30 = vpop.permute.xlu0 %2891 }
 0xab0   : > { %v2864_v46 = vsel %vm1897_vm4, %v2862_v0, 0.0  ;;  %v2894_v35 = vsel %vm1932_vm10, %v2892_v30, 0.0 }
 0xab1   : > { %v2865_v13 = vadd.f32 %v2864_v46, %v2858_v9 }
 0xab4   : > { %v2868_v1 = vpop.permute.xlu1 %2867 }
 0xab5   : > { %v2870_v12 = vsel %vm1904_vm6, %v2868_v1, 0.0 }
 0xab6   : > { %v2871_v17 = vadd.f32 %v2870_v12, %v2865_v13 }
 0xab8   : > { %v2877_v21 = vadd.f32 %v2876_v19, %v2871_v17 }
 0xab9   : > { %v2880_v15 = vpop.permute.xlu1 %2879 }
 0xaba   : > { %v2882_v25 = vsel %vm1918_vm8, %v2880_v15, 0.0 }
 0xabb   : > { %v2883_v29 = vadd.f32 %v2882_v25, %v2877_v21 }
 0xabe   : > { %v2886_v24 = vpop.permute.xlu1 %2885 }
 0xabf   : > { %v2888_v26 = vsel %vm1925_vm9, %v2886_v24, 0.0  ;;  %v3075_v24 = vadd.f32 %v7949_v60, %v7971_v10 }
 0xac0   : > { %v2889_v32 = vadd.f32 %v2888_v26, %v2883_v29 }
 0xac2   : > { %v2895_v49 = vadd.f32 %v2894_v35, %v2889_v32 }
 0xac3   : > { %v2898_v34 = vpop.permute.xlu1 %2897 }
 0xac4   : > { %v2900_v36 = vsel %vm1939_vm11, %v2898_v34, 0.0  ;;  %v3076_v34 = vmul.f32 0.25, %v3075_v24 }
 0xac5   : > { %v2901_v53 = vadd.f32 %v2900_v36, %v2895_v49 }
 0xb63   : > { %v8210_v33 = vpop.f32.mrf.mxu1 }
 0xb65   : > { %v6201_v37 = vpop.f32.mrf.mxu1 }
 0xb67   : > { %v2977_v38 = vpop.f32.mrf.mxu1 }
 0xb68   : > { %v2978_v39 = vadd.f32 %v2977_v38, %v2901_v53 }
 0xb69   : > { %v6211_v40 = vpop.f32.mrf.mxu1 }
 0xb6a   : > { %v2981_v43 = vsel %vm8003_vm12, -1e+30, %v2978_v39 }
 0xb6b   : > { %v3148_v44 = vpop.f32.mrf.mxu1  ;;  %v2982_v45 = vsel %vm2025_vm13, %v2981_v43, -inf }
 0xb6c   : > { %2983 = vmax.xlane.f32.xlu1 %v2982_v45 }
 0xb6d   : > { %v6221_v47 = vpop.f32.mrf.mxu1 }
 0xb7d   : > { %3202 = vrot.lane.b32.xlu1 %v7971_v10, %s7243_s10 }
 0xb81   : > { %3154 = vperm.xlu1 %6558, %v3148_v44  }
 0xb85   : > { %6560 = vset.pattern.permute.xlu1 %v7246_v4 }
 0xb86   : > { %3166 = vperm.xlu1 %6560, %v3148_v44  }
 0xb8a   : > { %6561 = vset.pattern.permute.xlu1 %v7241_v50 }
 0xb8b   : > { %3172 = vperm.xlu1 %6561, %v3148_v44  }
 0xb8f   : > { %6563 = vset.pattern.permute.xlu1 %v7248_v6 }
 0xb90   : > { %3184 = vperm.xlu1 %6563, %v3148_v44  }
 0xb94   : > { %6564 = vset.pattern.permute.xlu1 %v7244_v2 }
 0xb95   : > { %3190 = vperm.xlu1 %6564, %v3148_v44  }
 0xb99   : > { %6566 = vset.pattern.permute.xlu1 %v7242_v51 }
 0xbf5   : > { %v2984_v55 = vpop.xlane.xlu1 %2983 }
 0xbf6   : > { %v2985_v48 = vsub.f32 %v2981_v43, %v2984_v55 }
 0xbf8   : > { %v2986_v56 = vmul.f32 1.442695, %v2985_v48 }
 0xbf9   : > { %v3203_v54 = vpop.permute.xlu1 %3202 }
 0xbfa   : > { %6607 = vpow2.f32 %v2986_v56 }
 0xbfd   : > { %v3155_v0 = vpop.permute.xlu1 %3154 }
 0xbfe   : > { %v3157_v42 = vsel %vm1889_vm5, %v3155_v0, 0.0 }
 0xc07   : > { %v6608_v57 = vpop.eup %6607 }
 0xc08   : > { %v2988_v61 = vsel %vm2025_vm13, %v6608_v57, 0.0 }
 0xc09   : > { %2989 = vadd.xlane.f32.xlu0 %v2988_v61 }
 0xc1f   : > { %2993 = vrot.lane.b32.xlu0 %v7938_v58, %s7255_s18  ;;  %v3167_v58 = vpop.permute.xlu1 %3166 }
 0xc20   : > { %v3169_v19 = vsel %vm1904_vm6, %v3167_v58, 0.0  ;;  %v3365_v58 = vadd.f32 %v8028_v7, %v7971_v10 }
 0xc23   : > { %3160 = vperm.xlu0 %6559, %v3148_v44   ;;  %v3173_v9 = vpop.permute.xlu1 %3172 }
 0xc24   : > { %v3175_v26 = vsel %vm1911_vm7, %v3173_v9, 0.0  ;;  %v3668_v9 = vadd.f32 %v8054_v28, %v7971_v10 }
 0xc27   : > { %6562 = vset.pattern.permute.xlu0 %v7247_v5  ;;  %v3185_v16 = vpop.permute.xlu1 %3184 }
 0xc28   : > { %3178 = vperm.xlu0 %6562, %v3148_v44   ;;  %v3187_v49 = vsel %vm1925_vm9, %v3185_v16, 0.0 }
 0xc2b   : > { %v3191_v60 = vpop.permute.xlu1 %3190 }
 0xc2c   : > { %6565 = vset.pattern.permute.xlu0 %v7249_v8  ;;  %v3193_v53 = vsel %vm1932_vm10, %v3191_v60, 0.0 }
 0xc2d   : > { %3196 = vperm.xlu0 %6565, %v3148_v44  }
 0xc31   : > { %3370 = vrot.lane.b32.xlu0 %v3368_v63, %s7251_s16 }
 0xc32   : > { %6569 = vset.pattern.permute.xlu0 %v7241_v50 }
 0xc92   : > { %v2990_v1 = vpop.xlane.xlu0 %2989 }
 0xc93   : > { %6609 = vrcp.f32 %v2990_v1 }
 0xc96   : > { %v2994_v46 = vpop.permute.xlu0 %2993 }
 0xc97   : > { %6213 = vmatpush3.msra.mxu0 %v2994_v46  ;;  %v3366_v46 = vmul.f32 0.25, %v3365_v58 }
 0xc98   : > { %6222 = vmatprep.subr.mxu0 %v7239_v14 }
 0xc9e   : > { %v3161_v12 = vpop.permute.xlu0 %3160 }
 0xc9f   : > { %v3163_v13 = vsel %vm1897_vm4, %v3161_v12, 0.0  ;;  %v3669_v12 = vmul.f32 0.25, %v3668_v9 }
 0xca0   : > { %v6610_v15 = vpop.eup %6609  ;;  %v3164_v17 = vadd.f32 %v3163_v13, %v3157_v42 }
 0xca1   : > { %v2992_v21 = vmul.f32 %v6610_v15, %v6608_v57 }
 0xca2   : > { %v3170_v25 = vadd.f32 %v3169_v19, %v3164_v17 }
 0xca3   : > { %6215 = vmatmul.mubr.msk.f32.vlgmr.msra.gmra.mxu0 %vm2025_vm13, %v2992_v21  ;;  %v3179_v29 = vpop.permute.xlu0 %3178 }
 0xca4   : > { %v3176_v30 = vadd.f32 %v3175_v26, %v3170_v25  ;;  %v3181_v32 = vsel %vm1918_vm8, %v3179_v29, 0.0  ;;  %6223 = vmatpush3.xpose.msk.msra.mxu0 %vm1812_vm3, %v3203_v54  ;;  %6224 = vmatprep.mubr.msk.f32.mxu0 %vm7240_vm2, %v7239_v14 }
 0xca5   : > { %6232 = vmatprep.subr.mxu0 %v7239_v14 }
 0xca6   : > { %v3182_v35 = vadd.f32 %v3181_v32, %v3176_v30 }
 0xca7   : > { %6225 = vmatmul.mubr.msk.f32.vlgmr.msra.gmra.mxu0 %vm1812_vm3, %v3076_v34 }
 0xca8   : > { %v3188_v36 = vadd.f32 %v3187_v49, %v3182_v35  ;;  %6233 = vmatpush3.xpose.msk.msra.mxu0 %vm1812_vm3, %v8014_v52  ;;  %v3197_v37 = vpop.permute.xlu0 %3196  ;;  %6234 = vmatprep.mubr.msk.f32.mxu0 %vm7240_vm2, %v7239_v14 }
 0xca9   : > { %6242 = vmatprep.subr.mxu0 %v7239_v14  ;;  %v3199_v39 = vsel %vm1939_vm11, %v3197_v37, 0.0 }
 0xcaa   : > { %v3194_v38 = vadd.f32 %v3193_v53, %v3188_v36 }
 0xcac   : > { %v3200_v40 = vadd.f32 %v3199_v39, %v3194_v38  ;;  %v3371_v43 = vpop.permute.xlu0 %3370 }
 0xcad   : > { %6235 = vmatmul.mubr.msk.f32.vlgmr.msra.gmra.mxu0 %vm1812_vm3, %v3371_v43 }
 0xcae   : > { %6244 = vmatprep.mubr.msk.f32.mxu0 %vm7240_vm2, %v7239_v14 }
 0xd63   : > { %v8264_v52 = vpop.f32.mrf.mxu0 }
 0xd65   : > { %v6216_v44 = vpop.f32.mrf.mxu0 }
 0xd67   : > { %v3275_v45 = vpop.f32.mrf.mxu0 }
 0xd68   : > { %v3276_v47 = vadd.f32 %v3275_v45, %v3200_v40 }
 0xd69   : > { %v6226_v55 = vpop.f32.mrf.mxu0 }
 0xd6a   : > { %v3279_v48 = vsel %vm8003_vm12, -1e+30, %v3276_v47 }
 0xd6b   : > { %v3280_v56 = vsel %vm2025_vm13, %v3279_v48, -inf }
 0xd6c   : > { %3281 = vmax.xlane.f32.xlu1 %v3280_v56 }
 0xd6d   : > { %v3440_v57 = vpop.f32.mrf.mxu0 }
 0xd6f   : > { %v6236_v61 = vpop.f32.mrf.mxu0 }
 0xd7d   : > { %3496 = vrot.lane.b32.xlu1 %v7971_v10, %s7252_s28 }
 0xd81   : > { %3446 = vperm.xlu1 %6566, %v3440_v57  }
 0xd85   : > { %6567 = vset.pattern.permute.xlu1 %v7245_v3 }
 0xd86   : > { %3452 = vperm.xlu1 %6567, %v3440_v57  }
 0xd8a   : > { %6568 = vset.pattern.permute.xlu1 %v7246_v4 }
 0xd8b   : > { %3458 = vperm.xlu1 %6568, %v3440_v57  }
 0xd8f   : > { %6570 = vset.pattern.permute.xlu1 %v7247_v5 }
 0xd90   : > { %3470 = vperm.xlu1 %6570, %v3440_v57  }
 0xd94   : > { %6571 = vset.pattern.permute.xlu1 %v7248_v6 }
 0xd95   : > { %3476 = vperm.xlu1 %6571, %v3440_v57  }
 0xd99   : > { %6573 = vset.pattern.permute.xlu1 %v7249_v8 }
 0xd9a   : > { %3488 = vperm.xlu1 %6573, %v3440_v57  }
 0xd9e   : > { %6574 = vset.pattern.permute.xlu1 %v7242_v51 }
 0xdf5   : > { %v3282_v62 = vpop.xlane.xlu1 %3281 }
 0xdf6   : > { %v3283_v63 = vsub.f32 %v3279_v48, %v3282_v62 }
 0xdf8   : > { %v3284_v54 = vmul.f32 1.442695, %v3283_v63 }
 0xdf9   : > { %v3497_v42 = vpop.permute.xlu1 %3496 }
 0xdfa   : > { %6611 = vpow2.f32 %v3284_v54 }
 0xdfd   : > { %v3447_v13 = vpop.permute.xlu1 %3446 }
 0xdfe   : > { %v3449_v28 = vsel %vm1889_vm5, %v3447_v13, 0.0 }
 0xe01   : > { %v3453_v15 = vpop.permute.xlu1 %3452 }
 0xe02   : > { %v3455_v17 = vsel %vm1897_vm4, %v3453_v15, 0.0 }
 0xe03   : > { %v3456_v25 = vadd.f32 %v3455_v17, %v3449_v28 }
 0xe06   : > { %v3459_v7 = vpop.permute.xlu1 %3458 }
 0xe07   : > { %v6612_v0 = vpop.eup %6611  ;;  %v3461_v24 = vsel %vm1904_vm6, %v3459_v7, 0.0 }
 0xe08   : > { %v3286_v1 = vsel %vm2025_vm13, %v6612_v0, 0.0  ;;  %v3462_v26 = vadd.f32 %v3461_v24, %v3456_v25 }
 0xe09   : > { %3287 = vadd.xlane.f32.xlu0 %v3286_v1 }
 0xe0b   : > { %v3471_v19 = vpop.permute.xlu1 %3470 }
 0xe0c   : > { %v3473_v35 = vsel %vm1918_vm8, %v3471_v19, 0.0 }
 0xe10   : > { %v3477_v34 = vpop.permute.xlu1 %3476 }
 0xe11   : > { %v3479_v37 = vsel %vm1925_vm9, %v3477_v34, 0.0 }
 0xe15   : > { %v3489_v44 = vpop.permute.xlu1 %3488 }
 0xe16   : > { %v3491_v47 = vsel %vm1939_vm11, %v3489_v44, 0.0 }
 0xe1f   : > { %3494 = vrot.lane.b32.xlu0 %v3366_v46, %s7251_s16 }
 0xe23   : > { %3464 = vperm.xlu0 %6569, %v3440_v57  }
 0xe27   : > { %6572 = vset.pattern.permute.xlu0 %v7244_v2 }
 0xe28   : > { %3482 = vperm.xlu0 %6572, %v3440_v57  }
 0xe2c   : > { %3671 = vrot.lane.b32.xlu0 %v3669_v12, %s7254_s17 }
 0xe2d   : > { %6575 = vset.pattern.permute.xlu0 %v7245_v3 }
 0xe92   : > { %v3288_v16 = vpop.xlane.xlu0 %3287 }
 0xe93   : > { %6613 = vrcp.f32 %v3288_v16 }
 0xe96   : > { %v3495_v21 = vpop.permute.xlu0 %3494 }
 0xe9e   : > { %v3465_v29 = vpop.permute.xlu0 %3464 }
 0xe9f   : > { %v3467_v30 = vsel %vm1911_vm7, %v3465_v29, 0.0 }
 0xea0   : > { %v6614_v32 = vpop.eup %6613  ;;  %v3468_v60 = vadd.f32 %v3467_v30, %v3462_v26 }
 0xea1   : > { %v3290_v49 = vmul.f32 %v6614_v32, %v6612_v0  ;;  %v3666_v0 = vadd.f32 %v8091_v20, %v7971_v10 }
 0xea2   : > { %v3474_v36 = vadd.f32 %v3473_v35, %v3468_v60 }
 0xea3   : > { %6230 = vmatmul.mubr.msk.f32.vlgmr.msra.gmra.mxu1 %vm2025_vm13, %v3290_v49  ;;  %v3483_v53 = vpop.permute.xlu0 %3482  ;;  %v3667_v1 = vmul.f32 0.25, %v3666_v0 }
 0xea4   : > { %6238 = vmatpush3.xpose.msk.msra.mxu1 %vm1812_vm3, %v3497_v42  ;;  %v3480_v38 = vadd.f32 %v3479_v37, %v3474_v36  ;;  %v3485_v39 = vsel %vm1932_vm10, %v3483_v53, 0.0  ;;  %6239 = vmatprep.mubr.msk.f32.mxu1 %vm7240_vm2, %v7239_v14  ;;  %v3968_v42 = vadd.f32 %v8137_v22, %v7971_v10 }
 0xea5   : > { %6247 = vmatprep.subr.mxu1 %v7239_v14 }
 0xea6   : > { %v3486_v40 = vadd.f32 %v3485_v39, %v3480_v38 }
 0xea7   : > { %6240 = vmatmul.mubr.msk.f32.vlgmr.msra.gmra.mxu1 %vm1812_vm3, %v3495_v21  ;;  %v3672_v43 = vpop.permute.xlu0 %3671 }
 0xea8   : > { %6248 = vmatpush3.xpose.msk.msra.mxu1 %vm1812_vm3, %v8058_v31  ;;  %6249 = vmatprep.mubr.msk.f32.mxu1 %vm7240_vm2, %v7239_v14  ;;  %v3492_v31 = vadd.f32 %v3491_v47, %v3486_v40 }
 0xea9   : > { %6257 = vmatprep.subr.mxu1 %v7239_v14 }
 0xeab   : > { %6250 = vmatmul.mubr.msk.f32.vlgmr.msra.gmra.mxu1 %vm1812_vm3, %v3672_v43 }
 0xeac   : > { %6259 = vmatprep.mubr.msk.f32.mxu1 %vm7240_vm2, %v7239_v14 }
 0xf63   : > { %v3360_v45 = vpop.f32.mrf.mxu1 }
 0xf64   : > { %3364 = vst.msk [vmem:[#allocation3 + $0x8] sm:$0xff] %vm1812_vm3, %v3360_v45 }
 0xf65   : > { %v6231_v55 = vpop.f32.mrf.mxu1 }
 0xf67   : > { %v3568_v48 = vpop.f32.mrf.mxu1 }
 0xf68   : > { %v3569_v56 = vadd.f32 %v3568_v48, %v3492_v31 }
 0xf69   : > { %v6241_v57 = vpop.f32.mrf.mxu1 }
 0xf6a   : > { %v3572_v61 = vsel %vm8003_vm12, -1e+30, %v3569_v56 }
 0xf6b   : > { %v3741_v62 = vpop.f32.mrf.mxu1  ;;  %v3573_v63 = vsel %vm2025_vm13, %v3572_v61, -inf }
 0xf6c   : > { %3574 = vmax.xlane.f32.xlu1 %v3573_v63 }
 0xf6d   : > { %v6251_v54 = vpop.f32.mrf.mxu1 }
 0xf6e   : > { %v3966_v54 = vadd.f32 %v8157_v59, %v7971_v10 }
 0xf70   : > { %v3967_v0 = vmul.f32 0.25, %v3966_v54  ;;  %v4269_v54 = vld [vmem:[%s7859_s25 + $0x8] sm:$0xff] }
 0xf7d   : > { %3797 = vrot.lane.b32.xlu1 %v7971_v10, %s7253_s7 }
 0xf81   : > { %3795 = vrot.lane.b32.xlu1 %v3667_v1, %s7254_s17 }
 0xf85   : > { %3747 = vperm.xlu1 %6574, %v3741_v62  }
 0xf89   : > { %6576 = vset.pattern.permute.xlu1 %v7246_v4 }
 0xf8a   : > { %3759 = vperm.xlu1 %6576, %v3741_v62  }
 0xf8e   : > { %6577 = vset.pattern.permute.xlu1 %v7241_v50 }
 0xf8f   : > { %3765 = vperm.xlu1 %6577, %v3741_v62  }
 0xf93   : > { %6579 = vset.pattern.permute.xlu1 %v7248_v6 }
 0xf94   : > { %3777 = vperm.xlu1 %6579, %v3741_v62  }
 0xf98   : > { %6580 = vset.pattern.permute.xlu1 %v7244_v2 }
 0xf99   : > { %3783 = vperm.xlu1 %6580, %v3741_v62  }
 0xf9d   : > { %6582 = vset.pattern.permute.xlu1 %v7242_v51  ;;  %v3969_v51 = vmul.f32 0.25, %v3968_v42 }
 0xff5   : > { %v3575_v20 = vpop.xlane.xlu1 %3574 }
 0xff6   : > { %v3576_v58 = vsub.f32 %v3572_v61, %v3575_v20 }
 0xff8   : > { %v3577_v46 = vmul.f32 1.442695, %v3576_v58 }
 0xff9   : > { %v3798_v13 = vpop.permute.xlu1 %3797 }
 0xffa   : > { %6615 = vpow2.f32 %v3577_v46 }
 0xffd   : > { %v3796_v15 = vpop.permute.xlu1 %3795 }
0x1001   : > { %v3748_v16 = vpop.permute.xlu1 %3747 }
0x1002   : > { %v3750_v28 = vsel %vm1889_vm5, %v3748_v16, 0.0 }
0x1005   : > { %v3760_v17 = vpop.permute.xlu1 %3759 }
0x1006   : > { %v3762_v29 = vsel %vm1904_vm6, %v3760_v17, 0.0 }
0x1007   : > { %v6616_v9 = vpop.eup %6615 }
0x1008   : > { %v3579_v12 = vsel %vm2025_vm13, %v6616_v9, 0.0 }
0x1009   : > { %3580 = vadd.xlane.f32.xlu0 %v3579_v12 }
0x100a   : > { %v3766_v21 = vpop.permute.xlu1 %3765 }
0x100b   : > { %v3768_v34 = vsel %vm1911_vm7, %v3766_v21, 0.0 }
0x101f   : > { %3585 = vrot.lane.b32.xlu0 %v7973_v11, %s7251_s16 }
0x1023   : > { %3753 = vperm.xlu0 %6575, %v3741_v62  }
0x1027   : > { %6578 = vset.pattern.permute.xlu0 %v7247_v5 }
0x1028   : > { %3771 = vperm.xlu0 %6578, %v3741_v62  }
0x102c   : > { %6581 = vset.pattern.permute.xlu0 %v7249_v8 }
0x102d   : > { %3789 = vperm.xlu0 %6581, %v3741_v62  }
0x1031   : > { %3971 = vrot.lane.b32.xlu0 %v3969_v51, %s7255_s18 }
0x1032   : > { %6584 = vset.pattern.permute.xlu0 %v7246_v4  ;;  %v3778_v4 = vpop.permute.xlu1 %3777 }
0x1033   : > { %v3780_v53 = vsel %vm1925_vm9, %v3778_v4, 0.0 }
0x1036   : > { %v3784_v36 = vpop.permute.xlu1 %3783 }
0x1037   : > { %v3786_v40 = vsel %vm1932_vm10, %v3784_v36, 0.0 }
0x1092   : > { %v3581_v7 = vpop.xlane.xlu0 %3580 }
0x1093   : > { %6617 = vrcp.f32 %v3581_v7 }
0x1096   : > { %v3586_v19 = vpop.permute.xlu0 %3585 }
0x1097   : > { %6243 = vmatpush3.msra.mxu0 %v3586_v19 }
0x1098   : > { %6252 = vmatprep.subr.mxu0 %v7239_v14 }
0x109e   : > { %v3754_v22 = vpop.permute.xlu0 %3753 }
0x109f   : > { %v3756_v24 = vsel %vm1897_vm4, %v3754_v22, 0.0 }
0x10a0   : > { %v6618_v25 = vpop.eup %6617  ;;  %v3757_v26 = vadd.f32 %v3756_v24, %v3750_v28 }
0x10a1   : > { %v3583_v30 = vmul.f32 %v6618_v25, %v6616_v9 }
0x10a2   : > { %v3763_v32 = vadd.f32 %v3762_v29, %v3757_v26 }
0x10a3   : > { %6245 = vmatmul.mubr.msk.f32.vlgmr.msra.gmra.mxu0 %vm2025_vm13, %v3583_v30  ;;  %v3772_v60 = vpop.permute.xlu0 %3771 }
0x10a4   : > { %v3769_v35 = vadd.f32 %v3768_v34, %v3763_v32  ;;  %v3774_v49 = vsel %vm1918_vm8, %v3772_v60, 0.0  ;;  %6253 = vmatpush3.xpose.msk.msra.mxu0 %vm1812_vm3, %v3798_v13  ;;  %6254 = vmatprep.mubr.msk.f32.mxu0 %vm7240_vm2, %v7239_v14 }
0x10a5   : > { %6262 = vmatprep.subr.mxu0 %v7239_v14 }
0x10a6   : > { %v3775_v37 = vadd.f32 %v3774_v49, %v3769_v35 }
0x10a7   : > { %6255 = vmatmul.mubr.msk.f32.vlgmr.msra.gmra.mxu0 %vm1812_vm3, %v3796_v15 }
0x10a8   : > { %v3781_v38 = vadd.f32 %v3780_v53, %v3775_v37  ;;  %6263 = vmatpush3.xpose.msk.msra.mxu0 %vm1812_vm3, %v8139_v23  ;;  %v3790_v39 = vpop.permute.xlu0 %3789  ;;  %6264 = vmatprep.mubr.msk.f32.mxu0 %vm7240_vm2, %v7239_v14 }
0x10a9   : > { %6272 = vmatprep.subr.mxu0 %v7239_v14  ;;  %v3792_v44 = vsel %vm1939_vm11, %v3790_v39, 0.0 }
0x10aa   : > { %v3787_v43 = vadd.f32 %v3786_v40, %v3781_v38 }
0x10ac   : > { %v3793_v45 = vadd.f32 %v3792_v44, %v3787_v43  ;;  %v3972_v47 = vpop.permute.xlu0 %3971 }
0x10ad   : > { %6265 = vmatmul.mubr.msk.f32.vlgmr.msra.gmra.mxu0 %vm1812_vm3, %v3972_v47 }
0x10ae   : > { %6274 = vmatprep.mubr.msk.f32.mxu0 %vm7240_vm2, %v7239_v14 }
0x1163   : > { %v8370_v23 = vpop.f32.mrf.mxu0 }
0x1165   : > { %v6246_v55 = vpop.f32.mrf.mxu0 }
0x1167   : > { %v3869_v31 = vpop.f32.mrf.mxu0 }
0x1168   : > { %v3870_v48 = vadd.f32 %v3869_v31, %v3793_v45 }
0x1169   : > { %v6256_v56 = vpop.f32.mrf.mxu0 }
0x116a   : > { %v3873_v57 = vsel %vm8003_vm12, -1e+30, %v3870_v48  ;;  %v4275_v48 = vld [vmem:[%s7859_s25 + $0x38] sm:$0xff]  ;;  %v4274_v56 = vld [vmem:[%s7859_s25 + $0x30] sm:$0xff] }
0x116b   : > { %v3874_v61 = vsel %vm2025_vm13, %v3873_v57, -inf }
0x116c   : > { %3875 = vmax.xlane.f32.xlu1 %v3874_v61  ;;  %v4272_v61 = vld [vmem:[%s7859_s25 + $0x20] sm:$0xff] }
0x116d   : > { %v4041_v62 = vpop.f32.mrf.mxu0 }
0x116f   : > { %v6266_v63 = vpop.f32.mrf.mxu0 }
0x1170   : > { %v4270_v63 = vld [vmem:[%s7859_s25 + $0x10] sm:$0xff] }
0x117d   : > { %3885 = vrot.lane.b32.xlu1 %v7973_v11, %s7254_s17 }
0x1181   : > { %4095 = vrot.lane.b32.xlu1 %v3967_v0, %s7255_s18  ;;  %v4268_v0 = vld [vmem:[%s7859_s25] sm:$0xff] }
0x1185   : > { %4047 = vperm.xlu1 %6582, %v4041_v62  }
0x1189   : > { %6583 = vset.pattern.permute.xlu1 %v7245_v3 }
0x118a   : > { %4053 = vperm.xlu1 %6583, %v4041_v62  }
0x118e   : > { %6585 = vset.pattern.permute.xlu1 %v7241_v50 }
0x118f   : > { %4065 = vperm.xlu1 %6585, %v4041_v62  }
0x1193   : > { %6586 = vset.pattern.permute.xlu1 %v7247_v5 }
0x1194   : > { %4071 = vperm.xlu1 %6586, %v4041_v62  }
0x1198   : > { %6588 = vset.pattern.permute.xlu1 %v7244_v2 }
0x1199   : > { %4083 = vperm.xlu1 %6588, %v4041_v62  }
0x119d   : > { %6589 = vset.pattern.permute.xlu1 %v7249_v8 }
0x119e   : > { %4089 = vperm.xlu1 %6589, %v4041_v62  }
0x11f5   : > { %v3876_v59 = vpop.xlane.xlu1 %3875 }
0x11f6   : > { %v3877_v1 = vsub.f32 %v3873_v57, %v3876_v59  ;;  %v4273_v57 = vld [vmem:[%s7859_s25 + $0x28] sm:$0xff]  ;;  %v4361_v59 = vld [vmem:[%s7862_s2 + $0x18] sm:$0xff] }
0x11f8   : > { %v3878_v20 = vmul.f32 1.442695, %v3877_v1  ;;  %v4360_v1 = vld [vmem:[%s7862_s2 + $0x10] sm:$0xff] }
0x11f9   : > { %v3886_v58 = vpop.permute.xlu1 %3885 }
0x11fa   : > { %6619 = vpow2.f32 %v3878_v20  ;;  %6258 = vmatpush3.msra.mxu1 %v3886_v58  ;;  %v4359_v20 = vld [vmem:[%s7862_s2 + $0x8] sm:$0xff] }
0x11fb   : > { %6267 = vmatprep.subr.mxu1 %v7239_v14 }
0x11fd   : > { %v4096_v12 = vpop.permute.xlu1 %4095 }
0x1207   : > { %v6620_v3 = vpop.eup %6619 }
0x1208   : > { %v3880_v50 = vsel %vm2025_vm13, %v6620_v3, 0.0 }
0x1209   : > { %3881 = vadd.xlane.f32.xlu0 %v3880_v50 }
0x121f   : > { %4097 = vrot.lane.b32.xlu0 %v7971_v10, %s7250_s8  ;;  %v4048_v10 = vpop.permute.xlu1 %4047 }
0x1220   : > { %v4050_v51 = vsel %vm1889_vm5, %v4048_v10, 0.0  ;;  %v4365_v10 = vld [vmem:[%s7865_s4 + $0x10] sm:$0xff] }
0x1223   : > { %4059 = vperm.xlu0 %6584, %v4041_v62  }
0x1227   : > { %6587 = vset.pattern.permute.xlu0 %v7248_v6  ;;  %v4054_v6 = vpop.permute.xlu1 %4053 }
0x1228   : > { %4077 = vperm.xlu0 %6587, %v4041_v62   ;;  %v4271_v62 = vld [vmem:[%s7859_s25 + $0x18] sm:$0xff]  ;;  %s8692_s25 = scalar_lea.vmem [#allocation11], %s7788_s26 }
0x122b   : > { %v4066_v16 = vpop.permute.xlu1 %4065 }
0x122c   : > { %6590 = vset.pattern.permute.xlu0 %v7249_v8  ;;  %v4056_v8 = vsel %vm1897_vm4, %v4054_v6, 0.0  ;;  %v4364_v6 = vld [vmem:[%s7865_s4 + $0x8] sm:$0xff] }
0x122d   : > { %v4057_v15 = vadd.f32 %v4056_v8, %v4050_v51  ;;  %v4363_v8 = vld [vmem:[%s7865_s4] sm:$0xff]  ;;  %v6672_v51 = vld [vmem:[#allocation2 + $0x8] sm:$0xff] }
0x122f   : > { %v4072_v17 = vpop.permute.xlu1 %4071 }
0x1230   : > { %v4074_v22 = vsel %vm1918_vm8, %v4072_v17, 0.0 }
0x1233   : > { %v4084_v25 = vpop.permute.xlu1 %4083 }
0x1234   : > { %v4086_v26 = vsel %vm1932_vm10, %v4084_v25, 0.0 }
0x1237   : > { %v4090_v29 = vpop.permute.xlu1 %4089 }
0x1238   : > { %v4092_v34 = vsel %vm1939_vm11, %v4090_v29, 0.0 }
0x1292   : > { %v3882_v2 = vpop.xlane.xlu0 %3881 }
0x1293   : > { %6621 = vrcp.f32 %v3882_v2 }
0x1296   : > { %v4098_v9 = vpop.permute.xlu0 %4097 }
0x129e   : > { %v4060_v42 = vpop.permute.xlu0 %4059 }
0x129f   : > { %v4062_v13 = vsel %vm1904_vm6, %v4060_v42, 0.0  ;;  %v6671_v42 = vld [vmem:[#allocation2] sm:$0xff] }
0x12a0   : > { %v6622_v5 = vpop.eup %6621  ;;  %v4063_v7 = vadd.f32 %v4062_v13, %v4057_v15  ;;  %v4371_v13 = vld [vmem:[%s7868_s5 + $0x18] sm:$0xff]  ;;  %v4370_v15 = vld [vmem:[%s7868_s5 + $0x10] sm:$0xff] }
0x12a1   : > { %v3884_v46 = vmul.f32 %v6622_v5, %v6620_v3  ;;  %v4358_v5 = vld [vmem:[%s7862_s2] sm:$0xff]  ;;  %s8694_s2 = scalar_lea.vmem [#allocation15], %s7788_s26 }
0x12a3   : > { %6260 = vmatmul.mubr.msk.f32.vlgmr.msra.gmra.mxu1 %vm2025_vm13, %v3884_v46  ;;  %v4078_v21 = vpop.permute.xlu0 %4077  ;;  %v4366_v46 = vld [vmem:[%s7865_s4 + $0x18] sm:$0xff]  ;;  %s8691_s4 = scalar_lea.vmem [#allocation9], %s7788_s26 }
0x12a4   : > { %6268 = vmatpush3.xpose.msk.msra.mxu1 %vm1812_vm3, %v4098_v9  ;;  %6269 = vmatprep.mubr.msk.f32.mxu1 %vm7240_vm2, %v7239_v14  ;;  %v4068_v14 = vsel %vm1911_vm7, %v4066_v16, 0.0  ;;  %v4080_v24 = vsel %vm1925_vm9, %v4078_v21, 0.0  ;;  %vm4276_vm2 = vcmask 523264   ;;  %v4369_v16 = vld [vmem:[%s7868_s5 + $0x8] sm:$0xff]  ;;  %v5970_v17 = vld [vmem:[%s8691_s4] ss:$0 sm:$0xff] }
0x12a5   : > { %v4069_v19 = vadd.f32 %v4068_v14, %v4063_v7  ;;  %6277 = vmatprep.subr.mxu1 %v4275_v48  ;;  %v4368_v7 = vld [vmem:[%s7868_s5] sm:$0xff]  ;;  %s8693_s5 = scalar_lea.vmem [#allocation12], %s7788_s26 }
0x12a6   : > { %v5973_v21 = vld [vmem:[%s8692_s25] ss:$0 sm:$0xff] }
0x12a7   : > { %6270 = vmatmul.mubr.msk.f32.vlgmr.msra.gmra.mxu1 %vm1812_vm3, %v4096_v12  ;;  %v4075_v28 = vadd.f32 %v4074_v22, %v4069_v19 }
0x12a8   : > { %6278 = vmatpush3.msra.mxu1 %v4275_v48 }
0x12a9   : > { %v4081_v4 = vadd.f32 %v4080_v24, %v4075_v28  ;;  %6279 = vmatprep.subr.mxu1 %v4274_v56 }
0x12aa   : > { %6280 = vmatpush3.msra.mxu1 %v4274_v56 }
0x12ab   : > { %v4087_v30 = vadd.f32 %v4086_v26, %v4081_v4  ;;  %6281 = vmatprep.subr.mxu1 %v4273_v57 }
0x12ac   : > { %6282 = vmatpush3.msra.mxu1 %v4273_v57 }
0x12ad   : > { %v4093_v35 = vadd.f32 %v4092_v34, %v4087_v30  ;;  %6283 = vmatprep.subr.mxu1 %v4272_v61 }
0x12ae   : > { %6284 = vmatpush3.msra.mxu1 %v4272_v61 }
0x12af   : > { %6285 = vmatprep.subr.mxu1 %v4271_v62 }
0x12b0   : > { %6286 = vmatpush3.msra.mxu1 %v4271_v62 }
0x12b1   : > { %6287 = vmatprep.subr.mxu1 %v4270_v63 }
0x12b2   : > { %6288 = vmatpush3.msra.mxu1 %v4270_v63 }
0x12b3   : > { %6289 = vmatprep.subr.mxu1 %v4269_v54 }
0x12b4   : > { %6290 = vmatpush3.msra.mxu1 %v4269_v54 }
0x12b5   : > { %6291 = vmatprep.subr.mxu1 %v4268_v0 }
0x12b6   : > { %6292 = vmatpush3.msra.mxu1 %v4268_v0 }
0x12b7   : > { %6318 = vmatprep.subr.mxu1 %v4371_v13 }
0x1363   : > { %v3957_v32 = vpop.f32.mrf.mxu1 }
0x1365   : > { %v6261_v60 = vpop.f32.mrf.mxu1 }
0x1367   : > { %v4169_v49 = vpop.f32.mrf.mxu1 }
0x1368   : > { %v4170_v36 = vadd.f32 %v4169_v49, %v4093_v35 }
0x1369   : > { %v6271_v37 = vpop.f32.mrf.mxu1 }
0x136a   : > { %v4173_v53 = vsel %vm8003_vm12, -1e+30, %v4170_v36 }
0x136b   : > { %v4174_v38 = vsel %vm2025_vm13, %v4173_v53, -inf }
0x136c   : > { %4175 = vmax.xlane.f32.xlu0 %v4174_v38 }
0x1382   : > { %4185 = vrot.lane.b32.xlu0 %v7973_v11, %s7255_s18 }
0x1386   : > { %2749 = vrot.lane.b32.xlu0 %v8210_v33, %s7253_s7 }
0x138a   : > { %3070 = vrot.lane.b32.xlu0 %v8264_v52, %s7252_s28 }
0x13f5   : > { %v4176_v18 = vpop.xlane.xlu0 %4175 }
0x13f6   : > { %v4177_v39 = vsub.f32 %v4173_v53, %v4176_v18 }
0x13f8   : > { %v4178_v40 = vmul.f32 1.442695, %v4177_v39 }
0x13f9   : > { %v4186_v43 = vpop.permute.xlu0 %4185 }
0x13fa   : > { %6623 = vpow2.f32 %v4178_v40  ;;  %6273 = vmatpush3.msra.mxu0 %v4186_v43  ;;  %v5984_v43 = vld [vmem:[%s8693_s5] ss:$0 sm:$0xff] }
0x13fb   : > { %6296 = vmatprep.subr.mxu0 %v4361_v59 }
0x13fd   : > { %v2750_v11 = vpop.permute.xlu0 %2749 }
0x1401   : > { %v3071_v45 = vpop.permute.xlu0 %3070 }
0x1407   : > { %v6624_v41 = vpop.eup %6623 }
0x1408   : > { %v4180_v44 = vsel %vm2025_vm13, %v6624_v41, 0.0 }
0x1409   : > { %4181 = vadd.xlane.f32.xlu1 %v4180_v44 }
0x141a   : > { %2428 = vrot.lane.b32.xlu1 %v8149_v27, %s7250_s8 }
0x141e   : > { %3662 = vrot.lane.b32.xlu1 %v8370_v23, %s7250_s8 }
0x1422   : > { %3962 = vrot.lane.b32.xlu1 %v3957_v32, %s7253_s7 }
0x1492   : > { %v4182_v33 = vpop.xlane.xlu1 %4181 }
0x1493   : > { %6625 = vrcp.f32 %v4182_v33 }
0x1496   : > { %v2429_v52 = vpop.permute.xlu1 %2428 }
0x1497   : > { %2432 = vst.msk [vmem:[#allocation3] sm:$0xff] %vm2431_vm14, %v2429_v52 }
0x1498   : > { %2753 = vst.msk [vmem:[#allocation3] sm:$0xff] %vm2752_vm15, %v2750_v11 }
0x1499   : > { %3074 = vst.msk [vmem:[#allocation3] sm:$0xff] %vm3073_vm0, %v3071_v45 }
0x149a   : > { %v3663_v27 = vpop.permute.xlu1 %3662 }
0x149b   : > { %3665 = vst.msk [vmem:[#allocation3 + $0x8] sm:$0xff] %vm2431_vm14, %v3663_v27 }
0x149e   : > { %v3963_v47 = vpop.permute.xlu1 %3962 }
0x149f   : > { %3965 = vst.msk [vmem:[#allocation3 + $0x8] sm:$0xff] %vm2752_vm15, %v3963_v47 }
0x14a0   : > { %v6626_v23 = vpop.eup %6625  ;;  %v4266_v55 = vld [vmem:[#allocation3] sm:$0xff] }
0x14a1   : > { %6293 = vmatprep.mubr.msk.f32.mxu1 %vm4276_vm2, %v4266_v55  ;;  %v4184_v31 = vmul.f32 %v6626_v23, %v6624_v41 }
0x14a3   : > { %6275 = vmatmul.mubr.msk.f32.vlgmr.msra.gmra.mxu0 %vm2025_vm13, %v4184_v31 }
0x14a4   : > { %6297 = vmatpush3.msra.mxu0 %v4361_v59 }
0x14a5   : > { %6298 = vmatprep.subr.mxu0 %v4360_v1 }
0x14a6   : > { %6299 = vmatpush3.msra.mxu0 %v4360_v1 }
0x14a7   : > { %6300 = vmatprep.subr.mxu0 %v4359_v20 }
0x14a8   : > { %6301 = vmatpush3.msra.mxu0 %v4359_v20 }
0x14a9   : > { %6302 = vmatprep.subr.mxu0 %v4358_v5 }
0x14aa   : > { %6303 = vmatpush3.msra.mxu0 %v4358_v5 }
0x14ab   : > { %6307 = vmatprep.subr.mxu0 %v4366_v46 }
0x1563   : > { %v4257_v58 = vpop.f32.mrf.mxu0 }
0x1564   : > { %4262 = vrot.lane.b32.xlu0 %v4257_v58, %s7252_s28 }
0x1565   : > { %v6276_v3 = vpop.f32.mrf.mxu0 }
0x15d6   : > { %v4263_v50 = vpop.permute.xlu0 %4262 }
0x15d7   : > { %4265 = vst.msk [vmem:[#allocation3 + $0x8] sm:$0xff] %vm3073_vm0, %v4263_v50 }
0x15de   : > { %v4267_v2 = vld [vmem:[#allocation3 + $0x8] sm:$0xff] }
0x15df   : > { %6294 = vmatmul.mubr.msk.f32.vlgmr.msra.gmra.mxu1 %vm4276_vm2, %v4267_v2 }
0x15e0   : > { %6319 = vmatpush3.msra.mxu1 %v4371_v13 }
0x15e1   : > { %6320 = vmatprep.subr.mxu1 %v4370_v15 }
0x15e2   : > { %6321 = vmatpush3.msra.mxu1 %v4370_v15 }
0x15e3   : > { %6322 = vmatprep.subr.mxu1 %v4369_v16 }
0x15e4   : > { %6323 = vmatpush3.msra.mxu1 %v4369_v16 }
0x15e5   : > { %6324 = vmatprep.subr.mxu1 %v4368_v7 }
0x15e6   : > { %6325 = vmatpush3.msra.mxu1 %v4368_v7 }
0x169f   : > { %v6295_v9 = vpop.f32.mrf.mxu1 }
0x16a1   : > { %v4349_v12 = vpop.f32.mrf.mxu1 }
0x16a2   : > { %6304 = vmatprep.mubr.msk.f32.mxu0 %vm1578_vm1, %v4349_v12 }
0x16a3   : > { %6305 = vmatmul.mubr.msk.f32.vlgmr.msra.gmra.mxu0 %vm1578_vm1, %v6295_v9 }
0x16a4   : > { %6308 = vmatpush3.msra.mxu0 %v4366_v46  ;;  %6315 = vmatprep.mubr.msk.f32.mxu0 %vm1578_vm1, %v6671_v42 }
0x16a5   : > { %6309 = vmatprep.subr.mxu0 %v4365_v10 }
0x16a6   : > { %6310 = vmatpush3.msra.mxu0 %v4365_v10 }
0x16a7   : > { %6311 = vmatprep.subr.mxu0 %v4364_v6 }
0x16a8   : > { %6312 = vmatpush3.msra.mxu0 %v4364_v6 }
0x16a9   : > { %6313 = vmatprep.subr.mxu0 %v4363_v8 }
0x16aa   : > { %6314 = vmatpush3.msra.mxu0 %v4363_v8 }
0x16ab   : > { %6316 = vmatmul.mubr.msk.f32.vlgmr.msra.gmra.mxu0 %vm1578_vm1, %v6672_v51 }
0x1763   : > { %v6306_v14 = vpop.f32.mrf.mxu0 }
0x1764   : > { %v4457_v28 = vadd.f32 %v6306_v14, %v5970_v17 }
0x1765   : > { %v4451_v19 = vpop.f32.mrf.mxu0 }
0x1766   : > { %v4452_v4 = vadd.f32 %v5970_v17, %v4451_v19 }
0x176b   : > { %v6317_v22 = vpop.f32.mrf.mxu0 }
0x176c   : > { %v4544_v24 = vadd.f32 %v6317_v22, %v5973_v21 }
0x176d   : > { %v4538_v25 = vpop.f32.mrf.mxu0 }
0x176e   : > { %v4548_v26 = vadd.f32 %v4544_v24, %v4457_v28  ;;  %v4539_v29 = vadd.f32 %v5973_v21, %v4538_v25 }
0x1770   : > { %v5977_v30 = vmul.f32 -1.442695, %v4548_v26  ;;  %v4547_v32 = vadd.f32 %v4539_v29, %v4452_v4  ;;  %v5979_v31 = vadd.f32 -0.1, %v4548_v26  ;;  %v5985_v26 = vld [vmem:[%s8695_s1] ss:$0 sm:$0xff] }
0x1771   : > { %v4769_v29 = vld [vmem:[%s7818_s22 + $0x18] sm:$0xff] }
0x1772   : > { %6627 = vpow2.f32 %v5977_v30  ;;  %v5976_v34 = vmul.f32 -1.442695, %v4547_v32  ;;  %v5978_v55 = vadd.f32 -0.1, %v4547_v32  ;;  %v5981_v56 = vmul.f32 -1.442695, %v5979_v31  ;;  %6329 = vmatprep.subr.mxu0 %v4769_v29 }
0x1773   : > { %v4768_v30 = vld [vmem:[%s7818_s22 + $0x10] sm:$0xff]  ;;  %6330 = vmatpush3.msra.mxu0 %v4769_v29 }
0x1774   : > { %6629 = vpow2.f32 %v5976_v34  ;;  %v5980_v48 = vmul.f32 -1.442695, %v5978_v55  ;;  %6331 = vmatprep.subr.mxu0 %v4768_v30 }
0x1775   : > { %6332 = vmatpush3.msra.mxu0 %v4768_v30 }
0x177f   : > { %v6628_v60 = vpop.eup %6627 }
0x1780   : > { %v4556_v35 = vadd.f32 1.0, %v6628_v60 }
0x1781   : > { %v6630_v49 = vpop.eup %6629 }
0x1782   : > { %v4555_v36 = vadd.f32 1.0, %v6630_v49  ;;  %6631 = vrcp.f32 %v4556_v35 }
0x1784   : > { %6633 = vrcp.f32 %v4555_v36 }
0x178f   : > { %v6632_v37 = vpop.eup %6631 }
0x1790   : > { %v4576_v18 = vmul.f32 %v6672_v51, %v6632_v37  ;;  %v4767_v37 = vld [vmem:[%s7818_s22 + $0x8] sm:$0xff] }
0x1791   : > { %v6634_v53 = vpop.eup %6633  ;;  %6333 = vmatprep.subr.mxu0 %v4767_v37 }
0x1792   : > { %v4575_v38 = vmul.f32 %v6671_v42, %v6634_v53  ;;  %v4766_v53 = vld [vmem:[%s7818_s22] sm:$0xff]  ;;  %6334 = vmatpush3.msra.mxu0 %v4767_v37  ;;  %s8696_s22 = scalar_lea.vmem [#allocation18], %s7788_s26 }
0x1793   : > { %6335 = vmatprep.subr.mxu0 %v4766_v53 }
0x1794   : > { %6326 = vmatprep.mubr.msk.f32.mxu1 %vm1578_vm1, %v4575_v38  ;;  %6336 = vmatpush3.msra.mxu0 %v4766_v53  ;;  %v4871_v38 = vld [vmem:[%s7871_s6 + $0x38] sm:$0xff] }
0x1795   : > { %6327 = vmatmul.mubr.msk.f32.vlgmr.msra.gmra.mxu1 %vm1578_vm1, %v4576_v18  ;;  %v4870_v18 = vld [vmem:[%s7871_s6 + $0x30] sm:$0xff]  ;;  %6340 = vmatprep.subr.mxu1 %v4871_v38 }
0x1796   : > { %6341 = vmatpush3.msra.mxu1 %v4871_v38 }
0x1797   : > { %6342 = vmatprep.subr.mxu1 %v4870_v18 }
0x1798   : > { %6343 = vmatpush3.msra.mxu1 %v4870_v18 }
0x1855   : > { %v6328_v39 = vpop.f32.mrf.mxu1 }
0x1856   : > { %4662 = vrot.lane.b32.xlu0 %v6328_v39, %s7243_s10 }
0x1857   : > { %v4649_v40 = vpop.f32.mrf.mxu1 }
0x1858   : > { %4660 = vrot.lane.b32.xlu1 %v4649_v40, %s7243_s10 }
0x185a   : > { %4682 = vrot.lane.b32.xlu0 %v6671_v42, %s7253_s7 }
0x185c   : > { %4673 = vrot.lane.b32.xlu1 %v5984_v43, %s7243_s10  ;;  %v4869_v43 = vld [vmem:[%s7871_s6 + $0x28] sm:$0xff] }
0x185d   : > { %6344 = vmatprep.subr.mxu1 %v4869_v43 }
0x185e   : > { %4684 = vrot.lane.b32.xlu0 %v6672_v51, %s7253_s7  ;;  %6345 = vmatpush3.msra.mxu1 %v4869_v43 }
0x18c8   : > { %v4663_v44 = vpop.permute.xlu0 %4662 }
0x18c9   : > { %v4667_v52 = vadd.f32 %v4663_v44, %v4457_v28 }
0x18ca   : > { %v4661_v41 = vpop.permute.xlu1 %4660 }
0x18cb   : > { %v4666_v11 = vadd.f32 %v4661_v41, %v4452_v4  ;;  %v5986_v4 = vld [vmem:[%s8694_s2] ss:$0 sm:$0xff] }
0x18cc   : > { %v4683_v0 = vpop.permute.xlu0 %4682 }
0x18ce   : > { %v4674_v33 = vpop.permute.xlu1 %4673 }
0x18cf   : > { %v4676_v45 = vadd.f32 %v4674_v33, %v4666_v11  ;;  %v4677_v27 = vadd.f32 %v4674_v33, %v4667_v52  ;;  %v4868_v11 = vld [vmem:[%s7871_s6 + $0x20] sm:$0xff] }
0x18d0   : > { %v4685_v50 = vpop.permute.xlu0 %4684  ;;  %6346 = vmatprep.subr.mxu1 %v4868_v11 }
0x18d1   : > { %6635 = vtanh.f32 %v4676_v45  ;;  %6347 = vmatpush3.msra.mxu1 %v4868_v11 }
0x18d2   : > { %6637 = vtanh.f32 %v4677_v27 }
0x18d3   : > { %6639 = vpow2.f32 %v5980_v48  ;;  %v4867_v48 = vld [vmem:[%s7871_s6 + $0x18] sm:$0xff] }
0x18d4   : > { %6641 = vpow2.f32 %v5981_v56  ;;  %6348 = vmatprep.subr.mxu1 %v4867_v48  ;;  %v4866_v56 = vld [vmem:[%s7871_s6 + $0x10] sm:$0xff] }
0x18d5   : > { %6349 = vmatpush3.msra.mxu1 %v4867_v48 }
0x18d6   : > { %6350 = vmatprep.subr.mxu1 %v4866_v56 }
0x18d7   : > { %6351 = vmatpush3.msra.mxu1 %v4866_v56 }
0x18de   : > { %v6636_v47 = vpop.eup %6635 }
0x18df   : > { %4692 = vrot.lane.b32.xlu1 %v6636_v47, %s7254_s17  ;;  %v6638_v23 = vpop.eup %6637 }
0x18e0   : > { %v6640_v57 = vpop.eup %6639 }
0x18e1   : > { %v4569_v61 = vadd.f32 1.0, %v6640_v57  ;;  %v6642_v62 = vpop.eup %6641  ;;  %v4865_v57 = vld [vmem:[%s7871_s6 + $0x8] sm:$0xff] }
0x18e2   : > { %v4570_v63 = vadd.f32 1.0, %v6642_v62  ;;  %6352 = vmatprep.subr.mxu1 %v4865_v57  ;;  %v4963_v62 = vld [vmem:[%s7828_s0 + $0x18] sm:$0xff] }
0x18e3   : > { %4694 = vrot.lane.b32.xlu1 %v6638_v23, %s7254_s17  ;;  %6643 = vrcp.f32 %v4569_v61  ;;  %v4864_v61 = vld [vmem:[%s7871_s6] sm:$0xff]  ;;  %6353 = vmatpush3.msra.mxu1 %v4865_v57  ;;  %s8697_s6 = scalar_lea.vmem [#allocation20], %s7788_s26 }
0x18e4   : > { %6645 = vrcp.f32 %v4570_v63  ;;  %6354 = vmatprep.subr.mxu1 %v4864_v61  ;;  %v4962_v63 = vld [vmem:[%s7828_s0 + $0x10] sm:$0xff]  ;;  %6359 = vmatprep.subr.mxu0 %v4963_v62 }
0x18e5   : > { %6355 = vmatpush3.msra.mxu1 %v4864_v61 }
0x18f0   : > { %v6644_v54 = vpop.eup %6643 }
0x18f1   : > { %v4680_v59 = vsub.f32 1.0, %v6644_v54  ;;  %v6646_v1 = vpop.eup %6645 }
0x18f2   : > { %v4681_v2 = vsub.f32 1.0, %v6646_v1 }
0x18f3   : > { %v4688_v58 = vmul.f32 %v4683_v0, %v4680_v59 }
0x18f4   : > { %v4689_v9 = vmul.f32 %v4685_v50, %v4681_v2  ;;  %v4961_v50 = vld [vmem:[%s7828_s0 + $0x8] sm:$0xff]  ;;  %v4960_v2 = vld [vmem:[%s7828_s0] sm:$0xff]  ;;  %s8699_s0 = scalar_lea.vmem [#allocation26], %s7788_s26 }
0x1951   : > { %v4693_v20 = vpop.permute.xlu1 %4692 }
0x1952   : > { %v4698_v3 = vmul.f32 %v6644_v54, %v4693_v20  ;;  %v5987_v54 = vld [vmem:[%s8696_s22] ss:$0 sm:$0xff] }
0x1954   : > { %v8472_v5 = vadd.f32 %v4698_v3, %v4688_v58 }
0x1955   : > { %v4695_v46 = vpop.permute.xlu1 %4694 }
0x1956   : > { %v4699_v12 = vmul.f32 %v6646_v1, %v4695_v46  ;;  %4706 = vrot.lane.b32.xlu0 %v8472_v5, %s7254_s17  ;;  %v4968_v46 = vld [vmem:[%s7836_s27 + $0x18] sm:$0xff] }
0x1958   : > { %v8476_v10 = vadd.f32 %v4699_v12, %v4689_v9  ;;  %v5990_v12 = vld [vmem:[%s8697_s6] ss:$0 sm:$0xff] }
0x195a   : > { %4708 = vrot.lane.b32.xlu1 %v8476_v10, %s7254_s17 }
0x19c8   : > { %v8480_v6 = vpop.permute.xlu0 %4706 }
0x19c9   : > { %v4712_v42 = vsel %vm1578_vm1, %v8480_v6, 0.0 }
0x19ca   : > { %4713 = vadd.xlane.f32.xlu0 %v4712_v42 }
0x19cc   : > { %v8484_v8 = vpop.permute.xlu1 %4708 }
0x19cd   : > { %v4715_v51 = vsel %vm1578_vm1, %v8484_v8, 0.0 }
0x19ce   : > { %4716 = vadd.xlane.f32.xlu1 %v4715_v51 }
0x1a53   : > { %v4714_v13 = vpop.xlane.xlu0 %4713 }
0x1a54   : > { %v4718_v15 = vmul.f32 0.03125, %v4714_v13 }
0x1a56   : > { %v4720_v16 = vsub.f32 %v8472_v5, %v4718_v15  ;;  %v4967_v15 = vld [vmem:[%s7836_s27 + $0x10] sm:$0xff] }
0x1a57   : > { %v4717_v7 = vpop.xlane.xlu1 %4716 }
0x1a58   : > { %v4722_v14 = vmul.f32 %v4720_v16, %v4720_v16  ;;  %v4719_v17 = vmul.f32 0.03125, %v4717_v7  ;;  %v4965_v7 = vld [vmem:[%s7836_s27] sm:$0xff] }
0x1a5a   : > { %v4721_v19 = vsub.f32 %v8476_v10, %v4719_v17  ;;  %4726 = vrot.lane.b32.xlu0 %v4722_v14, %s7254_s17  ;;  %v4973_v14 = vld [vmem:[%s7844_s23 + $0x18] sm:$0xff]  ;;  %v4972_v17 = vld [vmem:[%s7844_s23 + $0x10] sm:$0xff] }
0x1a5b   : > { %6381 = vmatprep.subr.mxu1 %v4973_v14 }
0x1a5c   : > { %v4723_v21 = vmul.f32 %v4721_v19, %v4721_v19 }
0x1a5e   : > { %4728 = vrot.lane.b32.xlu1 %v4723_v21, %s7254_s17  ;;  %v4970_v21 = vld [vmem:[%s7844_s23] sm:$0xff] }
0x1acc   : > { %v4727_v22 = vpop.permute.xlu0 %4726 }
0x1acd   : > { %v4732_v28 = vsel %vm1578_vm1, %v4727_v22, 0.0 }
0x1ace   : > { %4733 = vadd.xlane.f32.xlu0 %v4732_v28 }
0x1ad0   : > { %v4729_v24 = vpop.permute.xlu1 %4728 }
0x1ad1   : > { %v4735_v25 = vsel %vm1578_vm1, %v4729_v24, 0.0 }
0x1ad2   : > { %4736 = vadd.xlane.f32.xlu1 %v4735_v25  ;;  %v5996_v25 = vld [vmem:[%s8699_s0] ss:$0 sm:$0xff] }
0x1ae3   : > { %4761 = vrot.lane.b32.xlu1 %v5986_v4, %s7253_s7 }
0x1ae4   : > { %4751 = vrot.lane.b32.xlu0 %v5985_v26, %s7253_s7 }
0x1b57   : > { %v4734_v32 = vpop.xlane.xlu0 %4733 }
0x1b58   : > { %v4738_v34 = vmul.f32 0.03125, %v4734_v32 }
0x1b5a   : > { %v4740_v60 = vadd.f32 1e-05, %v4738_v34 }
0x1b5b   : > { %v4737_v35 = vpop.xlane.xlu1 %4736  ;;  %v4752_v40 = vpop.permute.xlu0 %4751 }
0x1b5c   : > { %6647 = vrsqrt.f32 %v4740_v60  ;;  %v4739_v49 = vmul.f32 0.03125, %v4737_v35 }
0x1b5e   : > { %v4741_v36 = vadd.f32 1e-05, %v4739_v49 }
0x1b5f   : > { %v4762_v44 = vpop.permute.xlu1 %4761 }
0x1b60   : > { %6649 = vrsqrt.f32 %v4741_v36 }
0x1b69   : > { %v6648_v39 = vpop.eup %6647 }
0x1b6a   : > { %v4744_v41 = vmul.f32 %v6648_v39, %v4720_v16  ;;  %v4966_v16 = vld [vmem:[%s7836_s27 + $0x8] sm:$0xff]  ;;  %s8698_s27 = scalar_lea.vmem [#allocation23], %s7788_s26 }
0x1b6b   : > { %v5993_v28 = vld [vmem:[%s8698_s27] ss:$0 sm:$0xff] }
0x1b6c   : > { %v4754_v33 = vmul.f32 %v4752_v40, %v4744_v41 }
0x1b6d   : > { %v6650_v52 = vpop.eup %6649 }
0x1b6e   : > { %v4745_v45 = vmul.f32 %v6650_v52, %v4721_v19  ;;  %v4764_v27 = vadd.f32 %v4762_v44, %v4754_v33  ;;  %v4971_v19 = vld [vmem:[%s7844_s23 + $0x8] sm:$0xff] }
0x1b6f   : > { %v6007_v33 = vld [vmem:[%s1362_s9] ss:$0 sm:$0xff]  ;;  %s8700_s9 = sld [smem:[#allocation43_spill]] (!%p6008_p7) }
0x1b70   : > { %v4755_v47 = vmul.f32 %v4752_v40, %v4745_v45  ;;  %4779 = vrot.lane.b32.xlu0 %v4764_v27, %s7254_s17 }
0x1b72   : > { %v4765_v23 = vadd.f32 %v4762_v44, %v4755_v47 }
0x1b74   : > { %4781 = vrot.lane.b32.xlu1 %v4765_v23, %s7254_s17 }
0x1be2   : > { %v4780_v55 = vpop.permute.xlu0 %4779 }
0x1be3   : > { %6337 = vmatprep.mubr.msk.f32.mxu0 %vm1578_vm1, %v4780_v55 }
0x1be6   : > { %v4782_v31 = vpop.permute.xlu1 %4781 }
0x1be7   : > { %6338 = vmatmul.mubr.msk.f32.vlgmr.msra.gmra.mxu0 %vm1578_vm1, %v4782_v31 }
0x1be8   : > { %6360 = vmatpush3.msra.mxu0 %v4963_v62 }
0x1be9   : > { %6361 = vmatprep.subr.mxu0 %v4962_v63 }
0x1bea   : > { %6362 = vmatpush3.msra.mxu0 %v4962_v63 }
0x1beb   : > { %6363 = vmatprep.subr.mxu0 %v4961_v50 }
0x1bec   : > { %6364 = vmatpush3.msra.mxu0 %v4961_v50 }
0x1bed   : > { %6365 = vmatprep.subr.mxu0 %v4960_v2 }
0x1bee   : > { %6366 = vmatpush3.msra.mxu0 %v4960_v2 }
0x1bef   : > { %6370 = vmatprep.subr.mxu0 %v4968_v46 }
0x1ca7   : > { %v6339_v0 = vpop.f32.mrf.mxu0 }
0x1ca8   : > { %v4859_v59 = vadd.f32 %v6339_v0, %v5987_v54 }
0x1ca9   : > { %v4853_v1 = vpop.f32.mrf.mxu0 }
0x1caa   : > { %v4854_v20 = vadd.f32 %v5987_v54, %v4853_v1  ;;  %v4863_v3 = vmax.f32 %v4859_v59, 0.0 }
0x1cac   : > { %v4862_v58 = vmax.f32 %v4854_v20, 0.0 }
0x1cae   : > { %6356 = vmatprep.mubr.msk.f32.mxu1 %vm4276_vm2, %v4862_v58 }
0x1caf   : > { %6357 = vmatmul.mubr.msk.f32.vlgmr.msra.gmra.mxu1 %vm4276_vm2, %v4863_v3 }
0x1cb0   : > { %6382 = vmatpush3.msra.mxu1 %v4973_v14 }
0x1cb1   : > { %6383 = vmatprep.subr.mxu1 %v4972_v17 }
0x1cb2   : > { %6384 = vmatpush3.msra.mxu1 %v4972_v17 }
0x1cb3   : > { %6385 = vmatprep.subr.mxu1 %v4971_v19 }
0x1cb4   : > { %6386 = vmatpush3.msra.mxu1 %v4971_v19 }
0x1cb5   : > { %6387 = vmatprep.subr.mxu1 %v4970_v21 }
0x1cb6   : > { %6388 = vmatpush3.msra.mxu1 %v4970_v21 }
0x1d6f   : > { %v6358_v9 = vpop.f32.mrf.mxu1 }
0x1d70   : > { %v4957_v13 = vadd.f32 %v6358_v9, %v5990_v12 }
0x1d71   : > { %v4951_v42 = vpop.f32.mrf.mxu1 }
0x1d72   : > { %v4952_v51 = vadd.f32 %v5990_v12, %v4951_v42 }
0x1d74   : > { %6367 = vmatprep.mubr.msk.f32.mxu0 %vm1578_vm1, %v4952_v51 }
0x1d75   : > { %6368 = vmatmul.mubr.msk.f32.vlgmr.msra.gmra.mxu0 %vm1578_vm1, %v4957_v13 }
0x1d76   : > { %6371 = vmatpush3.msra.mxu0 %v4968_v46  ;;  %6378 = vmatprep.mubr.msk.f32.mxu0 %vm1578_vm1, %v8480_v6 }
0x1d77   : > { %6372 = vmatprep.subr.mxu0 %v4967_v15 }
0x1d78   : > { %6373 = vmatpush3.msra.mxu0 %v4967_v15 }
0x1d79   : > { %6374 = vmatprep.subr.mxu0 %v4966_v16 }
0x1d7a   : > { %6375 = vmatpush3.msra.mxu0 %v4966_v16 }
0x1d7b   : > { %6376 = vmatprep.subr.mxu0 %v4965_v7 }
0x1d7c   : > { %6377 = vmatpush3.msra.mxu0 %v4965_v7 }
0x1d7d   : > { %6379 = vmatmul.mubr.msk.f32.vlgmr.msra.gmra.mxu0 %vm1578_vm1, %v8484_v8 }
0x1e35   : > { %v6369_v22 = vpop.f32.mrf.mxu0 }
0x1e36   : > { %v5059_v26 = vadd.f32 %v6369_v22, %v5993_v28 }
0x1e37   : > { %v5053_v24 = vpop.f32.mrf.mxu0 }
0x1e38   : > { %v5054_v32 = vadd.f32 %v5993_v28, %v5053_v24 }
0x1e3d   : > { %v6380_v4 = vpop.f32.mrf.mxu0 }
0x1e3e   : > { %v5144_v29 = vadd.f32 %v6380_v4, %v5996_v25 }
0x1e3f   : > { %v5138_v30 = vpop.f32.mrf.mxu0 }
0x1e40   : > { %v5148_v34 = vadd.f32 %v5144_v29, %v5059_v26  ;;  %v5139_v60 = vadd.f32 %v5996_v25, %v5138_v30 }
0x1e42   : > { %v6000_v35 = vmul.f32 -1.442695, %v5148_v34  ;;  %v5147_v49 = vadd.f32 %v5139_v60, %v5054_v32  ;;  %v6002_v56 = vadd.f32 -0.1, %v5148_v34 }
0x1e44   : > { %6651 = vpow2.f32 %v6000_v35  ;;  %v5999_v36 = vmul.f32 -1.442695, %v5147_v49  ;;  %v6001_v48 = vadd.f32 -0.1, %v5147_v49  ;;  %v6004_v61 = vmul.f32 -1.442695, %v6002_v56 }
0x1e46   : > { %6653 = vpow2.f32 %v5999_v36  ;;  %v6003_v57 = vmul.f32 -1.442695, %v6001_v48 }
0x1e51   : > { %v6652_v37 = vpop.eup %6651 }
0x1e52   : > { %v5156_v53 = vadd.f32 1.0, %v6652_v37 }
0x1e53   : > { %v6654_v38 = vpop.eup %6653 }
0x1e54   : > { %v5155_v18 = vadd.f32 1.0, %v6654_v38  ;;  %6655 = vrcp.f32 %v5156_v53 }
0x1e56   : > { %6657 = vrcp.f32 %v5155_v18 }
0x1e61   : > { %v6656_v39 = vpop.eup %6655 }
0x1e62   : > { %v5176_v41 = vmul.f32 %v6656_v39, %v8484_v8 }
0x1e63   : > { %v6658_v40 = vpop.eup %6657 }
0x1e64   : > { %v5175_v43 = vmul.f32 %v6658_v40, %v8480_v6 }
0x1e66   : > { %6389 = vmatprep.mubr.msk.f32.mxu1 %vm1578_vm1, %v5175_v43 }
0x1e67   : > { %6390 = vmatmul.mubr.msk.f32.vlgmr.msra.gmra.mxu1 %vm1578_vm1, %v5176_v41 }
0x1f27   : > { %v6391_v44 = vpop.f32.mrf.mxu1 }
0x1f28   : > { %5262 = vrot.lane.b32.xlu1 %v6391_v44, %s7243_s10 }
0x1f29   : > { %v5249_v11 = vpop.f32.mrf.mxu1 }
0x1f2a   : > { %5260 = vrot.lane.b32.xlu0 %v5249_v11, %s7243_s10 }
0x1f2e   : > { %5273 = vrot.lane.b32.xlu0 %v6007_v33, %s7243_s10 }
0x1f9a   : > { %v5263_v52 = vpop.permute.xlu1 %5262 }
0x1f9b   : > { %v5267_v27 = vadd.f32 %v5263_v52, %v5059_v26 }
0x1f9c   : > { %v5261_v45 = vpop.permute.xlu0 %5260 }
0x1f9d   : > { %v5266_v6 = vadd.f32 %v5261_v45, %v5054_v32 }
0x1fa0   : > { %v5274_v47 = vpop.permute.xlu0 %5273 }
0x1fa1   : > { %v5276_v8 = vadd.f32 %v5274_v47, %v5266_v6  ;;  %v5277_v23 = vadd.f32 %v5274_v47, %v5267_v27 }
0x1fa3   : > { %6659 = vtanh.f32 %v5276_v8 }
0x1fa4   : > { %6661 = vtanh.f32 %v5277_v23 }
0x1fa5   : > { %6663 = vpow2.f32 %v6003_v57 }
0x1fa6   : > { %6665 = vpow2.f32 %v6004_v61 }
0x1fb0   : > { %v6660_v55 = vpop.eup %6659 }
0x1fb1   : > { %v6662_v31 = vpop.eup %6661  ;;  %5286 = vrot.lane.b32.xlu1 %v6660_v55, %s7254_s17 }
0x1fb2   : > { %5288 = vrot.lane.b32.xlu0 %v6662_v31, %s7254_s17  ;;  %v6664_v62 = vpop.eup %6663 }
0x1fb3   : > { %v6666_v63 = vpop.eup %6665  ;;  %v5169_v54 = vadd.f32 1.0, %v6664_v62 }
0x1fb4   : > { %v5170_v0 = vadd.f32 1.0, %v6666_v63 }
0x1fb5   : > { %6667 = vrcp.f32 %v5169_v54 }
0x1fb6   : > { %6669 = vrcp.f32 %v5170_v0 }
0x1fc2   : > { %v6668_v59 = vpop.eup %6667 }
0x1fc3   : > { %v6670_v1 = vpop.eup %6669  ;;  %v5280_v20 = vsub.f32 1.0, %v6668_v59 }
0x1fc4   : > { %v5281_v58 = vsub.f32 1.0, %v6670_v1 }
0x1fc5   : > { %v5282_v2 = vmul.f32 %v5280_v20, %v8472_v5 }
0x1fc6   : > { %v5283_v9 = vmul.f32 %v5281_v58, %v8476_v10 }
0x2023   : > { %v5287_v3 = vpop.permute.xlu1 %5286 }
0x2024   : > { %v5289_v50 = vpop.permute.xlu0 %5288  ;;  %v5292_v46 = vmul.f32 %v6668_v59, %v5287_v3 }
0x2025   : > { %v5293_v12 = vmul.f32 %v6670_v1, %v5289_v50 }
0x2026   : > { %v5294_v42 = vadd.f32 %v5292_v46, %v5282_v2 }
0x2027   : > { %v5295_v51 = vadd.f32 %v5293_v12, %v5283_v9 }
0x2028   : > { %5298 = vrot.lane.b32.xlu1 %v5294_v42, %s7254_s17 }
0x2029   : > { %5300 = vrot.lane.b32.xlu0 %v5295_v51, %s7254_s17 }
0x2098   : > { %5309 = sbr.rel (%p6008_p7) target bundleno = 8872 (0x22a8), region = 212 }
0x209a   : > { %v5299_v13 = vpop.permute.xlu1 %5298 }
0x209b   : > { %v5301_v15 = vpop.permute.xlu0 %5300  ;;  %5304 = vst.msk [vmem:[#allocation2] sm:$0xff] %vm1578_vm1, %v5299_v13 }
0x209c   : > { %5305 = vst.msk [vmem:[#allocation2 + $0x8] sm:$0xff] %vm1578_vm1, %v5301_v15 }
0x209d   : > { %v5313_v5 = vld [vmem:[%s8700_s9 + $0x18] sm:$0xff]  ;;  %v5312_v10 = vld [vmem:[%s8700_s9 + $0x10] sm:$0xff]  ;;  %6400 = vmatprep.mubr.msk.f32.mxu0 %vm1578_vm1, %v5299_v13  ;;  %v5311_v16 = vld [vmem:[%s8700_s9 + $0x8] sm:$0xff]  ;;  %vm5400_vm3 = vcmask 31744  }
0x209e   : > { %6392 = vmatprep.subr.mxu0 %v5313_v5  ;;  %v5310_v7 = vld [vmem:[%s8700_s9] sm:$0xff] }
0x209f   : > { %6393 = vmatpush3.msra.mxu0 %v5313_v5  ;;  %v6009_v17 = vld [vmem:[#allocation4] ss:$0 sm:$0xff] }
0x20a0   : > { %6394 = vmatprep.subr.mxu0 %v5312_v10 }
0x20a1   : > { %6395 = vmatpush3.msra.mxu0 %v5312_v10 }
0x20a2   : > { %6396 = vmatprep.subr.mxu0 %v5311_v16 }
0x20a3   : > { %6397 = vmatpush3.msra.mxu0 %v5311_v16 }
0x20a4   : > { %6398 = vmatprep.subr.mxu0 %v5310_v7 }
0x20a5   : > { %6399 = vmatpush3.msra.mxu0 %v5310_v7 }
0x20a6   : > { %6401 = vmatmul.mubr.msk.f32.vlgmr.msra.gmra.mxu0 %vm1578_vm1, %v5301_v15 }
0x2166   : > { %v6402_v14 = vpop.f32.mrf.mxu0 }
0x2167   : > { %v5397_v22 = vadd.f32 %v6402_v14, %v6009_v17 }
0x2168   : > { %v5391_v19 = vpop.f32.mrf.mxu0 }
0x2169   : > { %v5392_v21 = vadd.f32 %v6009_v17, %v5391_v19  ;;  %v5404_v24 = vsel %vm5400_vm3, %v5397_v22, -inf }
0x216b   : > { %v5401_v28 = vsel %vm5400_vm3, %v5392_v21, -inf }
0x216c   : > { %5402 = vmax.xlane.f32.xlu0 %v5401_v28 }
0x2170   : > { %5405 = vmax.xlane.f32.xlu0 %v5404_v24 }
0x21f5   : > { %v5403_v25 = vpop.xlane.xlu0 %5402 }
0x21f6   : > { %v5407_v4 = vsub.f32 %v5392_v21, %v5403_v25 }
0x21f8   : > { %v5409_v26 = vmul.f32 1.442695, %v5407_v4 }
0x21f9   : > { %v5406_v29 = vpop.xlane.xlu0 %5405 }
0x21fa   : > { %6673 = vpow2.f32 %v5409_v26  ;;  %v5408_v30 = vsub.f32 %v5397_v22, %v5406_v29 }
0x21fc   : > { %v5411_v32 = vmul.f32 1.442695, %v5408_v30 }
0x21fe   : > { %6675 = vpow2.f32 %v5411_v32 }
0x2207   : > { %v6674_v34 = vpop.eup %6673 }
0x2208   : > { %v5413_v60 = vsel %vm5400_vm3, %v6674_v34, 0.0 }
0x2209   : > { %5414 = vadd.xlane.f32.xlu1 %v5413_v60 }
0x220b   : > { %v6676_v35 = vpop.eup %6675 }
0x220c   : > { %v5416_v49 = vsel %vm5400_vm3, %v6676_v35, 0.0 }
0x220d   : > { %5417 = vadd.xlane.f32.xlu1 %v5416_v49 }
0x2292   : > { %v5415_v36 = vpop.xlane.xlu1 %5414 }
0x2293   : > { %6677 = vrcp.f32 %v5415_v36 }
0x2296   : > { %v5418_v37 = vpop.xlane.xlu1 %5417 }
0x2297   : > { %6679 = vrcp.f32 %v5418_v37 }
0x22a0   : > { %v6678_v53 = vpop.eup %6677 }
0x22a1   : > { %v5420_v38 = vmul.f32 %v6678_v53, %v6674_v34 }
0x22a3   : > { %5423 = vst.msk [vmem:[%s8701_s15] sm:$0xff] %vm5400_vm3, %v5420_v38 }
0x22a4   : > { %v6680_v18 = vpop.eup %6679 }
0x22a5   : > { %v5422_v39 = vmul.f32 %v6680_v18, %v6676_v35 }
0x22a7   : > { %5424 = vst.msk [vmem:[%s8701_s15 + $0x8] sm:$0xff] %vm5400_vm3, %v5422_v39 }
0x22a8 PF: > { %s8702_s11 = sld [smem:[#allocation65_spill]] }
0x22a9   : > { %s8703_s7 = sld [smem:[#allocation63_spill]] }
0x22aa   : > { %s8704_s0 = sld [smem:[#allocation64_spill]] }
0x22ab   : > { %s8705_s10 = sld [smem:[#allocation66_spill]] }
0x22ae   : > { %p91_p8 = scmp.ge.s32.totalorder %s8702_s11, 4  }
0x22b0   :  { %93 = sbr.rel (!%p91_p8) target bundleno = 77 (0x4d), region = 414 }
0x22b5   :  { %5436 = vsyncpa [#allocation5], 1 }
0x22b6   :  { %5438 = vsyncpa [#allocation5 + $0x1], 1 }
0x22b7   :  { %5439 = vsyncpa [#allocation7], 1 }
0x22b8   :  { %5441 = vsyncpa [#allocation7 + $0x1], 1 }
0x22b9   :  { %5442 = vsyncpa [#allocation10], 1 }
0x22ba   :  { %5444 = vsyncpa [#allocation10 + $0x1], 1 }
0x22bb   :  { %5445 = vsyncpa [#allocation13], 1 }
0x22bc   :  { %5447 = vsyncpa [#allocation13 + $0x1], 1 }
0x22bd   :  { %5448 = vsyncpa [#allocation16], 1 }
0x22be   :  { %5450 = vsyncpa [#allocation16 + $0x1], 1 }
0x22bf   :  { %5451 = vsyncpa [#allocation19], 1 }
0x22c0   :  { %5453 = vsyncpa [#allocation19 + $0x1], 1 }
0x22c1   :  { %5454 = vsyncpa [#allocation22], 1 }
0x22c2   :  { %5456 = vsyncpa [#allocation22 + $0x1], 1 }
0x22c3   :  { %5457 = vsyncpa [#allocation25], 1 }
0x22c4   :  { %5459 = vsyncpa [#allocation25 + $0x1], 1 }
0x22c5   :  { %5460 = vsyncpa [#allocation28], 1 }
0x22c6   :  { %5462 = vsyncpa [#allocation28 + $0x1], 1 }

</bundles_post_ra>
